<compile_context>
chip_gen: v6e
topology: v6e:2x2x1
jax: 0.10.0
libtpu: 0.0.40
codegen_flags: <defaults>
</compile_context>

<pallas_src>
import math
from functools import partial

import jax
import jax.numpy as jnp
from jax import lax
from jax.experimental import pallas as pl
from jax.experimental.pallas import tpu as pltpu

DIM = 64          # ConvODEF(64)
CIN = DIM + 1     # + time channel (folded into the Tb template in-kernel)
CPAD = 128        # lanes: [0:64] = even image channels, [64:128] = odd image
H_MAX = 0.05      # Euler max step of the reference ode_solve
BN_EPS = 1e-5


def _round_up(x, m):
    return (x + m - 1) // m * m


# ---------------------------------------------------------------------------
# Fused kernel: the whole Euler loop of one time segment, fully VMEM-resident.
# ---------------------------------------------------------------------------
def fused_euler_kernel(z0_ref, mask_ref, tb1_ref, w1_ref, g1_ref, b1_ref,
                       tb2_ref, w2_ref, g2_ref, b2_ref, o_ref, xbuf_ref,
                       *, n_steps, t0, dt, Wp, S, inv_count):
    """
    z0_ref:   (R,128) f32   packed initial z (R = round_up(P*Hp*Wp, 8))
    mask_ref: (R,128) f32   lane-dense validity mask (interior rows, real imgs)
    tb?_ref:  (R,128) f32   step-invariant time-bias template (f32 time path)
    w?_ref:   (9,128,128) bf16  block-diagonal 3x3 taps (row-major tap order)
    g?/b?_ref:(1,128) f32   BatchNorm weight/bias duplicated into both halves
    o_ref:    (R,128) f32   output z (VMEM-resident Euler carry)
    xbuf_ref: (XR,128) bf16 shifted conv-input staging (data window at [S,S+R))
    """
    R = o_ref.shape[0]

    # One-time init: halo margins of xbuf stay identically zero forever.
    xbuf_ref[...] = jnp.zeros_like(xbuf_ref)
    o_ref[...] = z0_ref[...]

    def conv_relu_bn(w_ref, tb_ref, g_ref, b_ref, t):
        mask = mask_ref[...]
        # Time-channel contribution initializes the accumulator (no zeros+add).
        acc = t * tb_ref[...]
        # conv3x3(pad=1, no bias): 9 shifted bf16 slices -> accumulating MXU dots.
        for ky in range(3):
            for kx in range(3):
                off = S + (ky - 1) * Wp + (kx - 1)            # static offset
                acc = acc + jnp.dot(xbuf_ref[off:off + R, :],
                                    w_ref[ky * 3 + kx],
                                    preferred_element_type=jnp.float32)
        y = jnp.maximum(acc, 0.0)                             # ReLU
        # BatchNorm2d training batch stats (one-pass, clamped).  The two packed
        # images live in separate lane halves -> combine sums with roll(64).
        ym = mask * y
        s1 = jnp.sum(ym, axis=0, keepdims=True)
        s2 = jnp.sum(ym * y, axis=0, keepdims=True)
        s1 = s1 + pltpu.roll(s1, shift=DIM, axis=1)
        s2 = s2 + pltpu.roll(s2, shift=DIM, axis=1)
        mean = s1 * inv_count
        var = jnp.maximum(s2 * inv_count - mean * mean, 0.0)
        ybn = (y - mean) * lax.rsqrt(var + BN_EPS) * g_ref[...] + b_ref[...]
        return mask * ybn                                     # zero halo rows

    def body(i, carry):
        t = jnp.float32(t0) + jnp.float32(dt) * i.astype(jnp.float32)
        # conv1 input: z (time handled by tb1); single f32->bf16 cast here.
        xbuf_ref[S:S + R, :] = o_ref[...].astype(jnp.bfloat16)
        h1 = conv_relu_bn(w1_ref, tb1_ref, g1_ref, b1_ref, t)
        # conv2 input: h1
        xbuf_ref[S:S + R, :] = h1.astype(jnp.bfloat16)
        dz = conv_relu_bn(w2_ref, tb2_ref, g2_ref, b2_ref, t)
        o_ref[...] = o_ref[...] + jnp.float32(dt) * dz        # Euler update
        return carry

    lax.fori_loop(0, n_steps, body, 0)


# ---------------------------------------------------------------------------
# One-time layout glue (nothing per Euler step).
# ---------------------------------------------------------------------------
def _pack_problem(params, z0_nchw):
    w1, g1, b1, w2, g2, b2 = params          # w: (3,3,65,64) HWIO; g/b: (64,)
    N, C, H, W = z0_nchw.shape
    P = (N + 1) // 2                         # batch pairs (dummy image if odd N)
    Hp, Wp = H + 2, W + 2
    Rd = P * Hp * Wp
    R = _round_up(Rd, 8)

    # z: NCHW -> spatially padded NHWC; images (2p, 2p+1) packed into lane halves.
    z = jnp.transpose(z0_nchw, (0, 2, 3, 1)).astype(jnp.float32)
    z = jnp.pad(z, ((0, 2 * P - N), (1, 1), (1, 1), (0, 0)))
    z = jnp.concatenate([z[0::2], z[1::2]], axis=-1)           # (P,Hp,Wp,128)
    z = jnp.pad(z.reshape(Rd, CPAD), ((0, R - Rd), (0, 0)))

    # Lane-dense validity mask: interior rows x existing (non-dummy) image.
    ys, xs = jnp.arange(Hp), jnp.arange(Wp)
    interior = (((ys >= 1) & (ys <= H))[:, None] &
                ((xs >= 1) & (xs <= W))[None, :]).astype(jnp.float32)
    lane_ok = jnp.repeat((jnp.arange(2 * P) < N).astype(jnp.float32)
                         .reshape(P, 2), DIM, axis=1)           # (P,128)
    mask = interior[None, :, :, None] * lane_ok[:, None, None, :]
    mask = jnp.pad(mask.reshape(Rd, CPAD), ((0, R - Rd), (0, 0)))

    def prep(w_hwio, g, b):
        wz, wt = w_hwio[:, :, :DIM, :], w_hwio[:, :, DIM, :]
        wp = jnp.zeros((3, 3, CPAD, CPAD), jnp.float32)
        wp = wp.at[:, :, :DIM, :DIM].set(wz)                   # even-image block
        wp = wp.at[:, :, DIM:, DIM:].set(wz)                   # odd-image block
        wp = wp.reshape(9, CPAD, CPAD).astype(jnp.bfloat16)
        # Step-invariant time-bias template: conv(interior indicator, w_time).
        indp = jnp.pad(interior, 1)
        tb = jnp.zeros((Hp, Wp, DIM), jnp.float32)
        for ky in range(3):
            for kx in range(3):
                tb = tb + indp[ky:ky + Hp, kx:kx + Wp, None] * wt[ky, kx]
        tb = tb * interior[:, :, None]
        tb = jnp.concatenate([tb, tb], axis=-1)                # both lane halves
        tb = jnp.broadcast_to(tb[None], (P, Hp, Wp, CPAD)).reshape(Rd, CPAD)
        tb = jnp.pad(tb, ((0, R - Rd), (0, 0)))
        gp = jnp.concatenate([g, g]).reshape(1, CPAD).astype(jnp.float32)
        bp = jnp.concatenate([b, b]).reshape(1, CPAD).astype(jnp.float32)
        return wp, tb, gp, bp

    w1p, tb1, g1p, b1p = prep(w1, g1, b1)
    w2p, tb2, g2p, b2p = prep(w2, g2, b2)
    packed = (mask, tb1, w1p, g1p, b1p, tb2, w2p, g2p, b2p)
    dims = dict(N=N, H=H, W=W, P=P, Hp=Hp, Wp=Wp, Rd=Rd, R=R)
    return z, packed, dims


def euler_segment(packed, z, t0, t1, *, N, H, W, R):
    """ode_solve(z, t0, t1, ConvODEF) for one segment: a single pallas_call."""
    mask, tb1, w1p, g1p, b1p, tb2, w2p, g2p, b2p = packed
    Wp = W + 2
    n_steps = int(math.ceil(abs(t1 - t0) / H_MAX))
    dt = (t1 - t0) / n_steps
    S = _round_up(Wp + 1, 16)                    # 16-row-aligned bf16 data start
    xrows = _round_up(S + R + Wp + 1, 16)
    kern = partial(fused_euler_kernel, n_steps=n_steps, t0=float(t0),
                   dt=float(dt), Wp=Wp, S=S, inv_count=1.0 / float(N * H * W))
    return pl.pallas_call(
        kern,
        out_shape=jax.ShapeDtypeStruct((R, CPAD), jnp.float32),
        in_specs=[pl.BlockSpec(memory_space=pltpu.MemorySpace.VMEM)] * 10,
        out_specs=pl.BlockSpec(memory_space=pltpu.MemorySpace.VMEM),
        scratch_shapes=[pltpu.VMEM((xrows, CPAD), jnp.bfloat16)],
    )(z, mask, tb1, w1p, g1p, b1p, tb2, w2p, g2p, b2p)


def neural_ode_forward(params, z0_nchw, t):
    """NeuralODE.forward with return_whole_sequence=False (z at t[-1])."""
    z, packed, d = _pack_problem(params, z0_nchw)
    for i in range(len(t) - 1):
        # TODO(synk): for len(t) > 2 the segments could be fused into one kernel
        # (SMEM breakpoints) and/or z aliased to skip the per-segment init copy.
        z = euler_segment(packed, z, float(t[i]), float(t[i + 1]),
                          N=d["N"], H=d["H"], W=d["W"], R=d["R"])
    N, H, W, P, Hp, Wp, Rd = (d["N"], d["H"], d["W"], d["P"],
                              d["Hp"], d["Wp"], d["Rd"])
    zf = z[:Rd].reshape(P, Hp, Wp, CPAD)
    zall = jnp.stack([zf[..., :DIM], zf[..., DIM:]], axis=1)
    zall = zall.reshape(2 * P, Hp, Wp, DIM)[:N, 1:H + 1, 1:W + 1, :]
    return jnp.transpose(zall, (0, 3, 1, 2))


# ---------------------------------------------------------------------------
# Pure-JAX reference (same arithmetic: bf16 conv for z, f32 time path, one-pass
# batch statistics) for validation.
# ---------------------------------------------------------------------------
def _ref_conv_relu_bn(x_nhwc, tval, w_hwio, gamma, beta):
    N, H, W, C = x_nhwc.shape
    xp = jnp.pad(x_nhwc, ((0, 0), (1, 1), (1, 1), (0, 0)))
    onesp = jnp.pad(jnp.ones((H, W), jnp.float32), ((1, 1), (1, 1)))
    cout = w_hwio.shape[-1]
    acc = jnp.zeros((N, H, W, cout), jnp.float32)
    for ky in range(3):
        for kx in range(3):
            zp = xp[:, ky:ky + H, kx:kx + W, :].astype(jnp.bfloat16)
            acc = acc + jnp.einsum(
                "nhwc,cd->nhwd", zp, w_hwio[ky, kx, :C, :].astype(jnp.bfloat16),
                preferred_element_type=jnp.float32)
            acc = acc + (tval * onesp[ky:ky + H, kx:kx + W])[None, :, :, None] \
                        * w_hwio[ky, kx, C, :]
    y = jnp.maximum(acc, 0.0)
    mean = jnp.mean(y, axis=(0, 1, 2), keepdims=True)
    mean_sq = jnp.mean(y * y, axis=(0, 1, 2), keepdims=True)
    var = jnp.maximum(mean_sq - mean * mean, 0.0)
    return (y - mean) * lax.rsqrt(var + BN_EPS) * gamma + beta


def ref_forward(w1, g1, b1, w2, g2, b2, z0_nchw, t):
    z = jnp.transpose(z0_nchw, (0, 2, 3, 1)).astype(jnp.float32)

    def f(zz, tv):
        h = _ref_conv_relu_bn(zz, tv, w1, g1, b1)
        return _ref_conv_relu_bn(h, tv, w2, g2, b2)

    for i in range(len(t) - 1):
        t0, t1 = float(t[i]), float(t[i + 1])
        n_steps = int(math.ceil(abs(t1 - t0) / H_MAX))
        hh = (t1 - t0) / n_steps

        def body(step, zz):
            tv = jnp.float32(t0) + jnp.float32(hh) * step.astype(jnp.float32)
            return zz + jnp.float32(hh) * f(zz, tv)

        z = lax.fori_loop(0, n_steps, body, z)
    return jnp.transpose(z, (0, 3, 1, 2))


# ---------------------------------------------------------------------------
if __name__ == "__main__":
    N, H, W = 2, 8, 8

    key = jax.random.PRNGKey(0)
    k1, k2, k3 = jax.random.split(key, 3)

    # Deterministic synthetic params (PyTorch-Conv2d-like uniform init), HWIO.
    bound = 1.0 / math.sqrt(CIN * 9)
    w1 = jax.random.uniform(k1, (3, 3, CIN, DIM), jnp.float32, -bound, bound)
    w2 = jax.random.uniform(k2, (3, 3, CIN, DIM), jnp.float32, -bound, bound)
    gamma = jnp.ones((DIM,), jnp.float32)       # BatchNorm2d weight init
    beta = jnp.zeros((DIM,), jnp.float32)       # BatchNorm2d bias init
    params = (w1, gamma, beta, w2, gamma, beta)

    # Input in PyTorch NCHW convention; default t = Tensor([0.0, 1.0]).
    z0 = jax.random.normal(k3, (N, DIM, H, W), jnp.float32)
    t = (0.0, 1.0)

    fwd = jax.jit(neural_ode_forward, static_argnums=(2,))
    out = jax.block_until_ready(fwd(params, z0, t))

    assert out.shape == (N, DIM, H, W), out.shape
    assert bool(jnp.all(jnp.isfinite(out)))

    ref = jax.block_until_ready(
        jax.jit(ref_forward, static_argnums=(7,))(w1, gamma, beta,
                                                  w2, gamma, beta, z0, t))
    err = float(jnp.max(jnp.abs(out - ref)))
    assert err < 5e-2, f"mismatch vs reference: {err}"

    print("KERNEL_OK")
</pallas_src>

<mosaic_0001>
module attributes {stable_mosaic.version = 11 : i64} {
  func.func @fused_euler_kernel(%arg0: memref<104x128xf32, #tpu.memory_space<vmem>>, %arg1: memref<104x128xf32, #tpu.memory_space<vmem>>, %arg2: memref<104x128xf32, #tpu.memory_space<vmem>>, %arg3: memref<9x128x128xbf16, #tpu.memory_space<vmem>>, %arg4: memref<1x128xf32, #tpu.memory_space<vmem>>, %arg5: memref<1x128xf32, #tpu.memory_space<vmem>>, %arg6: memref<104x128xf32, #tpu.memory_space<vmem>>, %arg7: memref<9x128x128xbf16, #tpu.memory_space<vmem>>, %arg8: memref<1x128xf32, #tpu.memory_space<vmem>>, %arg9: memref<1x128xf32, #tpu.memory_space<vmem>>, %arg10: memref<104x128xf32, #tpu.memory_space<vmem>>, %arg11: memref<144x128xbf16, #tpu.memory_space<vmem>>) attributes {dimension_semantics = [], scalar_prefetch = 0 : i64, scratch_operands = 1 : i64, tpu.core_type = #tpu.core_type<tc>} {
    %cst = arith.constant 0.000000e+00 : bf16
    %0 = vector.broadcast %cst : bf16 to vector<144x128xbf16>
    %c0 = arith.constant 0 : index
    %c0_0 = arith.constant 0 : index
    %1 = vector.load %arg11[%c0, %c0_0] : memref<144x128xbf16, #tpu.memory_space<vmem>>, vector<144x128xbf16>
    tpu.vector_store %arg11[%c0, %c0_0], %0 {strides = array<i32>} : memref<144x128xbf16, #tpu.memory_space<vmem>>, vector<144x128xbf16>,
    %c0_1 = arith.constant 0 : index
    %c0_2 = arith.constant 0 : index
    %2 = vector.load %arg0[%c0_1, %c0_2] : memref<104x128xf32, #tpu.memory_space<vmem>>, vector<104x128xf32>
    %c0_3 = arith.constant 0 : index
    %c0_4 = arith.constant 0 : index
    %3 = vector.load %arg10[%c0_3, %c0_4] : memref<104x128xf32, #tpu.memory_space<vmem>>, vector<104x128xf32>
    tpu.vector_store %arg10[%c0_3, %c0_4], %2 {strides = array<i32>} : memref<104x128xf32, #tpu.memory_space<vmem>>, vector<104x128xf32>,
    %c0_i32 = arith.constant 0 : i32
    %c20_i32 = arith.constant 20 : i32
    %4 = arith.addi %c0_i32, %c20_i32 : i32
    %c1_i32 = arith.constant 1 : i32
    scf.for %arg12 = %c0_i32 to %4 step %c1_i32  : i32 {
      %5 = arith.sitofp %arg12 : i32 to f32
      %cst_6 = arith.constant 5.000000e-02 : f32
      %6 = arith.mulf %cst_6, %5 : f32
      %cst_7 = arith.constant 0.000000e+00 : f32
      %7 = arith.addf %cst_7, %6 : f32
      %c0_8 = arith.constant 0 : index
      %c0_9 = arith.constant 0 : index
      %8 = vector.load %arg10[%c0_8, %c0_9] : memref<104x128xf32, #tpu.memory_space<vmem>>, vector<104x128xf32>
      %9 = arith.truncf %8 : vector<104x128xf32> to vector<104x128xbf16>
      %c16 = arith.constant 16 : index
      %c0_10 = arith.constant 0 : index
      %10 = vector.load %arg11[%c16, %c0_10] : memref<144x128xbf16, #tpu.memory_space<vmem>>, vector<104x128xbf16>
      tpu.vector_store %arg11[%c16, %c0_10], %9 {strides = array<i32>} : memref<144x128xbf16, #tpu.memory_space<vmem>>, vector<104x128xbf16>,
      %c0_11 = arith.constant 0 : index
      %c0_12 = arith.constant 0 : index
      %11 = vector.load %arg1[%c0_11, %c0_12] : memref<104x128xf32, #tpu.memory_space<vmem>>, vector<104x128xf32>
      %c0_13 = arith.constant 0 : index
      %c0_14 = arith.constant 0 : index
      %12 = vector.load %arg2[%c0_13, %c0_14] : memref<104x128xf32, #tpu.memory_space<vmem>>, vector<104x128xf32>
      %13 = vector.broadcast %7 : f32 to vector<104x128xf32>
      %14 = arith.mulf %13, %12 : vector<104x128xf32>
      %c5 = arith.constant 5 : index
      %c0_15 = arith.constant 0 : index
      %15 = vector.load %arg11[%c5, %c0_15] : memref<144x128xbf16, #tpu.memory_space<vmem>>, vector<104x128xbf16>
      %c0_16 = arith.constant 0 : index
      %c0_17 = arith.constant 0 : index
      %c0_18 = arith.constant 0 : index
      %16 = vector.load %arg3[%c0_16, %c0_17, %c0_18] : memref<9x128x128xbf16, #tpu.memory_space<vmem>>, vector<1x128x128xbf16>
      %17 = vector.shape_cast %16 : vector<1x128x128xbf16> to vector<128x128xbf16>
      %cst_19 = arith.constant dense<0.000000e+00> : vector<104x128xf32>
      %18 = tpu.matmul %15, %17, %cst_19 {dimension_numbers = #tpu.dot_dimension_numbers<[1], [0], [0], [1], [0, 0, 1, 1], [], []>} : vector<104x128xbf16>, vector<128x128xbf16>, vector<104x128xf32> -> vector<104x128xf32>
      %19 = arith.addf %14, %18 : vector<104x128xf32>
      %c6 = arith.constant 6 : index
      %c0_20 = arith.constant 0 : index
      %20 = vector.load %arg11[%c6, %c0_20] : memref<144x128xbf16, #tpu.memory_space<vmem>>, vector<104x128xbf16>
      %c1 = arith.constant 1 : index
      %c0_21 = arith.constant 0 : index
      %c0_22 = arith.constant 0 : index
      %21 = vector.load %arg3[%c1, %c0_21, %c0_22] : memref<9x128x128xbf16, #tpu.memory_space<vmem>>, vector<1x128x128xbf16>
      %22 = vector.shape_cast %21 : vector<1x128x128xbf16> to vector<128x128xbf16>
      %cst_23 = arith.constant dense<0.000000e+00> : vector<104x128xf32>
      %23 = tpu.matmul %20, %22, %cst_23 {dimension_numbers = #tpu.dot_dimension_numbers<[1], [0], [0], [1], [0, 0, 1, 1], [], []>} : vector<104x128xbf16>, vector<128x128xbf16>, vector<104x128xf32> -> vector<104x128xf32>
      %24 = arith.addf %19, %23 : vector<104x128xf32>
      %c7 = arith.constant 7 : index
      %c0_24 = arith.constant 0 : index
      %25 = vector.load %arg11[%c7, %c0_24] : memref<144x128xbf16, #tpu.memory_space<vmem>>, vector<104x128xbf16>
      %c2 = arith.constant 2 : index
      %c0_25 = arith.constant 0 : index
      %c0_26 = arith.constant 0 : index
      %26 = vector.load %arg3[%c2, %c0_25, %c0_26] : memref<9x128x128xbf16, #tpu.memory_space<vmem>>, vector<1x128x128xbf16>
      %27 = vector.shape_cast %26 : vector<1x128x128xbf16> to vector<128x128xbf16>
      %cst_27 = arith.constant dense<0.000000e+00> : vector<104x128xf32>
      %28 = tpu.matmul %25, %27, %cst_27 {dimension_numbers = #tpu.dot_dimension_numbers<[1], [0], [0], [1], [0, 0, 1, 1], [], []>} : vector<104x128xbf16>, vector<128x128xbf16>, vector<104x128xf32> -> vector<104x128xf32>
      %29 = arith.addf %24, %28 : vector<104x128xf32>
      %c15 = arith.constant 15 : index
      %c0_28 = arith.constant 0 : index
      %30 = vector.load %arg11[%c15, %c0_28] : memref<144x128xbf16, #tpu.memory_space<vmem>>, vector<104x128xbf16>
      %c3 = arith.constant 3 : index
      %c0_29 = arith.constant 0 : index
      %c0_30 = arith.constant 0 : index
      %31 = vector.load %arg3[%c3, %c0_29, %c0_30] : memref<9x128x128xbf16, #tpu.memory_space<vmem>>, vector<1x128x128xbf16>
      %32 = vector.shape_cast %31 : vector<1x128x128xbf16> to vector<128x128xbf16>
      %cst_31 = arith.constant dense<0.000000e+00> : vector<104x128xf32>
      %33 = tpu.matmul %30, %32, %cst_31 {dimension_numbers = #tpu.dot_dimension_numbers<[1], [0], [0], [1], [0, 0, 1, 1], [], []>} : vector<104x128xbf16>, vector<128x128xbf16>, vector<104x128xf32> -> vector<104x128xf32>
      %34 = arith.addf %29, %33 : vector<104x128xf32>
      %c16_32 = arith.constant 16 : index
      %c0_33 = arith.constant 0 : index
      %35 = vector.load %arg11[%c16_32, %c0_33] : memref<144x128xbf16, #tpu.memory_space<vmem>>, vector<104x128xbf16>
      %c4 = arith.constant 4 : index
      %c0_34 = arith.constant 0 : index
      %c0_35 = arith.constant 0 : index
      %36 = vector.load %arg3[%c4, %c0_34, %c0_35] : memref<9x128x128xbf16, #tpu.memory_space<vmem>>, vector<1x128x128xbf16>
      %37 = vector.shape_cast %36 : vector<1x128x128xbf16> to vector<128x128xbf16>
      %cst_36 = arith.constant dense<0.000000e+00> : vector<104x128xf32>
      %38 = tpu.matmul %35, %37, %cst_36 {dimension_numbers = #tpu.dot_dimension_numbers<[1], [0], [0], [1], [0, 0, 1, 1], [], []>} : vector<104x128xbf16>, vector<128x128xbf16>, vector<104x128xf32> -> vector<104x128xf32>
      %39 = arith.addf %34, %38 : vector<104x128xf32>
      %c17 = arith.constant 17 : index
      %c0_37 = arith.constant 0 : index
      %40 = vector.load %arg11[%c17, %c0_37] : memref<144x128xbf16, #tpu.memory_space<vmem>>, vector<104x128xbf16>
      %c5_38 = arith.constant 5 : index
      %c0_39 = arith.constant 0 : index
      %c0_40 = arith.constant 0 : index
      %41 = vector.load %arg3[%c5_38, %c0_39, %c0_40] : memref<9x128x128xbf16, #tpu.memory_space<vmem>>, vector<1x128x128xbf16>
      %42 = vector.shape_cast %41 : vector<1x128x128xbf16> to vector<128x128xbf16>
      %cst_41 = arith.constant dense<0.000000e+00> : vector<104x128xf32>
      %43 = tpu.matmul %40, %42, %cst_41 {dimension_numbers = #tpu.dot_dimension_numbers<[1], [0], [0], [1], [0, 0, 1, 1], [], []>} : vector<104x128xbf16>, vector<128x128xbf16>, vector<104x128xf32> -> vector<104x128xf32>
      %44 = arith.addf %39, %43 : vector<104x128xf32>
      %c25 = arith.constant 25 : index
      %c0_42 = arith.constant 0 : index
      %45 = vector.load %arg11[%c25, %c0_42] : memref<144x128xbf16, #tpu.memory_space<vmem>>, vector<104x128xbf16>
      %c6_43 = arith.constant 6 : index
      %c0_44 = arith.constant 0 : index
      %c0_45 = arith.constant 0 : index
      %46 = vector.load %arg3[%c6_43, %c0_44, %c0_45] : memref<9x128x128xbf16, #tpu.memory_space<vmem>>, vector<1x128x128xbf16>
      %47 = vector.shape_cast %46 : vector<1x128x128xbf16> to vector<128x128xbf16>
      %cst_46 = arith.constant dense<0.000000e+00> : vector<104x128xf32>
      %48 = tpu.matmul %45, %47, %cst_46 {dimension_numbers = #tpu.dot_dimension_numbers<[1], [0], [0], [1], [0, 0, 1, 1], [], []>} : vector<104x128xbf16>, vector<128x128xbf16>, vector<104x128xf32> -> vector<104x128xf32>
      %49 = arith.addf %44, %48 : vector<104x128xf32>
      %c26 = arith.constant 26 : index
      %c0_47 = arith.constant 0 : index
      %50 = vector.load %arg11[%c26, %c0_47] : memref<144x128xbf16, #tpu.memory_space<vmem>>, vector<104x128xbf16>
      %c7_48 = arith.constant 7 : index
      %c0_49 = arith.constant 0 : index
      %c0_50 = arith.constant 0 : index
      %51 = vector.load %arg3[%c7_48, %c0_49, %c0_50] : memref<9x128x128xbf16, #tpu.memory_space<vmem>>, vector<1x128x128xbf16>
      %52 = vector.shape_cast %51 : vector<1x128x128xbf16> to vector<128x128xbf16>
      %cst_51 = arith.constant dense<0.000000e+00> : vector<104x128xf32>
      %53 = tpu.matmul %50, %52, %cst_51 {dimension_numbers = #tpu.dot_dimension_numbers<[1], [0], [0], [1], [0, 0, 1, 1], [], []>} : vector<104x128xbf16>, vector<128x128xbf16>, vector<104x128xf32> -> vector<104x128xf32>
      %54 = arith.addf %49, %53 : vector<104x128xf32>
      %c27 = arith.constant 27 : index
      %c0_52 = arith.constant 0 : index
      %55 = vector.load %arg11[%c27, %c0_52] : memref<144x128xbf16, #tpu.memory_space<vmem>>, vector<104x128xbf16>
      %c8 = arith.constant 8 : index
      %c0_53 = arith.constant 0 : index
      %c0_54 = arith.constant 0 : index
      %56 = vector.load %arg3[%c8, %c0_53, %c0_54] : memref<9x128x128xbf16, #tpu.memory_space<vmem>>, vector<1x128x128xbf16>
      %57 = vector.shape_cast %56 : vector<1x128x128xbf16> to vector<128x128xbf16>
      %cst_55 = arith.constant dense<0.000000e+00> : vector<104x128xf32>
      %58 = tpu.matmul %55, %57, %cst_55 {dimension_numbers = #tpu.dot_dimension_numbers<[1], [0], [0], [1], [0, 0, 1, 1], [], []>} : vector<104x128xbf16>, vector<128x128xbf16>, vector<104x128xf32> -> vector<104x128xf32>
      %59 = arith.addf %54, %58 : vector<104x128xf32>
      %cst_56 = arith.constant 0.000000e+00 : f32
      %60 = vector.broadcast %cst_56 : f32 to vector<104x128xf32>
      %61 = arith.maximumf %59, %60 : vector<104x128xf32>
      %62 = arith.mulf %11, %61 : vector<104x128xf32>
      %cst_57 = arith.constant dense<0.000000e+00> : vector<128xf32>
      %63 = vector.multi_reduction <add>, %62, %cst_57 [0] : vector<104x128xf32> to vector<128xf32>
      %64 = vector.shape_cast %63 : vector<128xf32> to vector<1x128xf32>
      %65 = arith.mulf %62, %61 : vector<104x128xf32>
      %cst_58 = arith.constant dense<0.000000e+00> : vector<128xf32>
      %66 = vector.multi_reduction <add>, %65, %cst_58 [0] : vector<104x128xf32> to vector<128xf32>
      %67 = vector.shape_cast %66 : vector<128xf32> to vector<1x128xf32>
      %c64_i32 = arith.constant 64 : i32
      %68 = tpu.dynamic_rotate %64 by %c64_i32 dim 1 : vector<1x128xf32>, i32 -> vector<1x128xf32>
      %69 = arith.addf %64, %68 : vector<1x128xf32>
      %c64_i32_59 = arith.constant 64 : i32
      %70 = tpu.dynamic_rotate %67 by %c64_i32_59 dim 1 : vector<1x128xf32>, i32 -> vector<1x128xf32>
      %71 = arith.addf %67, %70 : vector<1x128xf32>
      %cst_60 = arith.constant 7.812500e-03 : f32
      %72 = vector.broadcast %cst_60 : f32 to vector<1x128xf32>
      %73 = arith.mulf %69, %72 : vector<1x128xf32>
      %cst_61 = arith.constant 7.812500e-03 : f32
      %74 = vector.broadcast %cst_61 : f32 to vector<1x128xf32>
      %75 = arith.mulf %71, %74 : vector<1x128xf32>
      %76 = arith.mulf %73, %73 : vector<1x128xf32>
      %77 = arith.subf %75, %76 : vector<1x128xf32>
      %cst_62 = arith.constant 0.000000e+00 : f32
      %78 = vector.broadcast %cst_62 : f32 to vector<1x128xf32>
      %79 = arith.maximumf %77, %78 : vector<1x128xf32>
      %80 = vector.broadcast %73 : vector<1x128xf32> to vector<104x128xf32>
      %81 = arith.subf %61, %80 : vector<104x128xf32>
      %cst_63 = arith.constant 9.99999974E-6 : f32
      %82 = vector.broadcast %cst_63 : f32 to vector<1x128xf32>
      %83 = arith.addf %79, %82 : vector<1x128xf32>
      %84 = math.rsqrt %83 : vector<1x128xf32>
      %85 = vector.broadcast %84 : vector<1x128xf32> to vector<104x128xf32>
      %86 = arith.mulf %81, %85 : vector<104x128xf32>
      %c0_64 = arith.constant 0 : index
      %c0_65 = arith.constant 0 : index
      %87 = vector.load %arg4[%c0_64, %c0_65] : memref<1x128xf32, #tpu.memory_space<vmem>>, vector<1x128xf32>
      %88 = vector.broadcast %87 : vector<1x128xf32> to vector<104x128xf32>
      %89 = arith.mulf %86, %88 : vector<104x128xf32>
      %c0_66 = arith.constant 0 : index
      %c0_67 = arith.constant 0 : index
      %90 = vector.load %arg5[%c0_66, %c0_67] : memref<1x128xf32, #tpu.memory_space<vmem>>, vector<1x128xf32>
      %91 = vector.broadcast %90 : vector<1x128xf32> to vector<104x128xf32>
      %92 = arith.addf %89, %91 : vector<104x128xf32>
      %93 = arith.mulf %11, %92 : vector<104x128xf32>
      %94 = arith.truncf %93 : vector<104x128xf32> to vector<104x128xbf16>
      %c16_68 = arith.constant 16 : index
      %c0_69 = arith.constant 0 : index
      %95 = vector.load %arg11[%c16_68, %c0_69] : memref<144x128xbf16, #tpu.memory_space<vmem>>, vector<104x128xbf16>
      tpu.vector_store %arg11[%c16_68, %c0_69], %94 {strides = array<i32>} : memref<144x128xbf16, #tpu.memory_space<vmem>>, vector<104x128xbf16>,
      %c0_70 = arith.constant 0 : index
      %c0_71 = arith.constant 0 : index
      %96 = vector.load %arg1[%c0_70, %c0_71] : memref<104x128xf32, #tpu.memory_space<vmem>>, vector<104x128xf32>
      %c0_72 = arith.constant 0 : index
      %c0_73 = arith.constant 0 : index
      %97 = vector.load %arg6[%c0_72, %c0_73] : memref<104x128xf32, #tpu.memory_space<vmem>>, vector<104x128xf32>
      %98 = vector.broadcast %7 : f32 to vector<104x128xf32>
      %99 = arith.mulf %98, %97 : vector<104x128xf32>
      %c5_74 = arith.constant 5 : index
      %c0_75 = arith.constant 0 : index
      %100 = vector.load %arg11[%c5_74, %c0_75] : memref<144x128xbf16, #tpu.memory_space<vmem>>, vector<104x128xbf16>
      %c0_76 = arith.constant 0 : index
      %c0_77 = arith.constant 0 : index
      %c0_78 = arith.constant 0 : index
      %101 = vector.load %arg7[%c0_76, %c0_77, %c0_78] : memref<9x128x128xbf16, #tpu.memory_space<vmem>>, vector<1x128x128xbf16>
      %102 = vector.shape_cast %101 : vector<1x128x128xbf16> to vector<128x128xbf16>
      %cst_79 = arith.constant dense<0.000000e+00> : vector<104x128xf32>
      %103 = tpu.matmul %100, %102, %cst_79 {dimension_numbers = #tpu.dot_dimension_numbers<[1], [0], [0], [1], [0, 0, 1, 1], [], []>} : vector<104x128xbf16>, vector<128x128xbf16>, vector<104x128xf32> -> vector<104x128xf32>
      %104 = arith.addf %99, %103 : vector<104x128xf32>
      %c6_80 = arith.constant 6 : index
      %c0_81 = arith.constant 0 : index
      %105 = vector.load %arg11[%c6_80, %c0_81] : memref<144x128xbf16, #tpu.memory_space<vmem>>, vector<104x128xbf16>
      %c1_82 = arith.constant 1 : index
      %c0_83 = arith.constant 0 : index
      %c0_84 = arith.constant 0 : index
      %106 = vector.load %arg7[%c1_82, %c0_83, %c0_84] : memref<9x128x128xbf16, #tpu.memory_space<vmem>>, vector<1x128x128xbf16>
      %107 = vector.shape_cast %106 : vector<1x128x128xbf16> to vector<128x128xbf16>
      %cst_85 = arith.constant dense<0.000000e+00> : vector<104x128xf32>
      %108 = tpu.matmul %105, %107, %cst_85 {dimension_numbers = #tpu.dot_dimension_numbers<[1], [0], [0], [1], [0, 0, 1, 1], [], []>} : vector<104x128xbf16>, vector<128x128xbf16>, vector<104x128xf32> -> vector<104x128xf32>
      %109 = arith.addf %104, %108 : vector<104x128xf32>
      %c7_86 = arith.constant 7 : index
      %c0_87 = arith.constant 0 : index
      %110 = vector.load %arg11[%c7_86, %c0_87] : memref<144x128xbf16, #tpu.memory_space<vmem>>, vector<104x128xbf16>
      %c2_88 = arith.constant 2 : index
      %c0_89 = arith.constant 0 : index
      %c0_90 = arith.constant 0 : index
      %111 = vector.load %arg7[%c2_88, %c0_89, %c0_90] : memref<9x128x128xbf16, #tpu.memory_space<vmem>>, vector<1x128x128xbf16>
      %112 = vector.shape_cast %111 : vector<1x128x128xbf16> to vector<128x128xbf16>
      %cst_91 = arith.constant dense<0.000000e+00> : vector<104x128xf32>
      %113 = tpu.matmul %110, %112, %cst_91 {dimension_numbers = #tpu.dot_dimension_numbers<[1], [0], [0], [1], [0, 0, 1, 1], [], []>} : vector<104x128xbf16>, vector<128x128xbf16>, vector<104x128xf32> -> vector<104x128xf32>
      %114 = arith.addf %109, %113 : vector<104x128xf32>
      %c15_92 = arith.constant 15 : index
      %c0_93 = arith.constant 0 : index
      %115 = vector.load %arg11[%c15_92, %c0_93] : memref<144x128xbf16, #tpu.memory_space<vmem>>, vector<104x128xbf16>
      %c3_94 = arith.constant 3 : index
      %c0_95 = arith.constant 0 : index
      %c0_96 = arith.constant 0 : index
      %116 = vector.load %arg7[%c3_94, %c0_95, %c0_96] : memref<9x128x128xbf16, #tpu.memory_space<vmem>>, vector<1x128x128xbf16>
      %117 = vector.shape_cast %116 : vector<1x128x128xbf16> to vector<128x128xbf16>
      %cst_97 = arith.constant dense<0.000000e+00> : vector<104x128xf32>
      %118 = tpu.matmul %115, %117, %cst_97 {dimension_numbers = #tpu.dot_dimension_numbers<[1], [0], [0], [1], [0, 0, 1, 1], [], []>} : vector<104x128xbf16>, vector<128x128xbf16>, vector<104x128xf32> -> vector<104x128xf32>
      %119 = arith.addf %114, %118 : vector<104x128xf32>
      %c16_98 = arith.constant 16 : index
      %c0_99 = arith.constant 0 : index
      %120 = vector.load %arg11[%c16_98, %c0_99] : memref<144x128xbf16, #tpu.memory_space<vmem>>, vector<104x128xbf16>
      %c4_100 = arith.constant 4 : index
      %c0_101 = arith.constant 0 : index
      %c0_102 = arith.constant 0 : index
      %121 = vector.load %arg7[%c4_100, %c0_101, %c0_102] : memref<9x128x128xbf16, #tpu.memory_space<vmem>>, vector<1x128x128xbf16>
      %122 = vector.shape_cast %121 : vector<1x128x128xbf16> to vector<128x128xbf16>
      %cst_103 = arith.constant dense<0.000000e+00> : vector<104x128xf32>
      %123 = tpu.matmul %120, %122, %cst_103 {dimension_numbers = #tpu.dot_dimension_numbers<[1], [0], [0], [1], [0, 0, 1, 1], [], []>} : vector<104x128xbf16>, vector<128x128xbf16>, vector<104x128xf32> -> vector<104x128xf32>
      %124 = arith.addf %119, %123 : vector<104x128xf32>
      %c17_104 = arith.constant 17 : index
      %c0_105 = arith.constant 0 : index
      %125 = vector.load %arg11[%c17_104, %c0_105] : memref<144x128xbf16, #tpu.memory_space<vmem>>, vector<104x128xbf16>
      %c5_106 = arith.constant 5 : index
      %c0_107 = arith.constant 0 : index
      %c0_108 = arith.constant 0 : index
      %126 = vector.load %arg7[%c5_106, %c0_107, %c0_108] : memref<9x128x128xbf16, #tpu.memory_space<vmem>>, vector<1x128x128xbf16>
      %127 = vector.shape_cast %126 : vector<1x128x128xbf16> to vector<128x128xbf16>
      %cst_109 = arith.constant dense<0.000000e+00> : vector<104x128xf32>
      %128 = tpu.matmul %125, %127, %cst_109 {dimension_numbers = #tpu.dot_dimension_numbers<[1], [0], [0], [1], [0, 0, 1, 1], [], []>} : vector<104x128xbf16>, vector<128x128xbf16>, vector<104x128xf32> -> vector<104x128xf32>
      %129 = arith.addf %124, %128 : vector<104x128xf32>
      %c25_110 = arith.constant 25 : index
      %c0_111 = arith.constant 0 : index
      %130 = vector.load %arg11[%c25_110, %c0_111] : memref<144x128xbf16, #tpu.memory_space<vmem>>, vector<104x128xbf16>
      %c6_112 = arith.constant 6 : index
      %c0_113 = arith.constant 0 : index
      %c0_114 = arith.constant 0 : index
      %131 = vector.load %arg7[%c6_112, %c0_113, %c0_114] : memref<9x128x128xbf16, #tpu.memory_space<vmem>>, vector<1x128x128xbf16>
      %132 = vector.shape_cast %131 : vector<1x128x128xbf16> to vector<128x128xbf16>
      %cst_115 = arith.constant dense<0.000000e+00> : vector<104x128xf32>
      %133 = tpu.matmul %130, %132, %cst_115 {dimension_numbers = #tpu.dot_dimension_numbers<[1], [0], [0], [1], [0, 0, 1, 1], [], []>} : vector<104x128xbf16>, vector<128x128xbf16>, vector<104x128xf32> -> vector<104x128xf32>
      %134 = arith.addf %129, %133 : vector<104x128xf32>
      %c26_116 = arith.constant 26 : index
      %c0_117 = arith.constant 0 : index
      %135 = vector.load %arg11[%c26_116, %c0_117] : memref<144x128xbf16, #tpu.memory_space<vmem>>, vector<104x128xbf16>
      %c7_118 = arith.constant 7 : index
      %c0_119 = arith.constant 0 : index
      %c0_120 = arith.constant 0 : index
      %136 = vector.load %arg7[%c7_118, %c0_119, %c0_120] : memref<9x128x128xbf16, #tpu.memory_space<vmem>>, vector<1x128x128xbf16>
      %137 = vector.shape_cast %136 : vector<1x128x128xbf16> to vector<128x128xbf16>
      %cst_121 = arith.constant dense<0.000000e+00> : vector<104x128xf32>
      %138 = tpu.matmul %135, %137, %cst_121 {dimension_numbers = #tpu.dot_dimension_numbers<[1], [0], [0], [1], [0, 0, 1, 1], [], []>} : vector<104x128xbf16>, vector<128x128xbf16>, vector<104x128xf32> -> vector<104x128xf32>
      %139 = arith.addf %134, %138 : vector<104x128xf32>
      %c27_122 = arith.constant 27 : index
      %c0_123 = arith.constant 0 : index
      %140 = vector.load %arg11[%c27_122, %c0_123] : memref<144x128xbf16, #tpu.memory_space<vmem>>, vector<104x128xbf16>
      %c8_124 = arith.constant 8 : index
      %c0_125 = arith.constant 0 : index
      %c0_126 = arith.constant 0 : index
      %141 = vector.load %arg7[%c8_124, %c0_125, %c0_126] : memref<9x128x128xbf16, #tpu.memory_space<vmem>>, vector<1x128x128xbf16>
      %142 = vector.shape_cast %141 : vector<1x128x128xbf16> to vector<128x128xbf16>
      %cst_127 = arith.constant dense<0.000000e+00> : vector<104x128xf32>
      %143 = tpu.matmul %140, %142, %cst_127 {dimension_numbers = #tpu.dot_dimension_numbers<[1], [0], [0], [1], [0, 0, 1, 1], [], []>} : vector<104x128xbf16>, vector<128x128xbf16>, vector<104x128xf32> -> vector<104x128xf32>
      %144 = arith.addf %139, %143 : vector<104x128xf32>
      %cst_128 = arith.constant 0.000000e+00 : f32
      %145 = vector.broadcast %cst_128 : f32 to vector<104x128xf32>
      %146 = arith.maximumf %144, %145 : vector<104x128xf32>
      %147 = arith.mulf %96, %146 : vector<104x128xf32>
      %cst_129 = arith.constant dense<0.000000e+00> : vector<128xf32>
      %148 = vector.multi_reduction <add>, %147, %cst_129 [0] : vector<104x128xf32> to vector<128xf32>
      %149 = vector.shape_cast %148 : vector<128xf32> to vector<1x128xf32>
      %150 = arith.mulf %147, %146 : vector<104x128xf32>
      %cst_130 = arith.constant dense<0.000000e+00> : vector<128xf32>
      %151 = vector.multi_reduction <add>, %150, %cst_130 [0] : vector<104x128xf32> to vector<128xf32>
      %152 = vector.shape_cast %151 : vector<128xf32> to vector<1x128xf32>
      %c64_i32_131 = arith.constant 64 : i32
      %153 = tpu.dynamic_rotate %149 by %c64_i32_131 dim 1 : vector<1x128xf32>, i32 -> vector<1x128xf32>
      %154 = arith.addf %149, %153 : vector<1x128xf32>
      %c64_i32_132 = arith.constant 64 : i32
      %155 = tpu.dynamic_rotate %152 by %c64_i32_132 dim 1 : vector<1x128xf32>, i32 -> vector<1x128xf32>
      %156 = arith.addf %152, %155 : vector<1x128xf32>
      %cst_133 = arith.constant 7.812500e-03 : f32
      %157 = vector.broadcast %cst_133 : f32 to vector<1x128xf32>
      %158 = arith.mulf %154, %157 : vector<1x128xf32>
      %cst_134 = arith.constant 7.812500e-03 : f32
      %159 = vector.broadcast %cst_134 : f32 to vector<1x128xf32>
      %160 = arith.mulf %156, %159 : vector<1x128xf32>
      %161 = arith.mulf %158, %158 : vector<1x128xf32>
      %162 = arith.subf %160, %161 : vector<1x128xf32>
      %cst_135 = arith.constant 0.000000e+00 : f32
      %163 = vector.broadcast %cst_135 : f32 to vector<1x128xf32>
      %164 = arith.maximumf %162, %163 : vector<1x128xf32>
      %165 = vector.broadcast %158 : vector<1x128xf32> to vector<104x128xf32>
      %166 = arith.subf %146, %165 : vector<104x128xf32>
      %cst_136 = arith.constant 9.99999974E-6 : f32
      %167 = vector.broadcast %cst_136 : f32 to vector<1x128xf32>
      %168 = arith.addf %164, %167 : vector<1x128xf32>
      %169 = math.rsqrt %168 : vector<1x128xf32>
      %170 = vector.broadcast %169 : vector<1x128xf32> to vector<104x128xf32>
      %171 = arith.mulf %166, %170 : vector<104x128xf32>
      %c0_137 = arith.constant 0 : index
      %c0_138 = arith.constant 0 : index
      %172 = vector.load %arg8[%c0_137, %c0_138] : memref<1x128xf32, #tpu.memory_space<vmem>>, vector<1x128xf32>
      %173 = vector.broadcast %172 : vector<1x128xf32> to vector<104x128xf32>
      %174 = arith.mulf %171, %173 : vector<104x128xf32>
      %c0_139 = arith.constant 0 : index
      %c0_140 = arith.constant 0 : index
      %175 = vector.load %arg9[%c0_139, %c0_140] : memref<1x128xf32, #tpu.memory_space<vmem>>, vector<1x128xf32>
      %176 = vector.broadcast %175 : vector<1x128xf32> to vector<104x128xf32>
      %177 = arith.addf %174, %176 : vector<104x128xf32>
      %178 = arith.mulf %96, %177 : vector<104x128xf32>
      %c0_141 = arith.constant 0 : index
      %c0_142 = arith.constant 0 : index
      %179 = vector.load %arg10[%c0_141, %c0_142] : memref<104x128xf32, #tpu.memory_space<vmem>>, vector<104x128xf32>
      %cst_143 = arith.constant 5.000000e-02 : f32
      %180 = vector.broadcast %cst_143 : f32 to vector<104x128xf32>
      %181 = arith.mulf %180, %178 : vector<104x128xf32>
      %182 = arith.addf %179, %181 : vector<104x128xf32>
      %c0_144 = arith.constant 0 : index
      %c0_145 = arith.constant 0 : index
      %183 = vector.load %arg10[%c0_144, %c0_145] : memref<104x128xf32, #tpu.memory_space<vmem>>, vector<104x128xf32>
      tpu.vector_store %arg10[%c0_144, %c0_145], %182 {strides = array<i32>} : memref<104x128xf32, #tpu.memory_space<vmem>>, vector<104x128xf32>,
    }
    %c20_i32_5 = arith.constant 20 : i32
    return
  }
}

</mosaic_0001>

<bundles_post_ra>
// kernel: neural_ode_forward.1
= control target key start
LH: loop header
LB: loop body
LE: loop exit
PB: predicated region body
PF: predicated region fallthrough
CT: control target
= control target key end

     0   :  { %v6862_v0 = vmov 0   ;;  %s6999_s25 = smov 0   ;;  %s9276_s1 = inlined_call_operand.vmem [shape: f32[104,128], index: 1, kind: input, shape index: {}]   ;;  %s9277_s2 = inlined_call_operand.vmem [shape: f32[104,128], index: 2, kind: input, shape index: {}]   ;;  %s9278_s3 = inlined_call_operand.vmem [shape: bf16[9,128,128], index: 3, kind: input, shape index: {}]   ;;  %s9279_s4 = inlined_call_operand.vmem [shape: f32[1,128], index: 4, kind: input, shape index: {}]   ;;  %s9280_s5 = inlined_call_operand.vmem [shape: f32[1,128], index: 5, kind: input, shape index: {}]   ;;  %s9281_s6 = inlined_call_operand.vmem [shape: f32[104,128], index: 6, kind: input, shape index: {}]   ;;  %s9282_s7 = inlined_call_operand.vmem [shape: bf16[9,128,128], index: 7, kind: input, shape index: {}]   ;;  %s9283_s8 = inlined_call_operand.vmem [shape: f32[1,128], index: 8, kind: input, shape index: {}]   ;;  %s9284_s9 = inlined_call_operand.vmem [shape: f32[1,128], index: 9, kind: input, shape index: {}]   ;;  %s9285_s0 = inlined_call_operand.vmem [shape: f32[104,128], index: 0, kind: input, shape index: {}]   ;;  %s9286_s10 = inlined_call_operand.vmem [shape: f32[104,128], index: 10, kind: output, shape index: {}]  }
   0x1   :  { %36 = vst [vmem:[#allocation2] sm:$0xf] %v6862_v0  ;;  %37 = vst [vmem:[#allocation2 + $0x4] sm:$0xf] %v6862_v0  ;;  %v54_v1 = vld [vmem:[%s9285_s0] sm:$0xff]  ;;  %v55_v2 = vld [vmem:[%s9285_s0 + $0x8] sm:$0xff] }
   0x2   :  { %38 = vst [vmem:[#allocation2 + $0x8] sm:$0xf] %v6862_v0  ;;  %39 = vst [vmem:[#allocation2 + $0xc] sm:$0xf] %v6862_v0  ;;  %v56_v3 = vld [vmem:[%s9285_s0 + $0x10] sm:$0xff]  ;;  %v57_v4 = vld [vmem:[%s9285_s0 + $0x18] sm:$0xff] }
   0x3   :  { %40 = vst [vmem:[#allocation2 + $0x10] sm:$0xf] %v6862_v0  ;;  %41 = vst [vmem:[#allocation2 + $0x14] sm:$0xf] %v6862_v0  ;;  %v58_v5 = vld [vmem:[%s9285_s0 + $0x20] sm:$0xff]  ;;  %v59_v6 = vld [vmem:[%s9285_s0 + $0x28] sm:$0xff] }
   0x4   :  { %42 = vst [vmem:[#allocation2 + $0x18] sm:$0xf] %v6862_v0  ;;  %43 = vst [vmem:[#allocation2 + $0x1c] sm:$0xf] %v6862_v0  ;;  %v60_v7 = vld [vmem:[%s9285_s0 + $0x30] sm:$0xff]  ;;  %v61_v8 = vld [vmem:[%s9285_s0 + $0x38] sm:$0xff] }
   0x5   :  { %44 = vst [vmem:[#allocation2 + $0x20] sm:$0xf] %v6862_v0  ;;  %45 = vst [vmem:[#allocation2 + $0x24] sm:$0xf] %v6862_v0  ;;  %v62_v9 = vld [vmem:[%s9285_s0 + $0x40] sm:$0xff]  ;;  %v63_v10 = vld [vmem:[%s9285_s0 + $0x48] sm:$0xff] }
   0x6   :  { %46 = vst [vmem:[#allocation2 + $0x28] sm:$0xf] %v6862_v0  ;;  %47 = vst [vmem:[#allocation2 + $0x2c] sm:$0xf] %v6862_v0  ;;  %v64_v11 = vld [vmem:[%s9285_s0 + $0x50] sm:$0xff]  ;;  %v65_v12 = vld [vmem:[%s9285_s0 + $0x58] sm:$0xff] }
   0x7   :  { %48 = vst [vmem:[#allocation2 + $0x30] sm:$0xf] %v6862_v0  ;;  %49 = vst [vmem:[#allocation2 + $0x34] sm:$0xf] %v6862_v0  ;;  %v66_v13 = vld [vmem:[%s9285_s0 + $0x60] sm:$0xff] }
   0x8   :  { %50 = vst [vmem:[#allocation2 + $0x38] sm:$0xf] %v6862_v0  ;;  %51 = vst [vmem:[#allocation2 + $0x3c] sm:$0xf] %v6862_v0 }
   0x9   :  { %52 = vst [vmem:[#allocation2 + $0x40] sm:$0xf] %v6862_v0  ;;  %67 = vst [vmem:[%s9286_s10] sm:$0xff] %v54_v1 }
   0xa   :  { %68 = vst [vmem:[%s9286_s10 + $0x8] sm:$0xff] %v55_v2  ;;  %69 = vst [vmem:[%s9286_s10 + $0x10] sm:$0xff] %v56_v3 }
   0xb   :  { %70 = vst [vmem:[%s9286_s10 + $0x18] sm:$0xff] %v57_v4  ;;  %71 = vst [vmem:[%s9286_s10 + $0x20] sm:$0xff] %v58_v5 }
   0xc   :  { %72 = vst [vmem:[%s9286_s10 + $0x28] sm:$0xff] %v59_v6  ;;  %73 = vst [vmem:[%s9286_s10 + $0x30] sm:$0xff] %v60_v7 }
   0xd   :  { %74 = vst [vmem:[%s9286_s10 + $0x38] sm:$0xff] %v61_v8  ;;  %75 = vst [vmem:[%s9286_s10 + $0x40] sm:$0xff] %v62_v9 }
   0xe   :  { %76 = vst [vmem:[%s9286_s10 + $0x48] sm:$0xff] %v63_v10  ;;  %77 = vst [vmem:[%s9286_s10 + $0x50] sm:$0xff] %v64_v11 }
   0xf   :  { %78 = vst [vmem:[%s9286_s10 + $0x58] sm:$0xff] %v65_v12  ;;  %79 = vst [vmem:[%s9286_s10 + $0x60] sm:$0xff] %v66_v13 }
  0x10 LB: > { %v6628_v14 = vld [vmem:[%s9278_s3 + $0x38] sm:$0xff]   ;;  %v6863_v15 = vmov 0.0   ;;  %v6630_v17 = vld [vmem:[%s9278_s3 + $0x30] sm:$0xff]   ;;  %vm6864_vm0 = vmmov 0   ;;  %v6632_v19 = vld [vmem:[%s9278_s3 + $0x28] sm:$0xff]   ;;  %vm513_vm2 = vcmask 1044480   ;;  %s86_s0 = scvt.s32.f32 %s6860_s25  ;;  %s6860_s25 = sphi %s6999_s25, %s85_s25  }
  0x11   : > { %5824 = vmatprep.subr.bf16.mxu0 %v6863_v15  ;;  %5868 = vmatprep.subr.bf16.mxu1 %v6863_v15  ;;  %v6629_v16 = vld [vmem:[%s9278_s3 + $0x78] sm:$0xff]   ;;  %v6631_v18 = vld [vmem:[%s9278_s3 + $0x70] sm:$0xff]   ;;  %v6633_v20 = vld [vmem:[%s9278_s3 + $0x68] sm:$0xff]   ;;  %vm273_vm1 = vsmask.f32 5376  ;;  %vm1938_vm5 = vcmask 1046528  }
  0x12   : > { %5825 = vmatpush3.bf16.msra.mxu0 %v6628_v14  ;;  %5840 = vmatprep.mubr.msk.bf16.mxu0 %vm6864_vm0, %v6863_v15  ;;  %v6634_v21 = vld [vmem:[%s9278_s3 + $0x20] sm:$0xff]   ;;  %v6636_v23 = vld [vmem:[%s9278_s3 + $0x18] sm:$0xff]   ;;  %v90_v26 = vld [vmem:[%s9286_s10 + $0x8] sm:$0xff]  ;;  %vm704_vm3 = vsmask.f32 4352  ;;  %s6865_s11 = smov 64  }
  0x13   : > { %5869 = vmatpush3.bf16.msra.mxu1 %v6629_v16  ;;  %5826 = vmatprep.subr.bf16.mxu0 %v6863_v15  ;;  %v6635_v22 = vld [vmem:[%s9278_s3 + $0x60] sm:$0xff]   ;;  %v6637_v24 = vld [vmem:[%s9278_s3 + $0x58] sm:$0xff]   ;;  %v6638_v30 = vld [vmem:[%s9278_s3 + $0x10] sm:$0xff]   ;;  %vm1428_vm4 = vsmask.f32 7424  ;;  %s85_s25 = sadd.s32 1, %s6860_s25  }
  0x14   : > { %5870 = vmatprep.subr.bf16.mxu1 %v6863_v15  ;;  %5884 = vmatprep.mubr.msk.bf16.mxu1 %vm6864_vm0, %v6863_v15  ;;  %v89_v25 = vld [vmem:[%s9286_s10] sm:$0xff]  ;;  %v6639_v31 = vld [vmem:[%s9278_s3 + $0x50] sm:$0xff]   ;;  %v92_v34 = vld [vmem:[%s9286_s10 + $0x18] sm:$0xff]  ;;  %s87_s30 = smul.f32 0.05, %s86_s0  ;;  %p82_p0 = scmp.ge.s32.totalorder %s85_s25, 20  }
  0x15   : > { %v208_v27 = vld [vmem:[#allocation2] sm:$0xc]  ;;  %v5485_v28 = vpack.c.bf16 %v90_v26, %v89_v25  ;;  %v209_v29 = vld [vmem:[#allocation2 + $0x4] sm:$0xf]  ;;  %v91_v33 = vld [vmem:[%s9286_s10 + $0x10] sm:$0xff] }
  0x16   : > { %5827 = vmatpush3.bf16.msra.mxu0 %v6630_v17  ;;  %v4961_v32 = vcombine.low %v208_v27, %v209_v29  ;;  %v492_v35 = vld [vmem:[#allocation2] sm:$0x8]  ;;  %v5490_v36 = vpack.c.bf16 %v92_v34, %v91_v33  ;;  %v94_v39 = vld [vmem:[%s9286_s10 + $0x28] sm:$0xff]  ;;  %v95_v45 = vld [vmem:[%s9286_s10 + $0x30] sm:$0xff]  ;;  %vm2129_vm6 = vsmask.f32 6400 }
  0x17   : > { %5871 = vmatpush3.bf16.msra.mxu1 %v6631_v18  ;;  %5828 = vmatprep.subr.bf16.mxu0 %v6863_v15  ;;  %5542 = vst [vmem:[#allocation2 + $0x8] sm:$0xff] %v5485_v28   ;;  %v93_v38 = vld [vmem:[%s9286_s10 + $0x20] sm:$0xff]  ;;  %v6640_v40 = vld [vmem:[%s9278_s3 + $0x8] sm:$0xff]   ;;  %v7081_v44 = vcombine.low %v492_v35, %v209_v29  ;;  %v96_v46 = vld [vmem:[%s9286_s10 + $0x38] sm:$0xff] }
  0x18   : > { %5872 = vmatprep.subr.bf16.mxu1 %v6863_v15  ;;  %v275_v37 = vshrl.u32 %v4961_v32, 16  ;;  %v278_v41 = vshll.u32 %v4961_v32, 16  ;;  %5543 = vst [vmem:[#allocation2 + $0x10] sm:$0xff] %v5490_v36   ;;  %v5495_v42 = vpack.c.bf16 %v94_v39, %v93_v38  ;;  %v6641_v43 = vld [vmem:[%s9278_s3 + $0x48] sm:$0xff]   ;;  %v5500_v47 = vpack.c.bf16 %v96_v46, %v95_v45  ;;  %v6642_v48 = vld [vmem:[%s9278_s3] sm:$0xff]   ;;  %v6646_v0 = vld [vmem:[%s9278_s3 + $0xb8] sm:$0xff]  }
  0x19   : > { %v6643_v52 = vld [vmem:[%s9278_s3 + $0x40] sm:$0xff]   ;;  %v514_v53 = vrot.slane %v7081_v44, 3  ;;  %v98_v58 = vld [vmem:[%s9286_s10 + $0x48] sm:$0xff]  ;;  %v6654_v8 = vld [vmem:[%s9278_s3 + $0xf8] sm:$0xff]  }
  0x1a   : > { %5829 = vmatpush3.bf16.msra.mxu0 %v6632_v19  ;;  %5544 = vst [vmem:[#allocation2 + $0x18] sm:$0xff] %v5495_v42   ;;  %v277_v49 = vrot.slane %v275_v37, 2  ;;  %v280_v51 = vrot.slane %v278_v41, 3  ;;  %5545 = vst [vmem:[#allocation2 + $0x20] sm:$0xff] %v5500_v47   ;;  %v97_v57 = vld [vmem:[%s9286_s10 + $0x40] sm:$0xff]  ;;  %v99_v11 = vld [vmem:[%s9286_s10 + $0x50] sm:$0xff] }
  0x1b   : > { %5873 = vmatpush3.bf16.msra.mxu1 %v6633_v20  ;;  %5830 = vmatprep.subr.bf16.mxu0 %v6863_v15  ;;  %v5505_v60 = vpack.c.bf16 %v98_v58, %v97_v57  ;;  %v6649_v13 = vld [vmem:[%s9278_s3 + $0xb0] sm:$0xff]   ;;  %v100_v17 = vld [vmem:[%s9286_s10 + $0x58] sm:$0xff]  ;;  %v6658_v26 = vld [vmem:[%s9278_s3 + $0xe8] sm:$0xff]  }
  0x1c   : > { %5874 = vmatprep.subr.bf16.mxu1 %v6863_v15  ;;  %v281_v61 = vor.u32 %v280_v51, %v277_v49  ;;  %v6656_v18 = vld [vmem:[%s9278_s3 + $0xf0] sm:$0xff]   ;;  %v5510_v19 = vpack.c.bf16 %v100_v17, %v99_v11  ;;  %v6652_v28 = vld [vmem:[%s9278_s3 + $0xa0] sm:$0xff]   ;;  %v6655_v38 = vld [vmem:[%s9278_s3 + $0x98] sm:$0xff]  }
  0x1d   : > { %5546 = vst [vmem:[#allocation2 + $0x28] sm:$0xff] %v5505_v60   ;;  %v6660_v32 = vld [vmem:[%s9278_s3 + $0xe0] sm:$0xff]   ;;  %v6663_v39 = vld [vmem:[%s9278_s3 + $0xd8] sm:$0xff]   ;;  %v6659_v45 = vld [vmem:[%s9278_s3 + $0x90] sm:$0xff]  }
  0x1e   : > { %5831 = vmatpush3.bf16.msra.mxu0 %v6634_v21  ;;  %v7093_v50 = vld [vmem:[#allocation2 + $0x8] sm:$0xff]   ;;  %5547 = vst [vmem:[#allocation2 + $0x30] sm:$0xff] %v5510_v19   ;;  %v898_v11 = vld [vmem:[#allocation2 + $0x4] sm:$0x8] }
  0x1f   : > { %5875 = vmatpush3.bf16.msra.mxu1 %v6635_v22  ;;  %5832 = vmatprep.subr.bf16.mxu0 %v6863_v15  ;;  %v283_v54 = vshrl.u32 %v7093_v50, 16  ;;  %v286_v55 = vshll.u32 %v7093_v50, 16  ;;  %v515_v56 = vrot.slane %v7093_v50, 3  ;;  %v7110_v59 = vld [vmem:[#allocation2 + $0x10] sm:$0xff]   ;;  %v6650_v21 = vld [vmem:[%s9278_s3 + $0xa8] sm:$0xff]  }
  0x20   : > { %5876 = vmatprep.subr.bf16.mxu1 %v6863_v15  ;;  %v292_v2 = vshrl.u32 %v7110_v59, 16  ;;  %v295_v3 = vshll.u32 %v7110_v59, 16  ;;  %v517_v10 = vrot.slane %v7110_v59, 3  ;;  %v6666_v58 = vld [vmem:[%s9278_s3 + $0xc8] sm:$0xff]   ;;  %v7267_v19 = vld [vmem:[#allocation2 + $0x10] sm:$0xf] }
  0x21   : > { %v285_v62 = vrot.slane %v283_v54, 2  ;;  %v288_v63 = vrot.slane %v286_v55, 3  ;;  %v516_v1 = vsel %vm513_vm2, %v514_v53, %v515_v56  ;;  %v7123_v4 = vld [vmem:[#allocation2 + $0x18] sm:$0xff]   ;;  %v7164_v25 = vld [vmem:[#allocation2 + $0x20] sm:$0xff]   ;;  %v6662_v53 = vld [vmem:[%s9278_s3 + $0x88] sm:$0xff]  }
  0x22   : > { %5833 = vmatpush3.bf16.msra.mxu0 %v6636_v23  ;;  %v294_v6 = vrot.slane %v292_v2, 2  ;;  %v297_v7 = vrot.slane %v295_v3, 3  ;;  %v301_v14 = vshrl.u32 %v7123_v4, 16  ;;  %v304_v16 = vshll.u32 %v7123_v4, 16 }
  0x23   : > { %5877 = vmatpush3.bf16.msra.mxu1 %v6637_v24  ;;  %5834 = vmatprep.subr.bf16.mxu0 %v6863_v15  ;;  %v289_v5 = vor.u32 %v288_v63, %v285_v62  ;;  %v518_v20 = vsel %vm513_vm2, %v515_v56, %v517_v10  ;;  %v519_v27 = vrot.slane %v7123_v4, 3  ;;  %v6665_v63 = vld [vmem:[%s9278_s3 + $0x80] sm:$0xff]  }
  0x24   : > { %5878 = vmatprep.subr.bf16.mxu1 %v6863_v15  ;;  %v298_v12 = vor.u32 %v297_v7, %v294_v6  ;;  %v303_v23 = vrot.slane %v301_v14, 2  ;;  %v306_v24 = vrot.slane %v304_v16, 3  ;;  %v7187_v34 = vld [vmem:[#allocation2 + $0x28] sm:$0xff]   ;;  %v101_v6 = vld [vmem:[%s9286_s10 + $0x60] sm:$0xff] }
  0x25   : > { %v290_v9 = vsel %vm273_vm1, %v281_v61, %v289_v5  ;;  %v520_v33 = vsel %vm513_vm2, %v517_v10, %v519_v27  ;;  %v319_v41 = vshrl.u32 %v7187_v34, 16  ;;  %v7212_v46 = vld [vmem:[#allocation2 + $0x30] sm:$0xf]  ;;  %v221_v47 = vld [vmem:[#allocation2 + $0x34] sm:$0x7]  ;;  %v523_v60 = vrot.slane %v7187_v34, 3 }
  0x26   : > { %5835 = vmatpush3.bf16.msra.mxu0 %v6638_v30  ;;  %v299_v22 = vsel %vm273_vm1, %v289_v5, %v298_v12  ;;  %v307_v29 = vor.u32 %v306_v24, %v303_v23  ;;  %v310_v30 = vshrl.u32 %v7164_v25, 16  ;;  %v5468_v10 = vpack.c.bf16 %v101_v6, %v101_v6 }
  0x27   : > { %5879 = vmatpush3.bf16.msra.mxu1 %v6639_v31  ;;  %5836 = vmatprep.subr.bf16.mxu0 %v6863_v15  ;;  %v313_v31 = vshll.u32 %v7164_v25, 16  ;;  %v321_v51 = vrot.slane %v319_v41, 2  ;;  %v706_v24 = vshrl.u32 %v7081_v44, 16 }
  0x28   : > { %5880 = vmatprep.subr.bf16.mxu1 %v6863_v15  ;;  %v308_v35 = vsel %vm273_vm1, %v298_v12, %v307_v29  ;;  %v312_v36 = vrot.slane %v310_v30, 2  ;;  %167 = vst [vmem:[#allocation2 + $0x38] sm:$0xf] %v5468_v10 }
  0x29   : > { %v315_v37 = vrot.slane %v313_v31, 3 }
  0x2a   : > { %5837 = vmatpush3.bf16.msra.mxu0 %v6640_v40  ;;  %v521_v40 = vrot.slane %v7164_v25, 3 }
  0x2b   : > { %5881 = vmatpush3.bf16.msra.mxu1 %v6641_v43  ;;  %5838 = vmatprep.subr.bf16.mxu0 %v6863_v15  ;;  %v316_v42 = vor.u32 %v315_v37, %v312_v36  ;;  %v322_v43 = vshll.u32 %v7187_v34, 16  ;;  %v708_v36 = vrot.slane %v706_v24, 3  ;;  %v6681_v24 = vld [vmem:[%s9278_s3 + $0x168] sm:$0xff]  }
  0x2c   : > { %5882 = vmatprep.subr.bf16.mxu1 %v6863_v15  ;;  %v522_v49 = vsel %vm513_vm2, %v519_v27, %v521_v40  ;;  %v524_v5 = vsel %vm513_vm2, %v521_v40, %v523_v60 }
  0x2d   : > { %v317_v56 = vsel %vm273_vm1, %v307_v29, %v316_v42  ;;  %v324_v57 = vrot.slane %v322_v43, 3 }
  0x2e   : > { %5839 = vmatpush3.bf16.msra.mxu0 %v6642_v48  ;;  %v6664_v48 = vld [vmem:[%s9278_s3 + $0xd0] sm:$0xff]  }
  0x2f   : > { %5883 = vmatpush3.bf16.msra.mxu1 %v6643_v52  ;;  %5912 = vmatprep.subr.bf16.mxu0 %v6863_v15  ;;  %v7223_v52 = vcombine.low %v7212_v46, %v221_v47 }
  0x30   : > { %5956 = vmatprep.subr.bf16.mxu1 %v6863_v15 }
  0x31   : > { %5841 = vmatmul.mubr.bf16.vlgmr.msra.gmra.mxu0 %v290_v9  ;;  %v328_v61 = vshrl.u32 %v7223_v52, 16  ;;  %v331_v62 = vshll.u32 %v7223_v52, 16  ;;  %v525_v12 = vrot.slane %v7223_v52, 3 }
  0x32   : > { %5885 = vmatmul.mubr.bf16.vlgmr.msra.gmra.mxu1 %v516_v1  ;;  %5913 = vmatpush3.bf16.msra.mxu0 %v6646_v0  ;;  %v325_v0 = vor.u32 %v324_v57, %v321_v51  ;;  %v6667_v1 = vld [vmem:[%s9278_s3 + $0xc0] sm:$0xff]  }
  0x33   : > { %5888 = vmatprep.mubr.msk.bf16.mxu1 %vm6864_vm0, %v6863_v15  ;;  %5844 = vmatprep.mubr.msk.bf16.mxu0 %vm6864_vm0, %v6863_v15  ;;  %v333_v9 = vrot.slane %v331_v62, 3 }
  0x34   : > { %5914 = vmatprep.subr.bf16.mxu0 %v6863_v15  ;;  %5957 = vmatpush3.bf16.msra.mxu1 %v6654_v8  ;;  %v326_v7 = vsel %vm273_vm1, %v316_v42, %v325_v0  ;;  %v330_v8 = vrot.slane %v328_v61, 2 }
  0x35   : > { %5958 = vmatprep.subr.bf16.mxu1 %v6863_v15 }
  0x36   : > { %5915 = vmatpush3.bf16.msra.mxu0 %v6649_v13  ;;  %v7258_v13 = vld [vmem:[#allocation2 + $0x8] sm:$0xf]  ;;  %v334_v17 = vor.u32 %v333_v9, %v330_v8  ;;  %v6679_v9 = vld [vmem:[%s9278_s3 + $0x170] sm:$0xff]  }
  0x37   : > { %5916 = vmatprep.subr.bf16.mxu0 %v6863_v15 }
  0x38   : > { %5959 = vmatpush3.bf16.msra.mxu1 %v6656_v18  ;;  %v7265_v18 = vld [vmem:[#allocation2 + $0xc] sm:$0xf]  ;;  %v335_v23 = vsel %vm273_vm1, %v325_v0, %v334_v17  ;;  %v718_v0 = vrot.slane %v295_v3, 4  ;;  %v7321_v3 = vld [vmem:[#allocation2 + $0x28] sm:$0xf] }
  0x39   : > { %5960 = vmatprep.subr.bf16.mxu1 %v6863_v15  ;;  %5845 = vmatmul.mubr.bf16.gmra.mxu0 %v299_v22  ;;  %v5043_v22 = vcombine.low %v7265_v18, %v7267_v19 }
  0x3a   : > { %5889 = vmatmul.mubr.bf16.gmra.mxu1 %v518_v20  ;;  %5848 = vmatprep.mubr.msk.bf16.mxu0 %vm6864_vm0, %v6863_v15  ;;  %v5042_v20 = vcombine.low %v898_v11, %v7258_v13  ;;  %v6673_v11 = vld [vmem:[%s9278_s3 + $0x128] sm:$0xff]  }
  0x3b   : > { %5892 = vmatprep.mubr.msk.bf16.mxu1 %vm6864_vm0, %v6863_v15  ;;  %5917 = vmatpush3.bf16.msra.mxu0 %v6650_v21  ;;  %v526_v21 = vsel %vm513_vm2, %v523_v60, %v525_v12  ;;  %v973_v29 = vshrl.u32 %v5043_v22, 16 }
  0x3c   : > { %5918 = vmatprep.subr.bf16.mxu0 %v6863_v15  ;;  %5961 = vmatpush3.bf16.msra.mxu1 %v6658_v26  ;;  %v709_v26 = vshll.u32 %v7081_v44, 16  ;;  %v965_v27 = vshrl.u32 %v5042_v20, 16  ;;  %v713_v44 = vrot.slane %v283_v54, 3 }
  0x3d   : > { %5962 = vmatprep.subr.bf16.mxu1 %v6863_v15  ;;  %v975_v42 = vrot.slane %v973_v29, 3  ;;  %v6675_v29 = vld [vmem:[%s9278_s3 + $0x120] sm:$0xff]  }
  0x3e   : > { %v711_v37 = vrot.slane %v709_v26, 4  ;;  %v7343_v26 = vld [vmem:[#allocation2 + $0x2c] sm:$0xf] }
  0x3f   : > { %5919 = vmatpush3.bf16.msra.mxu0 %v6652_v28  ;;  %v968_v28 = vshll.u32 %v5042_v20, 16 }
  0x40   : > { %5920 = vmatprep.subr.bf16.mxu0 %v6863_v15  ;;  %5963 = vmatpush3.bf16.msra.mxu1 %v6660_v32  ;;  %v976_v32 = vshll.u32 %v5043_v22, 16  ;;  %v712_v50 = vor.u32 %v711_v37, %v708_v36  ;;  %v721_v22 = vrot.slane %v301_v14, 3  ;;  %v6683_v36 = vld [vmem:[%s9278_s3 + $0x160] sm:$0xff]   ;;  %v6678_v37 = vld [vmem:[%s9278_s3 + $0x118] sm:$0xff]  }
  0x41   : > { %5964 = vmatprep.subr.bf16.mxu1 %v6863_v15  ;;  %5849 = vmatmul.mubr.bf16.gmra.mxu0 %v308_v35  ;;  %v7282_v35 = vld [vmem:[#allocation2 + $0x18] sm:$0xf]  ;;  %v970_v40 = vrot.slane %v968_v28, 4 }
  0x42   : > { %5893 = vmatmul.mubr.bf16.gmra.mxu1 %v520_v33  ;;  %5852 = vmatprep.mubr.msk.bf16.mxu0 %vm6864_vm0, %v6863_v15  ;;  %v7280_v33 = vld [vmem:[#allocation2 + $0x14] sm:$0xf] }
  0x43   : > { %5896 = vmatprep.mubr.msk.bf16.mxu1 %vm6864_vm0, %v6863_v15  ;;  %5921 = vmatpush3.bf16.msra.mxu0 %v6655_v38  ;;  %v714_v38 = vrot.slane %v286_v55, 4  ;;  %v5044_v47 = vcombine.low %v7280_v33, %v7282_v35 }
  0x44   : > { %5922 = vmatprep.subr.bf16.mxu0 %v6863_v15  ;;  %5965 = vmatpush3.bf16.msra.mxu1 %v6663_v39  ;;  %v967_v39 = vrot.slane %v965_v27, 3  ;;  %v7345_v27 = vld [vmem:[#allocation2 + $0x30] sm:$0xf] }
  0x45   : > { %5966 = vmatprep.subr.bf16.mxu1 %v6863_v15  ;;  %v982_v54 = vshrl.u32 %v5044_v47, 16  ;;  %v985_v52 = vshll.u32 %v5044_v47, 16  ;;  %v715_v55 = vor.u32 %v714_v38, %v713_v44 }
  0x47   : > { %5923 = vmatpush3.bf16.msra.mxu0 %v6659_v45  ;;  %v978_v45 = vrot.slane %v976_v32, 4  ;;  %v987_v60 = vrot.slane %v985_v52, 4  ;;  %v716_v62 = vsel %vm704_vm3, %v712_v50, %v715_v55  ;;  %v5047_v32 = vcombine.low %v7343_v26, %v7345_v27  ;;  %v7375_v52 = vld [vmem:[#allocation2 + $0x34] sm:$0xf] }
  0x48   : > { %5924 = vmatprep.subr.bf16.mxu0 %v6863_v15  ;;  %5967 = vmatpush3.bf16.msra.mxu1 %v6664_v48  ;;  %v7290_v48 = vld [vmem:[#allocation2 + $0x1c] sm:$0xf]  ;;  %v6682_v50 = vld [vmem:[%s9278_s3 + $0x110] sm:$0xff]  }
  0x49   : > { %5968 = vmatprep.subr.bf16.mxu1 %v6863_v15  ;;  %5853 = vmatmul.mubr.bf16.gmra.mxu0 %v317_v56  ;;  %v979_v51 = vor.u32 %v978_v45, %v975_v42  ;;  %v717_v56 = vrot.slane %v292_v2, 3  ;;  %v6677_v2 = vld [vmem:[%s9278_s3 + $0x178] sm:$0xff]   ;;  %v725_v42 = vrot.slane %v310_v30, 3  ;;  %v726_v45 = vrot.slane %v313_v31, 4 }
  0x4a   : > { %5897 = vmatmul.mubr.bf16.gmra.mxu1 %v522_v49  ;;  %5856 = vmatprep.mubr.msk.bf16.mxu0 %vm6864_vm0, %v6863_v15  ;;  %v971_v49 = vor.u32 %v970_v40, %v967_v39  ;;  %v1009_v47 = vshrl.u32 %v5047_v32, 16  ;;  %v7380_v30 = vld [vmem:[#allocation2 + $0x38] sm:$0xf] }
  0x4b   : > { %5900 = vmatprep.mubr.msk.bf16.mxu1 %vm6864_vm0, %v6863_v15  ;;  %5925 = vmatpush3.bf16.msra.mxu0 %v6662_v53  ;;  %v7296_v53 = vld [vmem:[#allocation2 + $0x20] sm:$0xf]  ;;  %v719_v59 = vor.u32 %v718_v0, %v717_v56  ;;  %v727_v31 = vor.u32 %v726_v45, %v725_v42  ;;  %v6688_v56 = vld [vmem:[%s9278_s3 + $0x150] sm:$0xff]   ;;  %v6693_v42 = vld [vmem:[%s9278_s3 + $0x1b8] sm:$0xff]  }
  0x4c   : > { %5926 = vmatprep.subr.bf16.mxu0 %v6863_v15  ;;  %5969 = vmatpush3.bf16.msra.mxu1 %v6666_v58  ;;  %v980_v57 = vsel %vm704_vm3, %v971_v49, %v979_v51  ;;  %v984_v58 = vrot.slane %v982_v54, 3  ;;  %v5045_v61 = vcombine.low %v7290_v48, %v7296_v53  ;;  %v1012_v49 = vshll.u32 %v5047_v32, 16  ;;  %v6687_v54 = vld [vmem:[%s9278_s3 + $0x158] sm:$0xff]  }
  0x4d   : > { %5970 = vmatprep.subr.bf16.mxu1 %v6863_v15 }
  0x4e   : > { %v988_v6 = vor.u32 %v987_v60, %v984_v58  ;;  %v994_v8 = vshll.u32 %v5045_v61, 16  ;;  %v5048_v58 = vcombine.low %v7375_v52, %v7380_v30 }
  0x4f   : > { %5927 = vmatpush3.bf16.msra.mxu0 %v6665_v63  ;;  %v6668_v63 = vld [vmem:[%s9278_s3 + $0x138] sm:$0xff]  }
  0x50   : > { %5971 = vmatpush3.bf16.msra.mxu1 %v6667_v1  ;;  %6000 = vmatprep.subr.bf16.mxu0 %v6863_v15  ;;  %v6671_v1 = vld [vmem:[%s9278_s3 + $0x130] sm:$0xff]   ;;  %v989_v10 = vsel %vm704_vm3, %v979_v51, %v988_v6  ;;  %v1018_v34 = vshrl.u32 %v5048_v58, 16 }
  0x51   : > { %6044 = vmatprep.subr.bf16.mxu1 %v6863_v15  ;;  %5857 = vmatmul.mubr.bf16.gmra.mxu0 %v326_v7  ;;  %v991_v7 = vshrl.u32 %v5045_v61, 16  ;;  %v683_v51 = vld [vmem:[#allocation2 + $0x34] sm:$0xf]  ;;  %v1011_v61 = vrot.slane %v1009_v47, 3 }
  0x52   : > { %5901 = vmatmul.mubr.bf16.gmra.mxu1 %v524_v5  ;;  %5860 = vmatprep.mubr.msk.bf16.mxu0 %vm6864_vm0, %v6863_v15  ;;  %v7315_v5 = vld [vmem:[#allocation2 + $0x24] sm:$0xf] }
  0x53   : > { %5904 = vmatprep.mubr.msk.bf16.mxu1 %vm6864_vm0, %v6863_v15  ;;  %v5046_v20 = vcombine.low %v7315_v5, %v7321_v3 }
  0x55   : > { %v1000_v14 = vshrl.u32 %v5046_v20, 16 }
  0x57   : > { %v1002_v38 = vrot.slane %v1000_v14, 3  ;;  %v6695_v14 = vld [vmem:[#allocation2 + $0x10] sm:$0xff]  }
  0x59   : > { %5861 = vmatmul.mubr.bf16.gmra.mxu0 %v335_v23  ;;  %v722_v23 = vrot.slane %v304_v16, 4  ;;  %v1003_v16 = vshll.u32 %v5046_v20, 16 }
  0x5a   : > { %5905 = vmatmul.mubr.bf16.gmra.mxu1 %v526_v21  ;;  %5864 = vmatprep.mubr.msk.bf16.mxu0 %vm6864_vm0, %v6863_v15  ;;  %v720_v21 = vsel %vm704_vm3, %v715_v55, %v719_v59  ;;  %v5017_v55 = vcombine.low %v7212_v46, %v683_v51  ;;  %v730_v46 = vrot.slane %v322_v43, 4  ;;  %v1021_v43 = vshll.u32 %v5048_v58, 16 }
  0x5b   : > { %5908 = vmatprep.mubr.msk.bf16.mxu1 %vm6864_vm0, %v6863_v15  ;;  %v723_v28 = vor.u32 %v722_v23, %v721_v22  ;;  %v1005_v39 = vrot.slane %v1003_v16, 4  ;;  %v6694_v23 = vld [vmem:[#allocation2 + $0x8] sm:$0xff]   ;;  %v5074_v58 = vcombine.low %v7267_v19, %v7280_v33  ;;  %v6712_v33 = vld [vmem:[%s9278_s3 + $0x1e0] sm:$0xff]  }
  0x5c   : > { %v734_v0 = vshrl.u32 %v5017_v55, 16  ;;  %v1432_v16 = vshll.u32 %v6694_v23, 16  ;;  %v1430_v32 = vshrl.u32 %v6694_v23, 16 }
  0x5d   : > { %v724_v40 = vsel %vm704_vm3, %v719_v59, %v723_v28  ;;  %v1006_v25 = vor.u32 %v1005_v39, %v1002_v38  ;;  %v6691_v59 = vld [vmem:[%s9278_s3 + $0x140] sm:$0xff]   ;;  %v1441_v39 = vshrl.u32 %v6695_v14, 16 }
  0x61   : > { %5865 = vmatmul.mubr.bf16.gmra.mxu0 %v334_v17  ;;  %v996_v17 = vrot.slane %v994_v8, 4  ;;  %v6689_v8 = vld [vmem:[%s9278_s3 + $0x100] sm:$0xff]  }
  0x62   : > { %5909 = vmatmul.mubr.bf16.gmra.mxu1 %v525_v12  ;;  %5928 = vmatprep.mubr.msk.bf16.mxu0 %vm6864_vm0, %v6863_v15  ;;  %v993_v12 = vrot.slane %v991_v7, 3 }
  0x63   : > { %5972 = vmatprep.mubr.msk.bf16.mxu1 %vm6864_vm0, %v6863_v15 }
  0x64   : > { %v997_v4 = vor.u32 %v996_v17, %v993_v12  ;;  %v1020_v12 = vrot.slane %v1018_v34, 3  ;;  %v1023_v17 = vrot.slane %v1021_v43, 4  ;;  %v6716_v34 = vld [vmem:[%s9278_s3 + $0x1d8] sm:$0xff]   ;;  %v6711_v43 = vld [vmem:[%s9278_s3 + $0x190] sm:$0xff]  }
  0x66   : > { %v998_v44 = vsel %vm704_vm3, %v988_v6, %v997_v4  ;;  %v1007_v60 = vsel %vm704_vm3, %v997_v4, %v1006_v25 }
  0x69   : > { %5929 = vmatmul.mubr.bf16.vlgmr.msra.gmra.mxu0 %v716_v62  ;;  %v1014_v62 = vrot.slane %v1012_v49, 4  ;;  %v5073_v49 = vcombine.low %v7258_v13, %v7265_v18  ;;  %v6707_v13 = vld [vmem:[%s9278_s3 + $0x1f0] sm:$0xff]   ;;  %v6699_v18 = vld [vmem:[%s9278_s3 + $0x1a8] sm:$0xff]  }
  0x6a   : > { %5973 = vmatmul.mubr.bf16.vlgmr.msra.gmra.mxu1 %v980_v57  ;;  %6001 = vmatpush3.bf16.msra.mxu0 %v6668_v63  ;;  %v729_v57 = vrot.slane %v319_v41, 3  ;;  %v728_v63 = vsel %vm704_vm3, %v723_v28, %v727_v31  ;;  %v6686_v41 = vld [vmem:[%s9278_s3 + $0x108] sm:$0xff]   ;;  %v1437_v28 = vshll.u32 %v6695_v14, 16  ;;  %v5078_v14 = vcombine.low %v7345_v27, %v7375_v52 }
  0x6b   : > { %5976 = vmatprep.mubr.msk.bf16.mxu1 %vm6864_vm0, %v6863_v15  ;;  %5932 = vmatprep.mubr.msk.bf16.mxu0 %vm6864_vm0, %v6863_v15  ;;  %v1015_v6 = vor.u32 %v1014_v62, %v1011_v61  ;;  %v6702_v61 = vld [vmem:[%s9278_s3 + $0x1a0] sm:$0xff]   ;;  %v5079_v27 = vcombine.low %v7380_v30, %v7380_v30 }
  0x6c   : > { %6002 = vmatprep.subr.bf16.mxu0 %v6863_v15  ;;  %6045 = vmatpush3.bf16.msra.mxu1 %v6677_v2  ;;  %v737_v2 = vshll.u32 %v5017_v55, 16  ;;  %v731_v7 = vor.u32 %v730_v46, %v729_v57  ;;  %v6710_v46 = vld [vmem:[%s9278_s3 + $0x1e8] sm:$0xff]  }
  0x6d   : > { %6046 = vmatprep.subr.bf16.mxu1 %v6863_v15 }
  0x6e   : > { %6003 = vmatpush3.bf16.msra.mxu0 %v6671_v1  ;;  %v6690_v1 = vld [vmem:[%s9278_s3 + $0x148] sm:$0xff]   ;;  %v732_v20 = vsel %vm704_vm3, %v727_v31, %v731_v7  ;;  %v6705_v31 = vld [vmem:[%s9278_s3 + $0x1f8] sm:$0xff]  }
  0x6f   : > { %6004 = vmatprep.subr.bf16.mxu0 %v6863_v15 }
  0x70   : > { %6047 = vmatpush3.bf16.msra.mxu1 %v6679_v9  ;;  %v736_v9 = vrot.slane %v734_v0, 3  ;;  %v5075_v0 = vcombine.low %v7282_v35, %v7290_v48 }
  0x71   : > { %6048 = vmatprep.subr.bf16.mxu1 %v6863_v15  ;;  %5933 = vmatmul.mubr.bf16.gmra.mxu0 %v720_v21  ;;  %v1024_v21 = vor.u32 %v1023_v17, %v1020_v12  ;;  %v6721_v17 = vld [vmem:[%s9278_s3 + $0x1c0] sm:$0xff]  }
  0x72   : > { %5977 = vmatmul.mubr.bf16.gmra.mxu1 %v989_v10  ;;  %5936 = vmatprep.mubr.msk.bf16.mxu0 %vm6864_vm0, %v6863_v15  ;;  %v739_v10 = vrot.slane %v737_v2, 4  ;;  %v6709_v2 = vld [vmem:[#allocation2 + $0x30] sm:$0xff]  }
  0x73   : > { %5980 = vmatprep.mubr.msk.bf16.mxu1 %vm6864_vm0, %v6863_v15  ;;  %6005 = vmatpush3.bf16.msra.mxu0 %v6673_v11  ;;  %v1016_v11 = vsel %vm704_vm3, %v1006_v25, %v1015_v6 }
  0x74   : > { %6006 = vmatprep.subr.bf16.mxu0 %v6863_v15  ;;  %6049 = vmatpush3.bf16.msra.mxu1 %v6681_v24  ;;  %v740_v22 = vor.u32 %v739_v10, %v736_v9  ;;  %v1025_v24 = vsel %vm704_vm3, %v1015_v6, %v1024_v21  ;;  %v6717_v6 = vld [vmem:[%s9278_s3 + $0x1d0] sm:$0xff]   ;;  %v6720_v10 = vld [vmem:[%s9278_s3 + $0x1c8] sm:$0xff]  }
  0x75   : > { %6050 = vmatprep.subr.bf16.mxu1 %v6863_v15 }
  0x76   : > { %v741_v4 = vsel %vm704_vm3, %v731_v7, %v740_v22  ;;  %v1469_v7 = vshll.u32 %v6709_v2, 16 }
  0x77   : > { %6007 = vmatpush3.bf16.msra.mxu0 %v6675_v29  ;;  %v6698_v29 = vld [vmem:[#allocation2 + $0x18] sm:$0xff]  }
  0x78   : > { %6008 = vmatprep.subr.bf16.mxu0 %v6863_v15  ;;  %6051 = vmatpush3.bf16.msra.mxu1 %v6683_v36  ;;  %v1434_v36 = vrot.slane %v1432_v16, 1  ;;  %v1449_v47 = vshrl.u32 %v6698_v29, 16  ;;  %v1471_v12 = vrot.slane %v1469_v7, 1 }
  0x79   : > { %6052 = vmatprep.subr.bf16.mxu1 %v6863_v15  ;;  %5937 = vmatmul.mubr.bf16.gmra.mxu0 %v724_v40  ;;  %v6701_v40 = vld [vmem:[#allocation2 + $0x20] sm:$0xff]  }
  0x7a   : > { %5981 = vmatmul.mubr.bf16.gmra.mxu1 %v998_v44  ;;  %5940 = vmatprep.mubr.msk.bf16.mxu0 %vm6864_vm0, %v6863_v15  ;;  %v1445_v44 = vshll.u32 %v6698_v29, 16  ;;  %v1435_v38 = vor.u32 %v1434_v36, %v1430_v32  ;;  %v1453_v25 = vshll.u32 %v6701_v40, 16  ;;  %v1457_v62 = vshrl.u32 %v6701_v40, 16  ;;  %v7549_v32 = vld [vmem:[#allocation2 + $0x14] sm:$0xff]  }
  0x7b   : > { %5984 = vmatprep.mubr.msk.bf16.mxu1 %vm6864_vm0, %v6863_v15  ;;  %6009 = vmatpush3.bf16.msra.mxu0 %v6678_v37  ;;  %v1439_v37 = vrot.slane %v1437_v28, 1  ;;  %v1714_v40 = vshll.u32 %v7549_v32, 16 }
  0x7c   : > { %6010 = vmatprep.subr.bf16.mxu0 %v6863_v15  ;;  %6053 = vmatpush3.bf16.msra.mxu1 %v6687_v54  ;;  %v1447_v45 = vrot.slane %v1445_v44, 1  ;;  %v7445_v54 = vld [vmem:[#allocation2 + $0x28] sm:$0xff]  }
  0x7d   : > { %6054 = vmatprep.subr.bf16.mxu1 %v6863_v15  ;;  %v1440_v51 = vsel %vm1428_vm4, %v1435_v38, %v1439_v37  ;;  %v1443_v55 = vor.u32 %v1441_v39, %v1439_v37  ;;  %v1461_v57 = vshll.u32 %v7445_v54, 16  ;;  %v1465_v48 = vshrl.u32 %v7445_v54, 16  ;;  %v1917_v37 = vld [vmem:[#allocation2 + $0xc] sm:$0xe] }
  0x7e   : > { %v1451_v19 = vor.u32 %v1449_v47, %v1447_v45  ;;  %v1716_v30 = vrot.slane %v1714_v40, 1 }
  0x7f   : > { %6011 = vmatpush3.bf16.msra.mxu0 %v6682_v50  ;;  %v6697_v50 = vld [vmem:[%s9278_s3 + $0x1b0] sm:$0xff]  }
  0x80   : > { %6012 = vmatprep.subr.bf16.mxu0 %v6863_v15  ;;  %6055 = vmatpush3.bf16.msra.mxu1 %v6688_v56  ;;  %v1455_v56 = vrot.slane %v1453_v25, 1  ;;  %v6724_v25 = vld [vmem:[%s9278_s3 + $0x238] sm:$0xff]  }
  0x81   : > { %6056 = vmatprep.subr.bf16.mxu1 %v6863_v15  ;;  %5941 = vmatmul.mubr.bf16.gmra.mxu0 %v728_v63  ;;  %v6706_v63 = vld [vmem:[%s9278_s3 + $0x198] sm:$0xff]  }
  0x82   : > { %5985 = vmatmul.mubr.bf16.gmra.mxu1 %v1007_v60  ;;  %5944 = vmatprep.mubr.msk.bf16.mxu0 %vm6864_vm0, %v6863_v15  ;;  %v1448_v60 = vsel %vm1428_vm4, %v1443_v55, %v1447_v45  ;;  %v1459_v35 = vor.u32 %v1457_v62, %v1455_v56  ;;  %v1940_v45 = vrot.slane %v7549_v32, 1 }
  0x83   : > { %5988 = vmatprep.mubr.msk.bf16.mxu1 %vm6864_vm0, %v6863_v15  ;;  %6013 = vmatpush3.bf16.msra.mxu0 %v6686_v41  ;;  %v1456_v41 = vsel %vm1428_vm4, %v1451_v19, %v1455_v56  ;;  %v6727_v56 = vld [vmem:[%s9278_s3 + $0x230] sm:$0xff]  }
  0x84   : > { %6014 = vmatprep.subr.bf16.mxu0 %v6863_v15  ;;  %6057 = vmatpush3.bf16.msra.mxu1 %v6690_v1  ;;  %v1463_v1 = vrot.slane %v1461_v57, 1  ;;  %v7585_v57 = vld [vmem:[#allocation2 + $0x24] sm:$0xff]  }
  0x85   : > { %6058 = vmatprep.subr.bf16.mxu1 %v6863_v15  ;;  %v1730_v19 = vshll.u32 %v7585_v57, 16 }
  0x86   : > { %v1464_v9 = vsel %vm1428_vm4, %v1459_v35, %v1463_v1  ;;  %v6732_v35 = vld [vmem:[%s9278_s3 + $0x218] sm:$0xff]  }
  0x87   : > { %6015 = vmatpush3.bf16.msra.mxu0 %v6689_v8  ;;  %v6715_v8 = vld [vmem:[%s9278_s3 + $0x188] sm:$0xff]  }
  0x88   : > { %6059 = vmatpush3.bf16.msra.mxu1 %v6691_v59  ;;  %6088 = vmatprep.subr.bf16.mxu0 %v6863_v15  ;;  %v5076_v59 = vcombine.low %v7296_v53, %v7315_v5  ;;  %v6714_v53 = vld [vmem:[#allocation2 + $0x38] sm:$0x1f]   ;;  %v6719_v5 = vld [vmem:[%s9278_s3 + $0x180] sm:$0xff]  }
  0x89   : > { %6132 = vmatprep.subr.bf16.mxu1 %v6863_v15  ;;  %5945 = vmatmul.mubr.bf16.gmra.mxu0 %v732_v20  ;;  %v5077_v20 = vcombine.low %v7321_v3, %v7343_v26  ;;  %v1477_v23 = vshll.u32 %v6714_v53, 16  ;;  %v1640_v3 = vld [vmem:[#allocation2 + $0xc] sm:$0xf]  ;;  %v1641_v26 = vld [vmem:[#allocation2 + $0x10] sm:$0xf]  ;;  %v1481_v29 = vshrl.u32 %v6714_v53, 16 }
  0x8a   : > { %5989 = vmatmul.mubr.bf16.gmra.mxu1 %v1016_v11  ;;  %5948 = vmatprep.mubr.msk.bf16.mxu0 %vm6864_vm0, %v6863_v15  ;;  %v1467_v11 = vor.u32 %v1465_v48, %v1463_v1  ;;  %v5135_v28 = vcombine.low %v1640_v3, %v1641_v26  ;;  %v7553_v52 = vcombine.low %v1917_v37, %v1641_v26 }
  0x8b   : > { %5992 = vmatprep.mubr.msk.bf16.mxu1 %vm6864_vm0, %v6863_v15 }
  0x8c   : > { %v1709_v36 = vshll.u32 %v5135_v28, 16  ;;  %v1707_v38 = vshrl.u32 %v5135_v28, 16  ;;  %v183_v28 = vld [vmem:[%s9277_s2 + $0x10] sm:$0xff] }
  0x8e   : > { %v1711_v39 = vrot.slane %v1709_v36, 1 }
  0x90   : > { %v1712_v47 = vor.u32 %v1711_v39, %v1707_v38 }
  0x91   : > { %5949 = vmatmul.mubr.bf16.gmra.mxu0 %v741_v4  ;;  %v1479_v4 = vrot.slane %v1477_v23, 1  ;;  %v1653_v23 = vld [vmem:[#allocation2 + $0x40] sm:$0x1] }
  0x92   : > { %5993 = vmatmul.mubr.bf16.gmra.mxu1 %v1025_v24  ;;  %5952 = vmatprep.mubr.msk.bf16.mxu0 %vm6864_vm0, %v6863_v15  ;;  %v1717_v54 = vsel %vm1428_vm4, %v1712_v47, %v1716_v30 }
  0x93   : > { %5996 = vmatprep.mubr.msk.bf16.mxu1 %vm6864_vm0, %v6863_v15  ;;  %v1483_v44 = vor.u32 %v1481_v29, %v1479_v4 }
  0x99   : > { %5953 = vmatmul.mubr.bf16.gmra.mxu0 %v740_v22  ;;  %v1473_v22 = vshrl.u32 %v6709_v2, 16 }
  0x9a   : > { %5997 = vmatmul.mubr.bf16.gmra.mxu1 %v1024_v21  ;;  %6016 = vmatprep.mubr.msk.bf16.mxu0 %vm6864_vm0, %v6863_v15  ;;  %v1472_v21 = vsel %vm1428_vm4, %v1467_v11, %v1471_v12 }
  0x9b   : > { %6060 = vmatprep.mubr.msk.bf16.mxu1 %vm6864_vm0, %v6863_v15  ;;  %v1475_v24 = vor.u32 %v1473_v22, %v1471_v12  ;;  %v7651_v22 = vld [vmem:[#allocation2 + $0x3c] sm:$0xf] }
  0x9c   : > { %v7668_v37 = vcombine.low %v7651_v22, %v1653_v23 }
  0x9d   : > { %v1480_v16 = vsel %vm1428_vm4, %v1475_v24, %v1479_v4 }
  0xa1   : > { %6017 = vmatmul.mubr.bf16.vlgmr.msra.gmra.mxu0 %v5073_v49  ;;  %v7564_v49 = vld [vmem:[#allocation2 + $0x1c] sm:$0xff]  }
  0xa2   : > { %6061 = vmatmul.mubr.bf16.vlgmr.msra.gmra.mxu1 %v1440_v51  ;;  %6089 = vmatpush3.bf16.msra.mxu0 %v6693_v42  ;;  %v1939_v42 = vrot.slane %v7553_v52, 1  ;;  %v1942_v55 = vrot.slane %v7564_v49, 1 }
  0xa3   : > { %6064 = vmatprep.mubr.msk.bf16.mxu1 %vm6864_vm0, %v6863_v15  ;;  %6020 = vmatprep.mubr.msk.bf16.mxu0 %vm6864_vm0, %v6863_v15 }
  0xa4   : > { %6090 = vmatprep.subr.bf16.mxu0 %v6863_v15  ;;  %6133 = vmatpush3.bf16.msra.mxu1 %v6705_v31  ;;  %v1941_v51 = vsel %vm1938_vm5, %v1939_v42, %v1940_v45  ;;  %v1718_v31 = vshrl.u32 %v7549_v32, 16 }
  0xa5   : > { %6134 = vmatprep.subr.bf16.mxu1 %v6863_v15 }
  0xa6   : > { %6091 = vmatpush3.bf16.msra.mxu0 %v6697_v50  ;;  %v1722_v50 = vshll.u32 %v7564_v49, 16 }
  0xa7   : > { %6092 = vmatprep.subr.bf16.mxu0 %v6863_v15 }
  0xa8   : > { %6135 = vmatpush3.bf16.msra.mxu1 %v6707_v13  ;;  %v1720_v13 = vor.u32 %v1718_v31, %v1716_v30 }
  0xa9   : > { %6136 = vmatprep.subr.bf16.mxu1 %v6863_v15  ;;  %6021 = vmatmul.mubr.bf16.gmra.mxu0 %v5074_v58  ;;  %v1943_v58 = vsel %vm1938_vm5, %v1940_v45, %v1942_v55 }
  0xaa   : > { %6065 = vmatmul.mubr.bf16.gmra.mxu1 %v1448_v60  ;;  %6024 = vmatprep.mubr.msk.bf16.mxu0 %vm6864_vm0, %v6863_v15 }
  0xab   : > { %6068 = vmatprep.mubr.msk.bf16.mxu1 %vm6864_vm0, %v6863_v15  ;;  %6093 = vmatpush3.bf16.msra.mxu0 %v6699_v18  ;;  %v1724_v18 = vrot.slane %v1722_v50, 1 }
  0xac   : > { %6094 = vmatprep.subr.bf16.mxu0 %v6863_v15  ;;  %6137 = vmatpush3.bf16.msra.mxu1 %v6710_v46  ;;  %v6728_v46 = vld [vmem:[%s9278_s3 + $0x228] sm:$0xff]  }
  0xad   : > { %6138 = vmatprep.subr.bf16.mxu1 %v6863_v15  ;;  %v1725_v60 = vsel %vm1428_vm4, %v1720_v13, %v1724_v18 }
  0xaf   : > { %6095 = vmatpush3.bf16.msra.mxu0 %v6702_v61  ;;  %v1726_v61 = vshrl.u32 %v7564_v49, 16  ;;  %v191_v49 = vld [vmem:[%s9277_s2 + $0x50] sm:$0xff] }
  0xb0   : > { %6096 = vmatprep.subr.bf16.mxu0 %v6863_v15  ;;  %6139 = vmatpush3.bf16.msra.mxu1 %v6712_v33  ;;  %v1944_v33 = vrot.slane %v7585_v57, 1 }
  0xb1   : > { %6140 = vmatprep.subr.bf16.mxu1 %v6863_v15  ;;  %6025 = vmatmul.mubr.bf16.gmra.mxu0 %v5075_v0  ;;  %v1728_v62 = vor.u32 %v1726_v61, %v1724_v18  ;;  %v6730_v0 = vld [vmem:[%s9278_s3 + $0x220] sm:$0xff]   ;;  %v184_v18 = vld [vmem:[%s9277_s2 + $0x18] sm:$0xff] }
  0xb2   : > { %6069 = vmatmul.mubr.bf16.gmra.mxu1 %v1456_v41  ;;  %6028 = vmatprep.mubr.msk.bf16.mxu0 %vm6864_vm0, %v6863_v15  ;;  %v7608_v41 = vld [vmem:[#allocation2 + $0x2c] sm:$0xff]   ;;  %v1945_v2 = vsel %vm1938_vm5, %v1942_v55, %v1944_v33  ;;  %v1754_v55 = vshll.u32 %v7668_v37, 16 }
  0xb3   : > { %6072 = vmatprep.mubr.msk.bf16.mxu1 %vm6864_vm0, %v6863_v15  ;;  %6097 = vmatpush3.bf16.msra.mxu0 %v6706_v63  ;;  %v1732_v63 = vrot.slane %v1730_v19, 1  ;;  %v1946_v48 = vrot.slane %v7608_v41, 1 }
  0xb4   : > { %6098 = vmatprep.subr.bf16.mxu0 %v6863_v15  ;;  %6141 = vmatpush3.bf16.msra.mxu1 %v6716_v34  ;;  %v1734_v34 = vshrl.u32 %v7585_v57, 16  ;;  %v193_v57 = vld [vmem:[%s9277_s2 + $0x60] sm:$0xff] }
  0xb5   : > { %6142 = vmatprep.subr.bf16.mxu1 %v6863_v15  ;;  %v1733_v1 = vsel %vm1428_vm4, %v1728_v62, %v1732_v63  ;;  %v1947_v11 = vsel %vm1938_vm5, %v1944_v33, %v1946_v48 }
  0xb7   : > { %6099 = vmatpush3.bf16.msra.mxu0 %v6711_v43  ;;  %v1738_v43 = vshll.u32 %v7608_v41, 16 }
  0xb8   : > { %6100 = vmatprep.subr.bf16.mxu0 %v6863_v15  ;;  %6143 = vmatpush3.bf16.msra.mxu1 %v6717_v6  ;;  %v1736_v6 = vor.u32 %v1734_v34, %v1732_v63 }
  0xb9   : > { %6144 = vmatprep.subr.bf16.mxu1 %v6863_v15  ;;  %6029 = vmatmul.mubr.bf16.gmra.mxu0 %v5076_v59  ;;  %v1740_v7 = vrot.slane %v1738_v43, 1  ;;  %v6734_v59 = vld [vmem:[%s9278_s3 + $0x210] sm:$0xff]  }
  0xba   : > { %6073 = vmatmul.mubr.bf16.gmra.mxu1 %v1464_v9  ;;  %6032 = vmatprep.mubr.msk.bf16.mxu0 %vm6864_vm0, %v6863_v15  ;;  %v181_v9 = vld [vmem:[%s9277_s2] sm:$0xff] }
  0xbb   : > { %6076 = vmatprep.mubr.msk.bf16.mxu1 %vm6864_vm0, %v6863_v15  ;;  %6101 = vmatpush3.bf16.msra.mxu0 %v6715_v8  ;;  %v7629_v8 = vld [vmem:[#allocation2 + $0x34] sm:$0xff]   ;;  %v1741_v53 = vsel %vm1428_vm4, %v1736_v6, %v1740_v7 }
  0xbc   : > { %6102 = vmatprep.subr.bf16.mxu0 %v6863_v15  ;;  %6145 = vmatpush3.bf16.msra.mxu1 %v6720_v10  ;;  %v7637_v10 = vstv %s87_s30  ;;  %v1948_v26 = vrot.slane %v7629_v8, 1 }
  0xbd   : > { %6146 = vmatprep.subr.bf16.mxu1 %v6863_v15  ;;  %v195_v12 = vmul.f32 %v7637_v10, %v181_v9  ;;  %v197_v45 = vmul.f32 %v7637_v10, %v183_v28  ;;  %v198_v62 = vmul.f32 %v7637_v10, %v184_v18  ;;  %v2131_v28 = vshrl.u32 %v7553_v52, 16  ;;  %v188_v18 = vld [vmem:[%s9277_s2 + $0x38] sm:$0xff] }
  0xbe   : > { %v1949_v47 = vsel %vm1938_vm5, %v1946_v48, %v1948_v26 }
  0xbf   : > { %6103 = vmatpush3.bf16.msra.mxu0 %v6719_v5  ;;  %v182_v5 = vld [vmem:[%s9277_s2 + $0x8] sm:$0xff] }
  0xc0   : > { %6147 = vmatpush3.bf16.msra.mxu1 %v6721_v17  ;;  %6176 = vmatprep.subr.bf16.mxu0 %v6863_v15  ;;  %v1742_v17 = vshrl.u32 %v7608_v41, 16  ;;  %v196_v3 = vmul.f32 %v7637_v10, %v182_v5 }
  0xc1   : > { %6220 = vmatprep.subr.bf16.mxu1 %v6863_v15  ;;  %6033 = vmatmul.mubr.bf16.gmra.mxu0 %v5077_v20  ;;  %v1746_v20 = vshll.u32 %v7629_v8, 16 }
  0xc2   : > { %6077 = vmatmul.mubr.bf16.gmra.mxu1 %v1472_v21  ;;  %6036 = vmatprep.mubr.msk.bf16.mxu0 %vm6864_vm0, %v6863_v15  ;;  %v6736_v21 = vld [vmem:[%s9278_s3 + $0x208] sm:$0xff]   ;;  %v1744_v29 = vor.u32 %v1742_v17, %v1740_v7 }
  0xc3   : > { %6080 = vmatprep.mubr.msk.bf16.mxu1 %vm6864_vm0, %v6863_v15  ;;  %v1748_v36 = vrot.slane %v1746_v20, 1 }
  0xc9   : > { %6037 = vmatmul.mubr.bf16.gmra.mxu0 %v5078_v14 }
  0xca   : > { %6081 = vmatmul.mubr.bf16.gmra.mxu1 %v1480_v16  ;;  %6040 = vmatprep.mubr.msk.bf16.mxu0 %vm6864_vm0, %v6863_v15 }
  0xcb   : > { %6084 = vmatprep.mubr.msk.bf16.mxu1 %vm6864_vm0, %v6863_v15 }
  0xd1   : > { %6041 = vmatmul.mubr.bf16.gmra.mxu0 %v5079_v27 }
  0xd2   : > { %6085 = vmatmul.mubr.bf16.gmra.mxu1 %v1483_v44  ;;  %6104 = vmatprep.mubr.msk.bf16.mxu0 %vm6864_vm0, %v6863_v15  ;;  %v6737_v44 = vld [vmem:[%s9278_s3 + $0x200] sm:$0xff]  }
  0xd3   : > { %6148 = vmatprep.mubr.msk.bf16.mxu1 %vm6864_vm0, %v6863_v15 }
  0xd9   : > { %6105 = vmatmul.mubr.bf16.vlgmr.msra.gmra.mxu0 %v1717_v54  ;;  %v1749_v54 = vsel %vm1428_vm4, %v1744_v29, %v1748_v36  ;;  %v2134_v29 = vshll.u32 %v7553_v52, 16 }
  0xda   : > { %6149 = vmatmul.mubr.bf16.vlgmr.msra.gmra.mxu1 %v1941_v51  ;;  %6177 = vmatpush3.bf16.msra.mxu0 %v6724_v25  ;;  %v1750_v25 = vshrl.u32 %v7629_v8, 16 }
  0xdb   : > { %6152 = vmatprep.mubr.msk.bf16.mxu1 %vm6864_vm0, %v6863_v15  ;;  %6108 = vmatprep.mubr.msk.bf16.mxu0 %vm6864_vm0, %v6863_v15 }
  0xdc   : > { %6178 = vmatprep.subr.bf16.mxu0 %v6863_v15 }
  0xde   : > { %6179 = vmatpush3.bf16.msra.mxu0 %v6727_v56 }
  0xdf   : > { %6180 = vmatprep.subr.bf16.mxu0 %v6863_v15 }
  0xe1   : > { %6109 = vmatmul.mubr.bf16.gmra.mxu0 %v1725_v60 }
  0xe2   : > { %6153 = vmatmul.mubr.bf16.gmra.mxu1 %v1943_v58  ;;  %6112 = vmatprep.mubr.msk.bf16.mxu0 %vm6864_vm0, %v6863_v15 }
  0xe3   : > { %6156 = vmatprep.mubr.msk.bf16.mxu1 %vm6864_vm0, %v6863_v15  ;;  %6181 = vmatpush3.bf16.msra.mxu0 %v6728_v46  ;;  %v1950_v46 = vrot.slane %v7668_v37, 1 }
  0xe4   : > { %6182 = vmatprep.subr.bf16.mxu0 %v6863_v15 }
  0xe7   : > { %6183 = vmatpush3.bf16.msra.mxu0 %v6730_v0  ;;  %v1752_v0 = vor.u32 %v1750_v25, %v1748_v36 }
  0xe8   : > { %6184 = vmatprep.subr.bf16.mxu0 %v6863_v15 }
  0xe9   : > { %6113 = vmatmul.mubr.bf16.gmra.mxu0 %v1733_v1 }
  0xea   : > { %6157 = vmatmul.mubr.bf16.gmra.mxu1 %v1945_v2  ;;  %6116 = vmatprep.mubr.msk.bf16.mxu0 %vm6864_vm0, %v6863_v15  ;;  %v1756_v2 = vrot.slane %v1754_v55, 1  ;;  %v2136_v55 = vrot.slane %v2134_v29, 2 }
  0xeb   : > { %6160 = vmatprep.mubr.msk.bf16.mxu1 %vm6864_vm0, %v6863_v15  ;;  %6185 = vmatpush3.bf16.msra.mxu0 %v6732_v35  ;;  %v185_v35 = vld [vmem:[%s9277_s2 + $0x20] sm:$0xff] }
  0xec   : > { %6186 = vmatprep.subr.bf16.mxu0 %v6863_v15 }
  0xef   : > { %6187 = vmatpush3.bf16.msra.mxu0 %v6734_v59  ;;  %v1951_v59 = vsel %vm1938_vm5, %v1948_v26, %v1950_v46 }
  0xf0   : > { %6188 = vmatprep.subr.bf16.mxu0 %v6863_v15 }
  0xf1   : > { %v425_v4 = vpop.f32.mrf.mxu0  ;;  %6117 = vmatmul.mubr.bf16.gmra.mxu0 %v1741_v53  ;;  %v1757_v53 = vsel %vm1428_vm4, %v1752_v0, %v1756_v2 }
  0xf2   : > { %v616_v24 = vpop.f32.mrf.mxu1  ;;  %6161 = vmatmul.mubr.bf16.gmra.mxu1 %v1947_v11  ;;  %v479_v14 = vadd.f32 %v425_v4, %v195_v12  ;;  %6120 = vmatprep.mubr.msk.bf16.mxu0 %vm6864_vm0, %v6863_v15  ;;  %v199_v11 = vmul.f32 %v7637_v10, %v185_v35 }
  0xf3   : > { %6164 = vmatprep.mubr.msk.bf16.mxu1 %vm6864_vm0, %v6863_v15  ;;  %6189 = vmatpush3.bf16.msra.mxu0 %v6736_v21  ;;  %v5842_v27 = vpop.f32.mrf.mxu0  ;;  %v186_v21 = vld [vmem:[%s9277_s2 + $0x28] sm:$0xff] }
  0xf4   : > { %v5886_v16 = vpop.f32.mrf.mxu1  ;;  %6190 = vmatprep.subr.bf16.mxu0 %v6863_v15  ;;  %v7674_v38 = vadd.f32 %v616_v24, %v479_v14  ;;  %v200_v14 = vmul.f32 %v7637_v10, %v186_v21 }
  0xf5   : > { %v428_v42 = vpop.f32.mrf.mxu0 }
  0xf6   : > { %v619_v39 = vpop.f32.mrf.mxu1  ;;  %v480_v30 = vadd.f32 %v428_v42, %v196_v3  ;;  %v1758_v3 = vshrl.u32 %v7668_v37, 16  ;;  %v2139_v42 = vrot.slane %v1714_v40, 2 }
  0xf7   : > { %6191 = vmatpush3.bf16.msra.mxu0 %v6737_v44  ;;  %v5843_v13 = vpop.f32.mrf.mxu0  ;;  %v187_v44 = vld [vmem:[%s9277_s2 + $0x30] sm:$0xff] }
  0xf8   : > { %v5887_v51 = vpop.f32.mrf.mxu1  ;;  %6264 = vmatprep.subr.bf16.mxu0 %v6863_v15  ;;  %v7685_v56 = vadd.f32 %v619_v39, %v480_v30  ;;  %v2138_v39 = vrot.slane %v1718_v31, 1 }
  0xf9   : > { %v433_v60 = vpop.f32.mrf.mxu0  ;;  %6121 = vmatmul.mubr.bf16.gmra.mxu0 %v1749_v54  ;;  %v201_v51 = vmul.f32 %v7637_v10, %v187_v44  ;;  %v2133_v54 = vrot.slane %v2131_v28, 1 }
  0xfa   : > { %v624_v58 = vpop.f32.mrf.mxu1  ;;  %6165 = vmatmul.mubr.bf16.gmra.mxu1 %v1949_v47  ;;  %v481_v33 = vadd.f32 %v433_v60, %v197_v45  ;;  %6124 = vmatprep.mubr.msk.bf16.mxu0 %vm6864_vm0, %v6863_v15  ;;  %v1760_v47 = vor.u32 %v1758_v3, %v1756_v2  ;;  %v2140_v32 = vor.u32 %v2139_v42, %v2138_v39  ;;  %v2146_v42 = vrot.slane %v1734_v34, 1 }
  0xfb   : > { %6168 = vmatprep.mubr.msk.bf16.mxu1 %vm6864_vm0, %v6863_v15  ;;  %v5846_v1 = vpop.f32.mrf.mxu0  ;;  %v2137_v0 = vor.u32 %v2136_v55, %v2133_v54 }
  0xfc   : > { %v5890_v63 = vpop.f32.mrf.mxu1  ;;  %v7698_v48 = vadd.f32 %v624_v58, %v481_v33  ;;  %v202_v33 = vmul.f32 %v7637_v10, %v188_v18 }
  0xfd   : > { %v436_v7 = vpop.f32.mrf.mxu0  ;;  %v189_v63 = vld [vmem:[%s9277_s2 + $0x40] sm:$0xff] }
  0xfe   : > { %v627_v6 = vpop.f32.mrf.mxu1  ;;  %v482_v9 = vadd.f32 %v436_v7, %v198_v62 }
  0xff   : > { %v5847_v5 = vpop.f32.mrf.mxu0 }
 0x100   : > { %v5891_v12 = vpop.f32.mrf.mxu1  ;;  %v7706_v23 = vadd.f32 %v627_v6, %v482_v9  ;;  %v203_v6 = vmul.f32 %v7637_v10, %v189_v63  ;;  %v2141_v9 = vsel %vm2129_vm6, %v2137_v0, %v2140_v32  ;;  %v190_v5 = vld [vmem:[%s9277_s2 + $0x48] sm:$0xff]  ;;  %v2150_v0 = vrot.slane %v1742_v17, 1 }
 0x101   : > { %v441_v4 = vpop.f32.mrf.mxu0  ;;  %6125 = vmatmul.mubr.bf16.gmra.mxu0 %v1757_v53  ;;  %v2143_v12 = vrot.slane %v1722_v50, 2 }
 0x102   : > { %v632_v24 = vpop.f32.mrf.mxu1  ;;  %6169 = vmatmul.mubr.bf16.gmra.mxu1 %v1951_v59  ;;  %v483_v26 = vadd.f32 %v441_v4, %v199_v11  ;;  %6128 = vmatprep.mubr.msk.bf16.mxu0 %vm6864_vm0, %v6863_v15  ;;  %v2142_v11 = vrot.slane %v1726_v61, 1 }
 0x103   : > { %6172 = vmatprep.mubr.msk.bf16.mxu1 %vm6864_vm0, %v6863_v15  ;;  %v5850_v36 = vpop.f32.mrf.mxu0 }
 0x104   : > { %v5894_v16 = vpop.f32.mrf.mxu1  ;;  %v7719_v37 = vadd.f32 %v632_v24, %v483_v26  ;;  %v204_v26 = vmul.f32 %v7637_v10, %v190_v5  ;;  %v2144_v50 = vor.u32 %v2143_v12, %v2142_v11  ;;  %v205_v36 = vmul.f32 %v7637_v10, %v191_v49 }
 0x105   : > { %v444_v45 = vpop.f32.mrf.mxu0 }
 0x106   : > { %v635_v27 = vpop.f32.mrf.mxu1  ;;  %v484_v30 = vadd.f32 %v444_v45, %v200_v14  ;;  %v2145_v39 = vsel %vm2129_vm6, %v2140_v32, %v2144_v50  ;;  %v2147_v45 = vrot.slane %v1730_v19, 2 }
 0x107   : > { %v5851_v13 = vpop.f32.mrf.mxu0 }
 0x108   : > { %v5895_v52 = vpop.f32.mrf.mxu1  ;;  %v7729_v58 = vadd.f32 %v635_v27, %v484_v30  ;;  %v192_v30 = vld [vmem:[%s9277_s2 + $0x58] sm:$0xff]  ;;  %v2148_v19 = vor.u32 %v2147_v45, %v2146_v42 }
 0x109   : > { %v449_v31 = vpop.f32.mrf.mxu0  ;;  %6129 = vmatmul.mubr.bf16.gmra.mxu0 %v1760_v47  ;;  %v206_v13 = vmul.f32 %v7637_v10, %v192_v30 }
 0x10a   : > { %v640_v60 = vpop.f32.mrf.mxu1  ;;  %6173 = vmatmul.mubr.bf16.gmra.mxu1 %v1950_v46  ;;  %v485_v40 = vadd.f32 %v449_v31, %v201_v51  ;;  %6192 = vmatprep.mubr.msk.bf16.mxu0 %vm6864_vm0, %v6863_v15  ;;  %v2149_v63 = vsel %vm2129_vm6, %v2144_v50, %v2148_v19 }
 0x10b   : > { %6236 = vmatprep.mubr.msk.bf16.mxu1 %vm6864_vm0, %v6863_v15  ;;  %v5854_v2 = vpop.f32.mrf.mxu0 }
 0x10c   : > { %v5898_v62 = vpop.f32.mrf.mxu1  ;;  %v7739_v46 = vadd.f32 %v640_v60, %v485_v40  ;;  %v207_v40 = vmul.f32 %v7637_v10, %v193_v57  ;;  %v2151_v2 = vrot.slane %v1738_v43, 2 }
 0x10d   : > { %v452_v35 = vpop.f32.mrf.mxu0 }
 0x10e   : > { %v643_v1 = vpop.f32.mrf.mxu1  ;;  %v486_v7 = vadd.f32 %v452_v35, %v202_v33  ;;  %v2152_v11 = vor.u32 %v2151_v2, %v2150_v0 }
 0x10f   : > { %v5855_v53 = vpop.f32.mrf.mxu0 }
 0x110   : > { %v5899_v59 = vpop.f32.mrf.mxu1  ;;  %v7750_v21 = vadd.f32 %v643_v1, %v486_v7  ;;  %v2108_v53 = vld [vmem:[#allocation2 + $0x40] sm:$0x3]  ;;  %v2153_v43 = vsel %vm2129_vm6, %v2148_v19, %v2152_v11 }
 0x111   : > { %v457_v4 = vpop.f32.mrf.mxu0  ;;  %6193 = vmatmul.mubr.bf16.vlgmr.msra.gmra.mxu0 %v2141_v9 }
 0x112   : > { %v648_v24 = vpop.f32.mrf.mxu1  ;;  %v487_v3 = vadd.f32 %v457_v4, %v203_v6  ;;  %6196 = vmatprep.mubr.msk.bf16.mxu0 %vm6864_vm0, %v6863_v15  ;;  %v2154_v4 = vrot.slane %v1750_v25, 1 }
 0x113   : > { %v5858_v61 = vpop.f32.mrf.mxu0 }
 0x114   : > { %v5902_v14 = vpop.f32.mrf.mxu1  ;;  %v7758_v16 = vadd.f32 %v648_v24, %v487_v3  ;;  %v2155_v3 = vrot.slane %v1746_v20, 2 }
 0x115   : > { %v460_v29 = vpop.f32.mrf.mxu0 }
 0x116   : > { %v651_v28 = vpop.f32.mrf.mxu1  ;;  %v488_v44 = vadd.f32 %v460_v29, %v204_v26  ;;  %v5191_v26 = vcombine.low %v7651_v22, %v2108_v53  ;;  %v2156_v29 = vor.u32 %v2155_v3, %v2154_v4 }
 0x117   : > { %v5859_v47 = vpop.f32.mrf.mxu0 }
 0x118   : > { %v5903_v27 = vpop.f32.mrf.mxu1  ;;  %v7769_v51 = vadd.f32 %v651_v28, %v488_v44  ;;  %v2162_v44 = vshll.u32 %v5191_v26, 16  ;;  %v2157_v42 = vsel %vm2129_vm6, %v2152_v11, %v2156_v29 }
 0x119   : > { %v465_v54 = vpop.f32.mrf.mxu0  ;;  %6197 = vmatmul.mubr.bf16.gmra.mxu0 %v2145_v39 }
 0x11a   : > { %v656_v52 = vpop.f32.mrf.mxu1  ;;  %v489_v55 = vadd.f32 %v465_v54, %v205_v36  ;;  %6200 = vmatprep.mubr.msk.bf16.mxu0 %vm6864_vm0, %v6863_v15  ;;  %v2159_v36 = vshrl.u32 %v5191_v26, 16  ;;  %v2164_v47 = vrot.slane %v2162_v44, 2 }
 0x11b   : > { %v5862_v34 = vpop.f32.mrf.mxu0 }
 0x11c   : > { %v5906_v18 = vpop.f32.mrf.mxu1  ;;  %v7777_v60 = vadd.f32 %v656_v52, %v489_v55  ;;  %v2161_v45 = vrot.slane %v2159_v36, 1 }
 0x11d   : > { %v468_v32 = vpop.f32.mrf.mxu0 }
 0x11e   : > { %v659_v31 = vpop.f32.mrf.mxu1  ;;  %v490_v33 = vadd.f32 %v468_v32, %v206_v13  ;;  %v2165_v18 = vor.u32 %v2164_v47, %v2161_v45 }
 0x11f   : > { %v5863_v1 = vpop.f32.mrf.mxu0 }
 0x120   : > { %v5907_v62 = vpop.f32.mrf.mxu1  ;;  %v7785_v35 = vadd.f32 %v659_v31, %v490_v33 }
 0x121   : > { %v473_v7 = vpop.f32.mrf.mxu0  ;;  %6201 = vmatmul.mubr.bf16.gmra.mxu0 %v2149_v63 }
 0x122   : > { %v664_v6 = vpop.f32.mrf.mxu1  ;;  %v491_v59 = vadd.f32 %v473_v7, %v207_v40  ;;  %6204 = vmatprep.mubr.msk.bf16.mxu0 %vm6864_vm0, %v6863_v15  ;;  %v2166_v40 = vsel %vm2129_vm6, %v2156_v29, %v2165_v18 }
 0x123   : > { %v5866_v12 = vpop.f32.mrf.mxu0 }
 0x124   : > { %v5910_v9 = vpop.f32.mrf.mxu1  ;;  %v7789_v5 = vadd.f32 %v664_v6, %v491_v59 }
 0x125   : > { %v476_v24 = vpop.f32.mrf.mxu0 }
 0x126   : > { %v667_v17 = vpop.f32.mrf.mxu1 }
 0x127   : > { %v5867_v14 = vpop.f32.mrf.mxu0 }
 0x128   : > { %v5911_v41 = vpop.f32.mrf.mxu1 }
 0x129   : > { %v831_v50 = vpop.f32.mrf.mxu0  ;;  %6205 = vmatmul.mubr.bf16.gmra.mxu0 %v2153_v43 }
 0x12a   : > { %v1115_v49 = vpop.f32.mrf.mxu1  ;;  %v885_v61 = vadd.f32 %v831_v50, %v7674_v38  ;;  %6208 = vmatprep.mubr.msk.bf16.mxu0 %vm6864_vm0, %v6863_v15 }
 0x12b   : > { %v5930_v27 = vpop.f32.mrf.mxu0 }
 0x12c   : > { %v5974_v28 = vpop.f32.mrf.mxu1  ;;  %v7800_v25 = vadd.f32 %v1115_v49, %v885_v61 }
 0x12d   : > { %v834_v20 = vpop.f32.mrf.mxu0 }
 0x12e   : > { %v1118_v8 = vpop.f32.mrf.mxu1  ;;  %v886_v22 = vadd.f32 %v834_v20, %v7685_v56 }
 0x12f   : > { %v5931_v38 = vpop.f32.mrf.mxu0 }
 0x130   : > { %v5975_v39 = vpop.f32.mrf.mxu1  ;;  %v7804_v30 = vadd.f32 %v1118_v8, %v886_v22 }
 0x131   : > { %v839_v54 = vpop.f32.mrf.mxu0  ;;  %6209 = vmatmul.mubr.bf16.gmra.mxu0 %v2157_v42 }
 0x132   : > { %v1123_v52 = vpop.f32.mrf.mxu1  ;;  %v887_v55 = vadd.f32 %v839_v54, %v7698_v48  ;;  %6212 = vmatprep.mubr.msk.bf16.mxu0 %vm6864_vm0, %v6863_v15 }
 0x133   : > { %v5934_v57 = vpop.f32.mrf.mxu0 }
 0x134   : > { %v5978_v13 = vpop.f32.mrf.mxu1  ;;  %v7809_v56 = vadd.f32 %v1123_v52, %v887_v55 }
 0x135   : > { %v842_v34 = vpop.f32.mrf.mxu0 }
 0x136   : > { %v1126_v19 = vpop.f32.mrf.mxu1  ;;  %v888_v31 = vadd.f32 %v842_v34, %v7706_v23 }
 0x137   : > { %v5935_v33 = vpop.f32.mrf.mxu0 }
 0x138   : > { %v5979_v32 = vpop.f32.mrf.mxu1  ;;  %v7813_v62 = vadd.f32 %v1126_v19, %v888_v31 }
 0x139   : > { %v847_v48 = vpop.f32.mrf.mxu0  ;;  %6213 = vmatmul.mubr.bf16.gmra.mxu0 %v2166_v40 }
 0x13a   : > { %v1131_v63 = vpop.f32.mrf.mxu1  ;;  %v889_v0 = vadd.f32 %v847_v48, %v7719_v37  ;;  %6216 = vmatprep.mubr.msk.bf16.mxu0 %vm6864_vm0, %v6863_v15 }
 0x13b   : > { %v5938_v1 = vpop.f32.mrf.mxu0 }
 0x13c   : > { %v5982_v2 = vpop.f32.mrf.mxu1  ;;  %v7818_v6 = vadd.f32 %v1131_v63, %v889_v0 }
 0x13d   : > { %v850_v23 = vpop.f32.mrf.mxu0 }
 0x13e   : > { %v1134_v7 = vpop.f32.mrf.mxu1  ;;  %v890_v59 = vadd.f32 %v850_v23, %v7729_v58 }
 0x13f   : > { %v5939_v11 = vpop.f32.mrf.mxu0 }
 0x140   : > { %v5983_v9 = vpop.f32.mrf.mxu1  ;;  %v7821_v12 = vadd.f32 %v1134_v7, %v890_v59 }
 0x141   : > { %v855_v17 = vpop.f32.mrf.mxu0  ;;  %6217 = vmatmul.mubr.bf16.gmra.mxu0 %v2165_v18 }
 0x142   : > { %v1139_v53 = vpop.f32.mrf.mxu1  ;;  %v891_v37 = vadd.f32 %v855_v17, %v7739_v46  ;;  %6280 = vmatprep.mubr.msk.bf16.mxu0 %vm6864_vm0, %v6863_v15 }
 0x143   : > { %v5942_v41 = vpop.f32.mrf.mxu0 }
 0x144   : > { %v5986_v24 = vpop.f32.mrf.mxu1  ;;  %v7826_v43 = vadd.f32 %v1139_v53, %v891_v37 }
 0x145   : > { %v858_v3 = vpop.f32.mrf.mxu0 }
 0x146   : > { %v1142_v4 = vpop.f32.mrf.mxu1  ;;  %v892_v58 = vadd.f32 %v858_v3, %v7750_v21 }
 0x147   : > { %v5943_v14 = vpop.f32.mrf.mxu0 }
 0x148   : > { %v5987_v26 = vpop.f32.mrf.mxu1  ;;  %v7829_v49 = vadd.f32 %v1142_v4, %v892_v58 }
 0x149   : > { %v863_v61 = vpop.f32.mrf.mxu0 }
 0x14a   : > { %v1147_v50 = vpop.f32.mrf.mxu1  ;;  %v893_v28 = vadd.f32 %v863_v61, %v7758_v16 }
 0x14b   : > { %v5946_v29 = vpop.f32.mrf.mxu0 }
 0x14c   : > { %v5990_v46 = vpop.f32.mrf.mxu1  ;;  %v7832_v36 = vadd.f32 %v1147_v50, %v893_v28 }
 0x14d   : > { %v866_v27 = vpop.f32.mrf.mxu0 }
 0x14e   : > { %v1150_v44 = vpop.f32.mrf.mxu1  ;;  %v894_v8 = vadd.f32 %v866_v27, %v7769_v51 }
 0x14f   : > { %v5947_v22 = vpop.f32.mrf.mxu0 }
 0x150   : > { %v5991_v20 = vpop.f32.mrf.mxu1  ;;  %v7835_v39 = vadd.f32 %v1150_v44, %v894_v8 }
 0x151   : > { %v871_v42 = vpop.f32.mrf.mxu0 }
 0x152   : > { %v1155_v21 = vpop.f32.mrf.mxu1  ;;  %v895_v45 = vadd.f32 %v871_v42, %v7777_v60 }
 0x153   : > { %v5950_v38 = vpop.f32.mrf.mxu0 }
 0x154   : > { %v5994_v47 = vpop.f32.mrf.mxu1  ;;  %v7838_v52 = vadd.f32 %v1155_v21, %v895_v45 }
 0x155   : > { %v874_v54 = vpop.f32.mrf.mxu0 }
 0x156   : > { %v1158_v16 = vpop.f32.mrf.mxu1  ;;  %v896_v55 = vadd.f32 %v874_v54, %v7785_v35 }
 0x157   : > { %v5951_v18 = vpop.f32.mrf.mxu0 }
 0x158   : > { %v5995_v13 = vpop.f32.mrf.mxu1  ;;  %v7841_v57 = vadd.f32 %v1158_v16, %v896_v55 }
 0x159   : > { %v879_v19 = vpop.f32.mrf.mxu0 }
 0x15a   : > { %v1163_v51 = vpop.f32.mrf.mxu1  ;;  %v897_v34 = vadd.f32 %v879_v19, %v7789_v5 }
 0x15b   : > { %v5954_v32 = vpop.f32.mrf.mxu0 }
 0x15c   : > { %v5998_v31 = vpop.f32.mrf.mxu1  ;;  %v7844_v40 = vadd.f32 %v1163_v51, %v897_v34 }
 0x15d   : > { %v882_v33 = vpop.f32.mrf.mxu0 }
 0x15e   : > { %v1166_v60 = vpop.f32.mrf.mxu1 }
 0x15f   : > { %v5955_v48 = vpop.f32.mrf.mxu0 }
 0x160   : > { %v5999_v63 = vpop.f32.mrf.mxu1 }
 0x161   : > { %v1295_v2 = vpop.f32.mrf.mxu0 }
 0x162   : > { %v1573_v0 = vpop.f32.mrf.mxu1  ;;  %v1349_v35 = vadd.f32 %v1295_v2, %v7800_v25 }
 0x163   : > { %v6018_v7 = vpop.f32.mrf.mxu0 }
 0x164   : > { %v6062_v1 = vpop.f32.mrf.mxu1  ;;  %v7847_v23 = vadd.f32 %v1573_v0, %v1349_v35 }
 0x165   : > { %v1298_v9 = vpop.f32.mrf.mxu0 }
 0x166   : > { %v1576_v59 = vpop.f32.mrf.mxu1  ;;  %v1350_v5 = vadd.f32 %v1298_v9, %v7804_v30 }
 0x167   : > { %v6019_v53 = vpop.f32.mrf.mxu0 }
 0x168   : > { %v6063_v11 = vpop.f32.mrf.mxu1  ;;  %v7850_v17 = vadd.f32 %v1576_v59, %v1350_v5 }
 0x169   : > { %v1303_v24 = vpop.f32.mrf.mxu0 }
 0x16a   : > { %v1581_v37 = vpop.f32.mrf.mxu1  ;;  %v1351_v41 = vadd.f32 %v1303_v24, %v7809_v56 }
 0x16b   : > { %v6022_v3 = vpop.f32.mrf.mxu0 }
 0x16c   : > { %v6066_v4 = vpop.f32.mrf.mxu1  ;;  %v7853_v58 = vadd.f32 %v1581_v37, %v1351_v41 }
 0x16d   : > { %v1306_v26 = vpop.f32.mrf.mxu0 }
 0x16e   : > { %v1584_v25 = vpop.f32.mrf.mxu1  ;;  %v1352_v14 = vadd.f32 %v1306_v26, %v7813_v62 }
 0x16f   : > { %v6023_v61 = vpop.f32.mrf.mxu0 }
 0x170   : > { %v6067_v50 = vpop.f32.mrf.mxu1  ;;  %v7856_v28 = vadd.f32 %v1584_v25, %v1352_v14 }
 0x171   : > { %v1311_v46 = vpop.f32.mrf.mxu0 }
 0x172   : > { %v1589_v30 = vpop.f32.mrf.mxu1  ;;  %v1353_v29 = vadd.f32 %v1311_v46, %v7818_v6 }
 0x173   : > { %v6026_v27 = vpop.f32.mrf.mxu0 }
 0x174   : > { %v6070_v44 = vpop.f32.mrf.mxu1  ;;  %v7859_v8 = vadd.f32 %v1589_v30, %v1353_v29 }
 0x175   : > { %v1314_v20 = vpop.f32.mrf.mxu0 }
 0x176   : > { %v1592_v56 = vpop.f32.mrf.mxu1  ;;  %v1354_v22 = vadd.f32 %v1314_v20, %v7821_v12 }
 0x177   : > { %v6027_v42 = vpop.f32.mrf.mxu0 }
 0x178   : > { %v6071_v21 = vpop.f32.mrf.mxu1  ;;  %v7862_v45 = vadd.f32 %v1592_v56, %v1354_v22 }
 0x179   : > { %v1319_v47 = vpop.f32.mrf.mxu0 }
 0x17a   : > { %v1597_v62 = vpop.f32.mrf.mxu1  ;;  %v1355_v38 = vadd.f32 %v1319_v47, %v7826_v43 }
 0x17b   : > { %v6030_v54 = vpop.f32.mrf.mxu0 }
 0x17c   : > { %v6074_v16 = vpop.f32.mrf.mxu1  ;;  %v7865_v55 = vadd.f32 %v1597_v62, %v1355_v38 }
 0x17d   : > { %v1322_v13 = vpop.f32.mrf.mxu0 }
 0x17e   : > { %v1600_v6 = vpop.f32.mrf.mxu1  ;;  %v1356_v18 = vadd.f32 %v1322_v13, %v7829_v49 }
 0x17f   : > { %v6031_v19 = vpop.f32.mrf.mxu0 }
 0x180   : > { %v6075_v51 = vpop.f32.mrf.mxu1  ;;  %v7868_v34 = vadd.f32 %v1600_v6, %v1356_v18 }
 0x181   : > { %v1327_v31 = vpop.f32.mrf.mxu0 }
 0x182   : > { %v1605_v12 = vpop.f32.mrf.mxu1  ;;  %v1357_v32 = vadd.f32 %v1327_v31, %v7832_v36 }
 0x183   : > { %v6034_v33 = vpop.f32.mrf.mxu0 }
 0x184   : > { %v6078_v60 = vpop.f32.mrf.mxu1  ;;  %v7871_v63 = vadd.f32 %v1605_v12, %v1357_v32 }
 0x185   : > { %v1330_v48 = vpop.f32.mrf.mxu0 }
 0x186   : > { %v1608_v43 = vpop.f32.mrf.mxu1  ;;  %v1358_v0 = vadd.f32 %v1330_v48, %v7835_v39 }
 0x187   : > { %v6035_v35 = vpop.f32.mrf.mxu0 }
 0x188   : > { %v6079_v2 = vpop.f32.mrf.mxu1  ;;  %v7874_v1 = vadd.f32 %v1608_v43, %v1358_v0 }
 0x189   : > { %v1335_v7 = vpop.f32.mrf.mxu0 }
 0x18a   : > { %v1613_v49 = vpop.f32.mrf.mxu1  ;;  %v1359_v59 = vadd.f32 %v1335_v7, %v7838_v52 }
 0x18b   : > { %v6038_v5 = vpop.f32.mrf.mxu0 }
 0x18c   : > { %v6082_v9 = vpop.f32.mrf.mxu1  ;;  %v7877_v11 = vadd.f32 %v1613_v49, %v1359_v59 }
 0x18d   : > { %v1338_v53 = vpop.f32.mrf.mxu0 }
 0x18e   : > { %v1616_v36 = vpop.f32.mrf.mxu1  ;;  %v1360_v37 = vadd.f32 %v1338_v53, %v7841_v57 }
 0x18f   : > { %v6039_v41 = vpop.f32.mrf.mxu0 }
 0x190   : > { %v6083_v24 = vpop.f32.mrf.mxu1  ;;  %v7880_v4 = vadd.f32 %v1616_v36, %v1360_v37 }
 0x191   : > { %v1343_v3 = vpop.f32.mrf.mxu0 }
 0x192   : > { %v1621_v39 = vpop.f32.mrf.mxu1  ;;  %v1361_v25 = vadd.f32 %v1343_v3, %v7844_v40 }
 0x193   : > { %v6042_v14 = vpop.f32.mrf.mxu0 }
 0x194   : > { %v6086_v26 = vpop.f32.mrf.mxu1  ;;  %v7883_v50 = vadd.f32 %v1621_v39, %v1361_v25 }
 0x195   : > { %v1346_v61 = vpop.f32.mrf.mxu0 }
 0x196   : > { %v1624_v52 = vpop.f32.mrf.mxu1 }
 0x197   : > { %v6043_v46 = vpop.f32.mrf.mxu0 }
 0x198   : > { %v6087_v30 = vpop.f32.mrf.mxu1 }
 0x199   : > { %v1850_v44 = vpop.f32.mrf.mxu0 }
 0x19a   : > { %v2041_v29 = vpop.f32.mrf.mxu1  ;;  %v1904_v57 = vadd.f32 %v1850_v44, %v7847_v23 }
 0x19b   : > { %v6106_v56 = vpop.f32.mrf.mxu0 }
 0x19c   : > { %v6150_v27 = vpop.f32.mrf.mxu1  ;;  %v7886_v20 = vadd.f32 %v2041_v29, %v1904_v57 }
 0x19d   : > { %v1853_v21 = vpop.f32.mrf.mxu0 }
 0x19e   : > { %v2044_v22 = vpop.f32.mrf.mxu1  ;;  %v1905_v40 = vadd.f32 %v1853_v21, %v7850_v17 }
 0x19f   : > { %v6107_v62 = vpop.f32.mrf.mxu0 }
 0x1a0   : > { %v6151_v42 = vpop.f32.mrf.mxu1  ;;  %v7889_v47 = vadd.f32 %v2044_v22, %v1905_v40 }
 0x1a1   : > { %v1858_v16 = vpop.f32.mrf.mxu0 }
 0x1a2   : > { %v2049_v38 = vpop.f32.mrf.mxu1  ;;  %v1906_v54 = vadd.f32 %v1858_v16, %v7853_v58 }
 0x1a3   : > { %v6110_v13 = vpop.f32.mrf.mxu0 }
 0x1a4   : > { %v6154_v6 = vpop.f32.mrf.mxu1  ;;  %v7892_v18 = vadd.f32 %v2049_v38, %v1906_v54 }
 0x1a5   : > { %v1861_v51 = vpop.f32.mrf.mxu0 }
 0x1a6   : > { %v2052_v23 = vpop.f32.mrf.mxu1  ;;  %v1907_v19 = vadd.f32 %v1861_v51, %v7856_v28 }
 0x1a7   : > { %v6111_v31 = vpop.f32.mrf.mxu0 }
 0x1a8   : > { %v6155_v12 = vpop.f32.mrf.mxu1  ;;  %v7895_v32 = vadd.f32 %v2052_v23, %v1907_v19 }
 0x1a9   : > { %v1866_v60 = vpop.f32.mrf.mxu0 }
 0x1aa   : > { %v2057_v17 = vpop.f32.mrf.mxu1  ;;  %v1908_v33 = vadd.f32 %v1866_v60, %v7859_v8 }
 0x1ab   : > { %v6114_v48 = vpop.f32.mrf.mxu0 }
 0x1ac   : > { %v6158_v43 = vpop.f32.mrf.mxu1  ;;  %v7898_v0 = vadd.f32 %v2057_v17, %v1908_v33 }
 0x1ad   : > { %v1869_v2 = vpop.f32.mrf.mxu0 }
 0x1ae   : > { %v2060_v58 = vpop.f32.mrf.mxu1  ;;  %v1909_v35 = vadd.f32 %v1869_v2, %v7862_v45 }
 0x1af   : > { %v6115_v7 = vpop.f32.mrf.mxu0 }
 0x1b0   : > { %v6159_v49 = vpop.f32.mrf.mxu1  ;;  %v7901_v59 = vadd.f32 %v2060_v58, %v1909_v35 }
 0x1b1   : > { %v1874_v9 = vpop.f32.mrf.mxu0 }
 0x1b2   : > { %v2065_v28 = vpop.f32.mrf.mxu1  ;;  %v1910_v5 = vadd.f32 %v1874_v9, %v7865_v55 }
 0x1b3   : > { %v6118_v53 = vpop.f32.mrf.mxu0 }
 0x1b4   : > { %v6162_v36 = vpop.f32.mrf.mxu1  ;;  %v7904_v37 = vadd.f32 %v2065_v28, %v1910_v5  ;;  %v7934_v5 = vld [vmem:[%s9276_s1 + $0x8] sm:$0xff] }
 0x1b5   : > { %v1877_v24 = vpop.f32.mrf.mxu0 }
 0x1b6   : > { %v2068_v8 = vpop.f32.mrf.mxu1  ;;  %v1911_v41 = vadd.f32 %v1877_v24, %v7868_v34 }
 0x1b7   : > { %v6119_v3 = vpop.f32.mrf.mxu0 }
 0x1b8   : > { %v6163_v39 = vpop.f32.mrf.mxu1  ;;  %v7907_v25 = vadd.f32 %v2068_v8, %v1911_v41  ;;  %v7960_v3 = vld [vmem:[%s9276_s1 + $0x18] sm:$0xff] }
 0x1b9   : > { %v1882_v26 = vpop.f32.mrf.mxu0 }
 0x1ba   : > { %v7909_v45 = vpop.f32.mrf.mxu1 }
 0x1bb   : > { %v6122_v52 = vpop.f32.mrf.mxu0 }
 0x1bc   : > { %v6166_v14 = vpop.f32.mrf.mxu1 }
 0x1bd   : > { %v1885_v55 = vpop.f32.mrf.mxu0 }
 0x1be   : > { %v7911_v61 = vpop.f32.mrf.mxu1 }
 0x1bf   : > { %v6123_v46 = vpop.f32.mrf.mxu0 }
 0x1c0   : > { %v6167_v30 = vpop.f32.mrf.mxu1 }
 0x1c1   : > { %v7915_v44 = vpop.f32.mrf.mxu0 }
 0x1c2   : > { %v7913_v29 = vpop.f32.mrf.mxu1 }
 0x1c3   : > { %v6126_v34 = vpop.f32.mrf.mxu0 }
 0x1c4   : > { %v6170_v57 = vpop.f32.mrf.mxu1 }
 0x1c5   : > { %v7919_v56 = vpop.f32.mrf.mxu0 }
 0x1c6   : > { %v7917_v27 = vpop.f32.mrf.mxu1 }
 0x1c7   : > { %v6127_v21 = vpop.f32.mrf.mxu0 }
 0x1c8   : > { %v6171_v22 = vpop.f32.mrf.mxu1 }
 0x1c9   : > { %v7923_v42 = vpop.f32.mrf.mxu0 }
 0x1ca   : > { %v7921_v40 = vpop.f32.mrf.mxu1 }
 0x1cb   : > { %v6130_v38 = vpop.f32.mrf.mxu0 }
 0x1cc   : > { %v6174_v62 = vpop.f32.mrf.mxu1  ;;  %v7985_v38 = vld [vmem:[%s9276_s1 + $0x28] sm:$0xff] }
 0x1cd   : > { %v1901_v54 = vpop.f32.mrf.mxu0 }
 0x1ce   : > { %v2092_v16 = vpop.f32.mrf.mxu1 }
 0x1cf   : > { %v6131_v13 = vpop.f32.mrf.mxu0 }
 0x1d0   : > { %v6175_v6 = vpop.f32.mrf.mxu1 }
 0x1d1   : > { %v2256_v23 = vpop.f32.mrf.mxu0 }
 0x1d2   : > { %v2310_v2 = vadd.f32 %v2256_v23, %v7886_v20 }
 0x1d3   : > { %v6194_v51 = vpop.f32.mrf.mxu0 }
 0x1d4   : > { %v7936_v36 = vmax.f32 %v2310_v2, 0.0 }
 0x1d5   : > { %v2259_v19 = vpop.f32.mrf.mxu0 }
 0x1d6   : > { %v2311_v48 = vadd.f32 %v2259_v19, %v7889_v47 }
 0x1d7   : > { %v6195_v12 = vpop.f32.mrf.mxu0 }
 0x1d8   : > { %v7928_v7 = vmax.f32 %v2311_v48, 0.0 }
 0x1d9   : > { %v2264_v31 = vpop.f32.mrf.mxu0 }
 0x1da   : > { %v2312_v35 = vadd.f32 %v2264_v31, %v7892_v18  ;;  %v7944_v18 = vld [vmem:[%s9276_s1] sm:$0xff]  ;;  %v2337_v8 = vmul.f32 %v7928_v7, %v7934_v5 }
 0x1db   : > { %v6198_v17 = vpop.f32.mrf.mxu0  ;;  %v2336_v14 = vmul.f32 %v7936_v36, %v7944_v18 }
 0x1dc   : > { %v7938_v53 = vmax.f32 %v2312_v35, 0.0 }
 0x1dd   : > { %v2267_v60 = vpop.f32.mrf.mxu0  ;;  %v2367_v16 = vmul.f32 %v2336_v14, %v7936_v36  ;;  %v2349_v23 = vadd.f32 %v2337_v8, %v2336_v14 }
 0x1de   : > { %v2313_v28 = vadd.f32 %v2267_v60, %v7895_v32  ;;  %v7949_v32 = vld [vmem:[%s9276_s1 + $0x10] sm:$0xff]  ;;  %v1914_v60 = vadd.f32 %v7915_v44, %v7877_v11  ;;  %v8019_v11 = vld [vmem:[%s9276_s1 + $0x40] sm:$0xff]  ;;  %v1915_v44 = vadd.f32 %v7919_v56, %v7880_v4  ;;  %v8035_v4 = vld [vmem:[%s9276_s1 + $0x48] sm:$0xff] }
 0x1df   : > { %v6199_v33 = vpop.f32.mrf.mxu0  ;;  %v2338_v52 = vmul.f32 %v7938_v53, %v7949_v32 }
 0x1e0   : > { %v7953_v24 = vmax.f32 %v2313_v28, 0.0 }
 0x1e1   : > { %v2272_v43 = vpop.f32.mrf.mxu0  ;;  %v2369_v54 = vmul.f32 %v2338_v52, %v7938_v53  ;;  %v2350_v33 = vadd.f32 %v2349_v23, %v2338_v52 }
 0x1e2   : > { %v2314_v47 = vadd.f32 %v2272_v43, %v7898_v0  ;;  %v1912_v0 = vadd.f32 %v1882_v26, %v7871_v63  ;;  %v7972_v63 = vld [vmem:[%s9276_s1 + $0x20] sm:$0xff]  ;;  %v2339_v26 = vmul.f32 %v7953_v24, %v7960_v3  ;;  %v8009_v43 = vld [vmem:[%s9276_s1 + $0x38] sm:$0xff] }
 0x1e3   : > { %v6202_v58 = vpop.f32.mrf.mxu0 }
 0x1e4   : > { %v7966_v30 = vmax.f32 %v2314_v47, 0.0  ;;  %v2103_v62 = vadd.f32 %v7909_v45, %v1912_v0  ;;  %v2370_v51 = vmul.f32 %v2339_v26, %v7953_v24  ;;  %v2351_v28 = vadd.f32 %v2350_v33, %v2339_v26 }
 0x1e5   : > { %v2275_v49 = vpop.f32.mrf.mxu0  ;;  %v2106_v26 = vadd.f32 %v7917_v27, %v1915_v44  ;;  %v8068_v44 = vld [vmem:[%s9276_s1 + $0x60] sm:$0xff] }
 0x1e6   : > { %v2315_v41 = vadd.f32 %v2275_v49, %v7901_v59  ;;  %v2368_v59 = vmul.f32 %v2337_v8, %v7928_v7  ;;  %v2340_v6 = vmul.f32 %v7966_v30, %v7972_v63 }
 0x1e7   : > { %v6203_v9 = vpop.f32.mrf.mxu0 }
 0x1e8   : > { %v7977_v34 = vmax.f32 %v2315_v41, 0.0  ;;  %v2371_v58 = vmul.f32 %v2340_v6, %v7966_v30  ;;  %v2105_v41 = vadd.f32 %v7913_v29, %v1914_v60 }
 0x1e9   : > { %v2280_v20 = vpop.f32.mrf.mxu0 }
 0x1ea   : > { %v2316_v46 = vadd.f32 %v2280_v20, %v7904_v37  ;;  %v1913_v37 = vadd.f32 %v1885_v55, %v7874_v1  ;;  %v7996_v1 = vld [vmem:[%s9276_s1 + $0x30] sm:$0xff]  ;;  %v2380_v55 = vadd.f32 %v2368_v59, %v2367_v16  ;;  %v2341_v19 = vmul.f32 %v7977_v34, %v7985_v38 }
 0x1eb   : > { %v6206_v39 = vpop.f32.mrf.mxu0 }
 0x1ec   : > { %v7991_v13 = vmax.f32 %v2316_v46, 0.0  ;;  %v2104_v17 = vadd.f32 %v7911_v61, %v1913_v37  ;;  %v2381_v48 = vadd.f32 %v2380_v55, %v2369_v54  ;;  %v2372_v47 = vmul.f32 %v2341_v19, %v7977_v34 }
 0x1ed   : > { %v2283_v57 = vpop.f32.mrf.mxu0  ;;  %v2352_v39 = vadd.f32 %v2351_v28, %v2340_v6  ;;  %v1916_v37 = vadd.f32 %v7923_v42, %v7883_v50  ;;  %v8056_v50 = vld [vmem:[%s9276_s1 + $0x58] sm:$0xff] }
 0x1ee   : > { %v2317_v22 = vadd.f32 %v2283_v57, %v7907_v25  ;;  %v2342_v2 = vmul.f32 %v7991_v13, %v7996_v1  ;;  %v2382_v9 = vadd.f32 %v2381_v48, %v2370_v51 }
 0x1ef   : > { %v6207_v21 = vpop.f32.mrf.mxu0  ;;  %v2353_v57 = vadd.f32 %v2352_v39, %v2341_v19 }
 0x1f0   : > { %v8001_v12 = vmax.f32 %v2317_v22, 0.0  ;;  %v2383_v14 = vadd.f32 %v2382_v9, %v2371_v58  ;;  %v2373_v52 = vmul.f32 %v2342_v2, %v7991_v13  ;;  %v8042_v21 = vld [vmem:[%s9276_s1 + $0x50] sm:$0xff] }
 0x1f1   : > { %v2288_v25 = vpop.f32.mrf.mxu0  ;;  %v2354_v16 = vadd.f32 %v2353_v57, %v2342_v2 }
 0x1f2   : > { %v2318_v45 = vadd.f32 %v2288_v25, %v2103_v62  ;;  %v2343_v20 = vmul.f32 %v8001_v12, %v8009_v43  ;;  %v2384_v29 = vadd.f32 %v2383_v14, %v2372_v47 }
 0x1f3   : > { %v6210_v31 = vpop.f32.mrf.mxu0 }
 0x1f4   : > { %v8014_v35 = vmax.f32 %v2318_v45, 0.0  ;;  %v2374_v22 = vmul.f32 %v2343_v20, %v8001_v12  ;;  %v2385_v25 = vadd.f32 %v2384_v29, %v2373_v52  ;;  %v2355_v45 = vadd.f32 %v2354_v16, %v2343_v20 }
 0x1f5   : > { %v2291_v49 = vpop.f32.mrf.mxu0  ;;  %v2107_v31 = vadd.f32 %v7921_v40, %v1916_v37 }
 0x1f6   : > { %v2319_v61 = vadd.f32 %v2291_v49, %v2104_v17  ;;  %v2344_v46 = vmul.f32 %v8014_v35, %v8019_v11  ;;  %v2386_v19 = vadd.f32 %v2385_v25, %v2374_v22 }
 0x1f7   : > { %v6211_v8 = vpop.f32.mrf.mxu0 }
 0x1f8   : > { %v8027_v0 = vmax.f32 %v2319_v61, 0.0  ;;  %v2375_v27 = vmul.f32 %v2344_v46, %v8014_v35  ;;  %v2356_v17 = vadd.f32 %v2355_v45, %v2344_v46 }
 0x1f9   : > { %v2296_v56 = vpop.f32.mrf.mxu0 }
 0x1fa   : > { %v2320_v59 = vadd.f32 %v2296_v56, %v2105_v41  ;;  %v2345_v54 = vmul.f32 %v8027_v0, %v8035_v4  ;;  %v2387_v48 = vadd.f32 %v2386_v19, %v2375_v27  ;;  %v6739_v27 = vld [vmem:[%s9282_s7 + $0x38] sm:$0xff]  }
 0x1fb   : > { %v6214_v62 = vpop.f32.mrf.mxu0  ;;  %6221 = vmatpush3.bf16.msra.mxu1 %v6739_v27  ;;  %v2603_v27 = vld [vmem:[#allocation2] sm:$0xc] }
 0x1fc   : > { %v8048_v6 = vmax.f32 %v2320_v59, 0.0  ;;  %v2376_v60 = vmul.f32 %v2345_v54, %v8027_v0  ;;  %v2357_v2 = vadd.f32 %v2356_v17, %v2345_v54  ;;  %6222 = vmatprep.subr.bf16.mxu1 %v6863_v15  ;;  %v6740_v17 = vld [vmem:[%s9282_s7 + $0x30] sm:$0xff]  }
 0x1fd   : > { %v2299_v23 = vpop.f32.mrf.mxu0 }
 0x1fe   : > { %v2346_v55 = vmul.f32 %v8048_v6, %v8042_v21  ;;  %v2321_v51 = vadd.f32 %v2299_v23, %v2106_v26  ;;  %v2388_v9 = vadd.f32 %v2387_v48, %v2376_v60  ;;  %v6746_v60 = vld [vmem:[%s9282_s7 + $0x68] sm:$0xff]  }
 0x1ff   : > { %v6215_v42 = vpop.f32.mrf.mxu0  ;;  %6223 = vmatpush3.bf16.msra.mxu1 %v6740_v17  ;;  %v6741_v48 = vld [vmem:[%s9282_s7 + $0x28] sm:$0xff]  }
 0x200   : > { %v8060_v33 = vmax.f32 %v2321_v51, 0.0  ;;  %v2377_v49 = vmul.f32 %v2346_v55, %v8048_v6  ;;  %v2358_v47 = vadd.f32 %v2357_v2, %v2346_v55  ;;  %v6742_v42 = vld [vmem:[%s9282_s7 + $0x78] sm:$0xff]   ;;  %6224 = vmatprep.subr.bf16.mxu1 %v6863_v15  ;;  %v6743_v2 = vld [vmem:[%s9282_s7 + $0x20] sm:$0xff]  }
 0x201   : > { %v2304_v58 = vpop.f32.mrf.mxu0  ;;  %6265 = vmatpush3.bf16.msra.mxu0 %v6742_v42 }
 0x202   : > { %v2347_v28 = vmul.f32 %v8060_v33, %v8056_v50  ;;  %v2322_v61 = vadd.f32 %v2304_v58, %v2107_v31  ;;  %v2389_v39 = vadd.f32 %v2388_v9, %v2377_v49  ;;  %6266 = vmatprep.subr.bf16.mxu0 %v6863_v15  ;;  %v6744_v31 = vld [vmem:[%s9282_s7 + $0x70] sm:$0xff]   ;;  %v6747_v58 = vld [vmem:[%s9282_s7 + $0x60] sm:$0xff]   ;;  %v6749_v49 = vld [vmem:[%s9282_s7 + $0x58] sm:$0xff]  }
 0x203   : > { %v6218_v40 = vpop.f32.mrf.mxu0  ;;  %6225 = vmatpush3.bf16.msra.mxu1 %v6741_v48  ;;  %v6752_v9 = vld [vmem:[%s9282_s7 + $0x48] sm:$0xff]  }
 0x204   : > { %v2378_v20 = vmul.f32 %v2347_v28, %v8060_v33  ;;  %v8071_v8 = vmax.f32 %v2322_v61, 0.0  ;;  %v2359_v14 = vadd.f32 %v2358_v47, %v2347_v28  ;;  %6226 = vmatprep.subr.bf16.mxu1 %v6863_v15  ;;  %v6745_v28 = vld [vmem:[%s9282_s7 + $0x18] sm:$0xff]   ;;  %v6750_v61 = vld [vmem:[%s9282_s7 + $0x50] sm:$0xff]   ;;  %v6751_v47 = vld [vmem:[%s9282_s7 + $0x8] sm:$0xff]  }
 0x205   : > { %v2307_v41 = vpop.f32.mrf.mxu0  ;;  %6267 = vmatpush3.bf16.msra.mxu0 %v6744_v31  ;;  %v6748_v40 = vld [vmem:[%s9282_s7 + $0x10] sm:$0xff]  }
 0x206   : > { %v2348_v52 = vmul.f32 %v8071_v8, %v8068_v44  ;;  %v2390_v56 = vadd.f32 %v2389_v39, %v2378_v20  ;;  %6268 = vmatprep.subr.bf16.mxu0 %v6863_v15  ;;  %v6753_v20 = vld [vmem:[%s9282_s7 + $0x40] sm:$0xff]  }
 0x207   : > { %v6219_v46 = vpop.f32.mrf.mxu0  ;;  %6227 = vmatpush3.bf16.msra.mxu1 %v6743_v2  ;;  %v6754_v41 = vld [vmem:[%s9282_s7] sm:$0xff]  }
 0x208   : > { %v2379_v57 = vmul.f32 %v2348_v52, %v8071_v8  ;;  %v2360_v59 = vadd.f32 %v2359_v14, %v2348_v52  ;;  %6228 = vmatprep.subr.bf16.mxu1 %v6863_v15 }
 0x209   : > { %6269 = vmatpush3.bf16.msra.mxu0 %v6746_v60 }
 0x20a   : > { %v2391_v26 = vadd.f32 %v2390_v56, %v2379_v57  ;;  %v2361_v29 = vrot.slane %v2360_v59, 4  ;;  %6270 = vmatprep.subr.bf16.mxu0 %v6863_v15 }
 0x20b   : > { %6229 = vmatpush3.bf16.msra.mxu1 %v6745_v28 }
 0x20c   : > { %v2392_v22 = vrot.slane %v2391_v26, 4  ;;  %v2362_v62 = vadd.f32 %v2361_v29, %v2360_v59  ;;  %6230 = vmatprep.subr.bf16.mxu1 %v6863_v15  ;;  %v2409_v29 = vlaneseq }
 0x20d   : > { %6271 = vmatpush3.bf16.msra.mxu0 %v6747_v58 }
 0x20e   : > { %v2363_v37 = vrot.slane %v2362_v62, 2  ;;  %v2393_v16 = vadd.f32 %v2392_v22, %v2391_v26  ;;  %6272 = vmatprep.subr.bf16.mxu0 %v6863_v15 }
 0x20f   : > { %6231 = vmatpush3.bf16.msra.mxu1 %v6748_v40 }
 0x210   : > { %v2364_v54 = vadd.f32 %v2363_v37, %v2362_v62  ;;  %v2394_v25 = vrot.slane %v2393_v16, 2  ;;  %6232 = vmatprep.subr.bf16.mxu1 %v6863_v15  ;;  %v2410_v37 = vshrl.u32 %v2409_v29, 7 }
 0x211   : > { %6273 = vmatpush3.bf16.msra.mxu0 %v6749_v49 }
 0x212   : > { %v2365_v23 = vrot.slane %v2364_v54, 1  ;;  %v2395_v45 = vadd.f32 %v2394_v25, %v2393_v16  ;;  %6274 = vmatprep.subr.bf16.mxu0 %v6863_v15  ;;  %v8142_v16 = vsub.s32 0, %v2410_v37  ;;  %v8147_v25 = vld [vmem:[#allocation2 + $0x4] sm:$0xf] }
 0x213   : > { %6233 = vmatpush3.bf16.msra.mxu1 %v6751_v47 }
 0x214   : > { %v2366_v55 = vadd.f32 %v2365_v23, %v2364_v54  ;;  %v2396_v51 = vrot.slane %v2395_v45, 1  ;;  %6234 = vmatprep.subr.bf16.mxu1 %v6863_v15 }
 0x215   : > { %6275 = vmatpush3.bf16.msra.mxu0 %v6750_v61 }
 0x216   : > { %2398 = vrot.lane.b32.xlu0 %v2366_v55, %s6865_s11  ;;  %v2397_v19 = vadd.f32 %v2396_v51, %v2395_v45  ;;  %6276 = vmatprep.subr.bf16.mxu0 %v6863_v15 }
 0x217   : > { %6235 = vmatpush3.bf16.msra.mxu1 %v6754_v41 }
 0x218   : > { %6308 = vmatprep.subr.bf16.mxu1 %v6863_v15 }
 0x219   : > { %6277 = vmatpush3.bf16.msra.mxu0 %v6752_v9 }
 0x21a   : > { %2401 = vrot.lane.b32.xlu0 %v2397_v19, %s6865_s11  ;;  %6278 = vmatprep.subr.bf16.mxu0 %v6863_v15 }
 0x21d   : > { %6279 = vmatpush3.bf16.msra.mxu0 %v6753_v20 }
 0x21e   : > { %6352 = vmatprep.subr.bf16.mxu0 %v6863_v15 }
 0x288   : > { %v2399_v39 = vpop.permute.xlu0 %2398 }
 0x289   : > { %v2400_v14 = vadd.f32 %v2399_v39, %v2366_v55  ;;  %v8154_v55 = vcombine.low %v2603_v27, %v8147_v25 }
 0x28b   : > { %v2404_v46 = vmul.f32 0.0078125, %v2400_v14 }
 0x28c   : > { %v2402_v52 = vpop.permute.xlu0 %2401 }
 0x28d   : > { %v2403_v56 = vadd.f32 %v2402_v52, %v2397_v19  ;;  %v2406_v57 = vmul.f32 %v2404_v46, %v2404_v46  ;;  %v8145_v54 = vrot.slane %v2404_v46, %v8142_v16 }
 0x28f   : > { %v2405_v59 = vmul.f32 0.0078125, %v2403_v56  ;;  %v2413_v23 = vsub.f32 %v7936_v36, %v8145_v54  ;;  %v2414_v45 = vsub.f32 %v7928_v7, %v8145_v54  ;;  %v2415_v19 = vsub.f32 %v7938_v53, %v8145_v54 }
 0x290   : > { %v2416_v42 = vsub.f32 %v7953_v24, %v8145_v54  ;;  %v2417_v31 = vsub.f32 %v7966_v30, %v8145_v54  ;;  %v2418_v17 = vsub.f32 %v7977_v34, %v8145_v54  ;;  %v2419_v36 = vsub.f32 %v7991_v13, %v8145_v54 }
 0x291   : > { %v2407_v26 = vsub.f32 %v2405_v59, %v2406_v57  ;;  %v2420_v7 = vsub.f32 %v8001_v12, %v8145_v54  ;;  %v2421_v60 = vsub.f32 %v8014_v35, %v8145_v54  ;;  %v2422_v24 = vsub.f32 %v8027_v0, %v8145_v54  ;;  %v5200_v12 = vld [vmem:[%s9279_s4] ss:$0 sm:$0xff] }
 0x292   : > { %v2423_v30 = vsub.f32 %v8048_v6, %v8145_v54  ;;  %v2424_v34 = vsub.f32 %v8060_v33, %v8145_v54  ;;  %v2425_v13 = vsub.f32 %v8071_v8, %v8145_v54  ;;  %v5201_v6 = vld [vmem:[%s9280_s5] ss:$0 sm:$0xff] }
 0x293   : > { %v2408_v22 = vmax.f32 %v2407_v26, 0.0 }
 0x295   : > { %v2426_v62 = vadd.f32 1e-05, %v2408_v22 }
 0x297   : > { %6850 = vrsqrt.f32 %v2426_v62 }
 0x2a4   : > { %v6851_v51 = vpop.eup %6850 }
 0x2a5   : > { %v2431_v53 = vrot.slane %v6851_v51, %v8142_v16 }
 0x2a7   : > { %v2432_v48 = vmul.f32 %v2431_v53, %v2413_v23  ;;  %v2433_v35 = vmul.f32 %v2431_v53, %v2414_v45  ;;  %v2434_v58 = vmul.f32 %v2431_v53, %v2415_v19  ;;  %v2435_v2 = vmul.f32 %v2431_v53, %v2416_v42 }
 0x2a8   : > { %v2436_v49 = vmul.f32 %v2431_v53, %v2417_v31  ;;  %v2437_v28 = vmul.f32 %v2431_v53, %v2418_v17  ;;  %v2438_v0 = vmul.f32 %v2431_v53, %v2419_v36  ;;  %v2439_v61 = vmul.f32 %v2431_v53, %v2420_v7 }
 0x2a9   : > { %v2440_v33 = vmul.f32 %v2431_v53, %v2421_v60  ;;  %v2441_v40 = vmul.f32 %v2431_v53, %v2422_v24  ;;  %v2442_v9 = vmul.f32 %v2431_v53, %v2423_v30  ;;  %v2443_v8 = vmul.f32 %v2431_v53, %v2424_v34 }
 0x2aa   : > { %v2452_v47 = vmul.f32 %v5200_v12, %v2432_v48  ;;  %v2453_v20 = vmul.f32 %v5200_v12, %v2433_v35  ;;  %v2454_v41 = vmul.f32 %v5200_v12, %v2434_v58  ;;  %v2455_v39 = vmul.f32 %v5200_v12, %v2435_v2 }
 0x2ab   : > { %v2462_v14 = vmul.f32 %v5200_v12, %v2442_v9  ;;  %v2463_v52 = vmul.f32 %v5200_v12, %v2443_v8  ;;  %v2456_v46 = vmul.f32 %v5200_v12, %v2436_v49  ;;  %v2457_v56 = vmul.f32 %v5200_v12, %v2437_v28 }
 0x2ac   : > { %v2472_v57 = vadd.f32 %v5201_v6, %v2452_v47  ;;  %v2473_v59 = vadd.f32 %v5201_v6, %v2453_v20  ;;  %v2474_v26 = vadd.f32 %v5201_v6, %v2454_v41  ;;  %v2475_v29 = vadd.f32 %v5201_v6, %v2455_v39 }
 0x2ad   : > { %v2482_v22 = vadd.f32 %v5201_v6, %v2462_v14  ;;  %v2483_v62 = vadd.f32 %v5201_v6, %v2463_v52  ;;  %v2476_v37 = vadd.f32 %v5201_v6, %v2456_v46  ;;  %v2477_v54 = vadd.f32 %v5201_v6, %v2457_v56  ;;  %v6758_v46 = vld [vmem:[%s9282_s7 + $0xb8] sm:$0xff]   ;;  %v6766_v56 = vld [vmem:[%s9282_s7 + $0xf0] sm:$0xff]  }
 0x2ae   : > { %v2485_v27 = vmul.f32 %v2472_v57, %v7944_v18  ;;  %v2486_v23 = vmul.f32 %v2473_v59, %v7934_v5  ;;  %v2487_v45 = vmul.f32 %v2474_v26, %v7949_v32  ;;  %v2488_v51 = vmul.f32 %v2475_v29, %v7960_v3  ;;  %v2886_v5 = vld [vmem:[#allocation2] sm:$0x8] }
 0x2af   : > { %v2489_v19 = vmul.f32 %v2476_v37, %v7972_v63  ;;  %v2490_v42 = vmul.f32 %v2477_v54, %v7985_v38  ;;  %v2458_v31 = vmul.f32 %v5200_v12, %v2438_v0  ;;  %v2459_v17 = vmul.f32 %v5200_v12, %v2439_v61  ;;  %v6769_v37 = vld [vmem:[%s9282_s7 + $0xe8] sm:$0xff]  }
 0x2b0   : > { %v5515_v36 = vpack.c.bf16 %v2486_v23, %v2485_v27  ;;  %v5520_v7 = vpack.c.bf16 %v2488_v51, %v2487_v45  ;;  %v2460_v60 = vmul.f32 %v5200_v12, %v2440_v33  ;;  %v2461_v24 = vmul.f32 %v5200_v12, %v2441_v40  ;;  %v6762_v51 = vld [vmem:[%s9282_s7 + $0xa8] sm:$0xff]  }
 0x2b1   : > { %v5525_v30 = vpack.c.bf16 %v2490_v42, %v2489_v19  ;;  %v2478_v34 = vadd.f32 %v5201_v6, %v2458_v31  ;;  %v2479_v48 = vadd.f32 %v5201_v6, %v2459_v17  ;;  %v2495_v18 = vmul.f32 %v2482_v22, %v8042_v21  ;;  %v6770_v19 = vld [vmem:[%s9282_s7 + $0xe0] sm:$0xff]  }
 0x2b2   : > { %5548 = vst [vmem:[#allocation2 + $0x8] sm:$0xff] %v5515_v36   ;;  %5549 = vst [vmem:[#allocation2 + $0x10] sm:$0xff] %v5520_v7   ;;  %v2480_v32 = vadd.f32 %v5201_v6, %v2460_v60  ;;  %v2481_v3 = vadd.f32 %v5201_v6, %v2461_v24  ;;  %v2496_v63 = vmul.f32 %v2483_v62, %v8056_v50  ;;  %v2669_v38 = vshrl.u32 %v8154_v55, 16  ;;  %v6760_v62 = vld [vmem:[%s9282_s7 + $0xb0] sm:$0xff]   ;;  %v6765_v60 = vld [vmem:[%s9282_s7 + $0xa0] sm:$0xff]  }
 0x2b3   : > { %v2444_v35 = vmul.f32 %v2431_v53, %v2425_v13  ;;  %v2672_v58 = vshll.u32 %v8154_v55, 16  ;;  %5550 = vst [vmem:[#allocation2 + $0x18] sm:$0xff] %v5525_v30   ;;  %v2491_v2 = vmul.f32 %v2478_v34, %v7996_v1  ;;  %v2492_v49 = vmul.f32 %v2479_v48, %v8009_v43  ;;  %v6773_v24 = vld [vmem:[%s9282_s7 + $0xd8] sm:$0xff]  }
 0x2b4   : > { %v2493_v28 = vmul.f32 %v2480_v32, %v8019_v11  ;;  %v2494_v21 = vmul.f32 %v2481_v3, %v8035_v4  ;;  %v5540_v0 = vpack.c.bf16 %v2496_v63, %v2495_v18  ;;  %v8200_v33 = vcombine.low %v2886_v5, %v8147_v25  ;;  %v6768_v5 = vld [vmem:[%s9282_s7 + $0x98] sm:$0xff]   ;;  %v6774_v32 = vld [vmem:[%s9282_s7 + $0xd0] sm:$0xff]  }
 0x2b5   : > { %v2464_v61 = vmul.f32 %v5200_v12, %v2444_v35  ;;  %v5530_v50 = vpack.c.bf16 %v2492_v49, %v2491_v2  ;;  %v2671_v55 = vrot.slane %v2669_v38, 2  ;;  %v2674_v40 = vrot.slane %v2672_v58, 3  ;;  %v6772_v2 = vld [vmem:[%s9282_s7 + $0x90] sm:$0xff]   ;;  %v6776_v49 = vld [vmem:[%s9282_s7 + $0xc8] sm:$0xff]  }
 0x2b6   : > { %v5535_v53 = vpack.c.bf16 %v2494_v21, %v2493_v28  ;;  %5553 = vst [vmem:[#allocation2 + $0x30] sm:$0xff] %v5540_v0   ;;  %v2907_v11 = vrot.slane %v8200_v33, 3 }
 0x2b7   : > { %v2484_v13 = vadd.f32 %v5201_v6, %v2464_v61  ;;  %5551 = vst [vmem:[#allocation2 + $0x20] sm:$0xff] %v5530_v50   ;;  %v6764_v6 = vld [vmem:[%s9282_s7 + $0xf8] sm:$0xff]   ;;  %v2675_v47 = vor.u32 %v2674_v40, %v2671_v55  ;;  %v6775_v50 = vld [vmem:[%s9282_s7 + $0x88] sm:$0xff]   ;;  %v6777_v40 = vld [vmem:[%s9282_s7 + $0xc0] sm:$0xff]  }
 0x2b8   : > { %5552 = vst [vmem:[#allocation2 + $0x28] sm:$0xff] %v5535_v53  }
 0x2b9   : > { %v2497_v1 = vmul.f32 %v2484_v13, %v8068_v44  ;;  %v8203_v43 = vld [vmem:[#allocation2 + $0x8] sm:$0xff]   ;;  %v8206_v4 = vld [vmem:[#allocation2 + $0x10] sm:$0xff]  }
 0x2ba   : > { %v2908_v25 = vrot.slane %v8203_v43, 3  ;;  %v2677_v9 = vshrl.u32 %v8203_v43, 16  ;;  %v2680_v8 = vshll.u32 %v8203_v43, 16  ;;  %v2686_v44 = vshrl.u32 %v8206_v4, 16  ;;  %v8236_v22 = vld [vmem:[#allocation2 + $0x18] sm:$0xff]  }
 0x2bb   : > { %v5481_v12 = vpack.c.bf16 %v2497_v1, %v2497_v1  ;;  %v2689_v14 = vshll.u32 %v8206_v4, 16  ;;  %v2910_v59 = vrot.slane %v8206_v4, 3  ;;  %v2695_v23 = vshrl.u32 %v8236_v22, 16  ;;  %v8324_v1 = vld [vmem:[#allocation2 + $0x8] sm:$0xf]  ;;  %v6783_v4 = vld [vmem:[%s9282_s7 + $0x130] sm:$0xff]  }
 0x2bc   : > { %v2909_v20 = vsel %vm513_vm2, %v2907_v11, %v2908_v25  ;;  %v2679_v41 = vrot.slane %v2677_v9, 2  ;;  %v2682_v39 = vrot.slane %v2680_v8, 3  ;;  %v2688_v26 = vrot.slane %v2686_v44, 2  ;;  %v8326_v11 = vld [vmem:[#allocation2 + $0xc] sm:$0xf] }
 0x2bd   : > { %2563 = vst [vmem:[#allocation2 + $0x38] sm:$0xf] %v5481_v12  ;;  %6281 = vmatmul.mubr.bf16.vlgmr.msra.gmra.mxu0 %v2909_v20  ;;  %v2691_v29 = vrot.slane %v2689_v14, 3  ;;  %v2911_v54 = vsel %vm513_vm2, %v2908_v25, %v2910_v59  ;;  %v2698_v45 = vshll.u32 %v8236_v22, 16  ;;  %v2912_v31 = vrot.slane %v8236_v22, 3  ;;  %v6796_v22 = vld [vmem:[%s9282_s7 + $0x158] sm:$0xff]  }
 0x2be   : > { %v2683_v52 = vor.u32 %v2682_v39, %v2679_v41  ;;  %6284 = vmatprep.mubr.msk.bf16.mxu0 %vm6864_vm0, %v6863_v15  ;;  %6353 = vmatpush3.bf16.msra.mxu0 %v6764_v6  ;;  %v2697_v17 = vrot.slane %v2695_v23, 2  ;;  %v8266_v7 = vld [vmem:[#allocation2 + $0x20] sm:$0xff]   ;;  %v8317_v13 = vld [vmem:[#allocation2 + $0x30] sm:$0xf]  ;;  %v2616_v55 = vld [vmem:[#allocation2 + $0x34] sm:$0x7] }
 0x2bf   : > { %6354 = vmatprep.subr.bf16.mxu0 %v6863_v15  ;;  %v2692_v27 = vor.u32 %v2691_v29, %v2688_v26  ;;  %v2700_v36 = vrot.slane %v2698_v45, 3  ;;  %v2913_v30 = vsel %vm513_vm2, %v2910_v59, %v2912_v31  ;;  %v2704_v48 = vshrl.u32 %v8266_v7, 16  ;;  %v8297_v58 = vld [vmem:[#allocation2 + $0x28] sm:$0xff]   ;;  %v8329_v12 = vld [vmem:[#allocation2 + $0x10] sm:$0xf]  ;;  %v6778_v39 = vld [vmem:[%s9282_s7 + $0x80] sm:$0xff]  }
 0x2c0   : > { %v2684_v57 = vsel %vm273_vm1, %v2675_v47, %v2683_v52  ;;  %v2707_v18 = vshll.u32 %v8266_v7, 16  ;;  %v2914_v63 = vrot.slane %v8266_v7, 3  ;;  %v2713_v0 = vshrl.u32 %v8297_v58, 16  ;;  %v8338_v41 = vld [vmem:[#allocation2 + $0x14] sm:$0xf] }
 0x2c1   : > { %6237 = vmatmul.mubr.bf16.vlgmr.msra.gmra.mxu1 %v2684_v57  ;;  %v2693_v42 = vsel %vm273_vm1, %v2683_v52, %v2692_v27  ;;  %v2701_v34 = vor.u32 %v2700_v36, %v2697_v17  ;;  %v2706_v35 = vrot.slane %v2704_v48, 2  ;;  %v2716_v61 = vshll.u32 %v8297_v58, 16  ;;  %v8343_v52 = vld [vmem:[#allocation2 + $0x18] sm:$0xf]  ;;  %v8351_v57 = vld [vmem:[#allocation2 + $0x20] sm:$0xf] }
 0x2c2   : > { %6309 = vmatpush3.bf16.msra.mxu1 %v6758_v46  ;;  %6240 = vmatprep.mubr.msk.bf16.mxu1 %vm6864_vm0, %v6863_v15  ;;  %v2709_v38 = vrot.slane %v2707_v18, 3  ;;  %v2915_v28 = vsel %vm513_vm2, %v2912_v31, %v2914_v63  ;;  %v2916_v53 = vrot.slane %v8297_v58, 3  ;;  %v2715_v6 = vrot.slane %v2713_v0, 2  ;;  %v8345_v46 = vld [vmem:[#allocation2 + $0x1c] sm:$0xf]  ;;  %v6795_v7 = vld [vmem:[%s9282_s7 + $0x110] sm:$0xff]  }
 0x2c3   : > { %6310 = vmatprep.subr.bf16.mxu1 %v6863_v15  ;;  %6355 = vmatpush3.bf16.msra.mxu0 %v6766_v56  ;;  %v2702_v3 = vsel %vm273_vm1, %v2692_v27, %v2701_v34  ;;  %v2718_v47 = vrot.slane %v2716_v61, 3  ;;  %v5221_v20 = vcombine.low %v8317_v13, %v2616_v55  ;;  %v5327_v56 = vcombine.low %v8324_v1, %v8326_v11  ;;  %v8355_v26 = vld [vmem:[#allocation2 + $0x24] sm:$0xf]  ;;  %v8359_v27 = vld [vmem:[#allocation2 + $0x28] sm:$0xf] }
 0x2c4   : > { %6356 = vmatprep.subr.bf16.mxu0 %v6863_v15  ;;  %v2710_v21 = vor.u32 %v2709_v38, %v2706_v35  ;;  %v2917_v59 = vsel %vm513_vm2, %v2914_v63, %v2916_v53  ;;  %v5328_v29 = vcombine.low %v8329_v12, %v8338_v41  ;;  %v8370_v31 = vld [vmem:[#allocation2 + $0x34] sm:$0xf]  ;;  %v5330_v17 = vcombine.low %v8351_v57, %v8355_v26  ;;  %v6802_v58 = vld [vmem:[%s9282_s7 + $0x100] sm:$0xff]  }
 0x2c5   : > { %6285 = vmatmul.mubr.bf16.gmra.mxu0 %v2911_v54  ;;  %v2725_v54 = vshll.u32 %v5221_v20, 16  ;;  %v5297_v38 = vcombine.low %v8326_v11, %v8329_v12 }
 0x2c6   : > { %6311 = vmatpush3.bf16.msra.mxu1 %v6760_v62  ;;  %6288 = vmatprep.mubr.msk.bf16.mxu0 %vm6864_vm0, %v6863_v15  ;;  %v2711_v25 = vsel %vm273_vm1, %v2701_v34, %v2710_v21  ;;  %v2719_v62 = vor.u32 %v2718_v47, %v2715_v6 }
 0x2c7   : > { %6312 = vmatprep.subr.bf16.mxu1 %v6863_v15  ;;  %6357 = vmatpush3.bf16.msra.mxu0 %v6769_v37  ;;  %v2722_v37 = vshrl.u32 %v5221_v20, 16  ;;  %v2727_v34 = vrot.slane %v2725_v54, 3 }
 0x2c8   : > { %6358 = vmatprep.subr.bf16.mxu0 %v6863_v15 }
 0x2c9   : > { %6241 = vmatmul.mubr.bf16.gmra.mxu1 %v2693_v42  ;;  %v8368_v42 = vld [vmem:[#allocation2 + $0x30] sm:$0xf] }
 0x2ca   : > { %6244 = vmatprep.mubr.msk.bf16.mxu1 %vm6864_vm0, %v6863_v15  ;;  %6313 = vmatpush3.bf16.msra.mxu1 %v6762_v51  ;;  %v8362_v51 = vld [vmem:[#allocation2 + $0x2c] sm:$0xf] }
 0x2cb   : > { %6314 = vmatprep.subr.bf16.mxu1 %v6863_v15  ;;  %6359 = vmatpush3.bf16.msra.mxu0 %v6770_v19  ;;  %v5329_v19 = vcombine.low %v8343_v52, %v8345_v46  ;;  %v5331_v36 = vcombine.low %v8359_v27, %v8362_v51 }
 0x2cc   : > { %6360 = vmatprep.subr.bf16.mxu0 %v6863_v15 }
 0x2cd   : > { %6289 = vmatmul.mubr.bf16.gmra.mxu0 %v2913_v30  ;;  %v2724_v30 = vrot.slane %v2722_v37, 2  ;;  %v3106_v37 = vrot.slane %v2680_v8, 4 }
 0x2ce   : > { %6292 = vmatprep.mubr.msk.bf16.mxu0 %vm6864_vm0, %v6863_v15  ;;  %6315 = vmatpush3.bf16.msra.mxu1 %v6765_v60  ;;  %v2720_v60 = vsel %vm273_vm1, %v2710_v21, %v2719_v62  ;;  %v3365_v21 = vshrl.u32 %v5297_v38, 16 }
 0x2cf   : > { %6316 = vmatprep.subr.bf16.mxu1 %v6863_v15  ;;  %6361 = vmatpush3.bf16.msra.mxu0 %v6773_v24  ;;  %v2918_v24 = vrot.slane %v5221_v20, 3  ;;  %v2728_v35 = vor.u32 %v2727_v34, %v2724_v30  ;;  %v5298_v20 = vcombine.low %v8338_v41, %v8343_v52 }
 0x2d0   : > { %6362 = vmatprep.subr.bf16.mxu0 %v6863_v15  ;;  %v3367_v6 = vrot.slane %v3365_v21, 3 }
 0x2d1   : > { %6245 = vmatmul.mubr.bf16.gmra.mxu1 %v2702_v3  ;;  %v2919_v63 = vsel %vm513_vm2, %v2916_v53, %v2918_v24  ;;  %v3098_v53 = vshrl.u32 %v8200_v33, 16  ;;  %v3377_v30 = vshll.u32 %v5298_v20, 16 }
 0x2d2   : > { %6248 = vmatprep.mubr.msk.bf16.mxu1 %vm6864_vm0, %v6863_v15  ;;  %6317 = vmatpush3.bf16.msra.mxu1 %v6768_v5  ;;  %v3290_v5 = vld [vmem:[#allocation2 + $0x4] sm:$0x8] }
 0x2d3   : > { %6318 = vmatprep.subr.bf16.mxu1 %v6863_v15  ;;  %6363 = vmatpush3.bf16.msra.mxu0 %v6774_v32  ;;  %v5332_v32 = vcombine.low %v8368_v42, %v8370_v31  ;;  %v5296_v3 = vcombine.low %v3290_v5, %v8324_v1  ;;  %v5299_v5 = vcombine.low %v8345_v46, %v8351_v57 }
 0x2d4   : > { %6364 = vmatprep.subr.bf16.mxu0 %v6863_v15 }
 0x2d5   : > { %6293 = vmatmul.mubr.bf16.gmra.mxu0 %v2915_v28  ;;  %v3360_v28 = vshll.u32 %v5296_v3, 16  ;;  %v3383_v21 = vshrl.u32 %v5299_v5, 16 }
 0x2d6   : > { %6296 = vmatprep.mubr.msk.bf16.mxu0 %vm6864_vm0, %v6863_v15  ;;  %6319 = vmatpush3.bf16.msra.mxu1 %v6772_v2  ;;  %v3357_v2 = vshrl.u32 %v5296_v3, 16  ;;  %v3379_v3 = vrot.slane %v3377_v30, 4 }
 0x2d7   : > { %6320 = vmatprep.subr.bf16.mxu1 %v6863_v15  ;;  %6365 = vmatpush3.bf16.msra.mxu0 %v6776_v49  ;;  %v2729_v49 = vsel %vm273_vm1, %v2719_v62, %v2728_v35  ;;  %v3105_v62 = vrot.slane %v2677_v9, 3 }
 0x2d8   : > { %6366 = vmatprep.subr.bf16.mxu0 %v6863_v15  ;;  %v3359_v55 = vrot.slane %v3357_v2, 3  ;;  %v6789_v2 = vld [vmem:[%s9282_s7 + $0x170] sm:$0xff]  }
 0x2d9   : > { %6249 = vmatmul.mubr.bf16.gmra.mxu1 %v2711_v25  ;;  %v3362_v25 = vrot.slane %v3360_v28, 4  ;;  %v3107_v43 = vor.u32 %v3106_v37, %v3105_v62  ;;  %v3114_v62 = vrot.slane %v2698_v45, 4 }
 0x2da   : > { %6252 = vmatprep.mubr.msk.bf16.mxu1 %vm6864_vm0, %v6863_v15  ;;  %6321 = vmatpush3.bf16.msra.mxu1 %v6775_v50  ;;  %v3368_v50 = vshll.u32 %v5297_v38, 16  ;;  %v3110_v38 = vrot.slane %v2689_v14, 4  ;;  %v6792_v14 = vld [vmem:[%s9282_s7 + $0x168] sm:$0xff]  }
 0x2db   : > { %6322 = vmatprep.subr.bf16.mxu1 %v6863_v15  ;;  %6367 = vmatpush3.bf16.msra.mxu0 %v6777_v40  ;;  %v3101_v40 = vshll.u32 %v8200_v33, 16  ;;  %v3363_v54 = vor.u32 %v3362_v25, %v3359_v55  ;;  %v5300_v25 = vcombine.low %v8355_v26, %v8359_v27  ;;  %v4308_v27 = vld [vmem:[#allocation2 + $0xc] sm:$0xe] }
 0x2dc   : > { %6440 = vmatprep.subr.bf16.mxu0 %v6863_v15  ;;  %v3370_v47 = vrot.slane %v3368_v50, 4  ;;  %v3386_v50 = vshll.u32 %v5299_v5, 16  ;;  %v3117_v5 = vrot.slane %v2704_v48, 3 }
 0x2dd   : > { %6297 = vmatmul.mubr.bf16.gmra.mxu0 %v2917_v59  ;;  %v3103_v59 = vrot.slane %v3101_v40, 4  ;;  %v3392_v37 = vshrl.u32 %v5300_v25, 16 }
 0x2de   : > { %6300 = vmatprep.mubr.msk.bf16.mxu0 %vm6864_vm0, %v6863_v15  ;;  %6323 = vmatpush3.bf16.msra.mxu1 %v6778_v39  ;;  %v3100_v39 = vrot.slane %v3098_v53, 3  ;;  %v3371_v33 = vor.u32 %v3370_v47, %v3367_v6  ;;  %v3385_v53 = vrot.slane %v3383_v21, 3  ;;  %v3388_v40 = vrot.slane %v3386_v50, 4  ;;  %v6785_v6 = vld [vmem:[%s9282_s7 + $0x128] sm:$0xff]   ;;  %v3076_v50 = vld [vmem:[#allocation2 + $0x34] sm:$0xf] }
 0x2df   : > { %6396 = vmatprep.subr.bf16.mxu1 %v6863_v15  ;;  %v3394_v30 = vrot.slane %v3392_v37, 3 }
 0x2e0   : > { %v3104_v34 = vor.u32 %v3103_v59, %v3100_v39  ;;  %v3372_v9 = vsel %vm704_vm3, %v3363_v54, %v3371_v33  ;;  %v6793_v39 = vld [vmem:[%s9282_s7 + $0x160] sm:$0xff]   ;;  %v3389_v59 = vor.u32 %v3388_v40, %v3385_v53  ;;  %v3395_v54 = vshll.u32 %v5300_v25, 16 }
 0x2e1   : > { %6253 = vmatmul.mubr.bf16.gmra.mxu1 %v2720_v60  ;;  %v3374_v60 = vshrl.u32 %v5298_v20, 16  ;;  %v3113_v20 = vrot.slane %v2695_v23, 3  ;;  %v6788_v23 = vld [vmem:[%s9282_s7 + $0x120] sm:$0xff]  }
 0x2e2   : > { %6256 = vmatprep.mubr.msk.bf16.mxu1 %vm6864_vm0, %v6863_v15  ;;  %v6801_v53 = vld [vmem:[%s9282_s7 + $0x140] sm:$0xff]  }
 0x2e3   : > { %v3376_v8 = vrot.slane %v3374_v60, 3  ;;  %v3115_v60 = vor.u32 %v3114_v62, %v3113_v20 }
 0x2e5   : > { %6301 = vmatmul.mubr.bf16.gmra.mxu0 %v2919_v63  ;;  %v6781_v63 = vld [vmem:[%s9282_s7 + $0x138] sm:$0xff]   ;;  %v3380_v28 = vor.u32 %v3379_v3, %v3376_v8 }
 0x2e6   : > { %6304 = vmatprep.mubr.msk.bf16.mxu0 %vm6864_vm0, %v6863_v15 }
 0x2e7   : > { %v3381_v55 = vsel %vm704_vm3, %v3371_v33, %v3380_v28  ;;  %v5301_v33 = vcombine.low %v8362_v51, %v8368_v42  ;;  %v3390_v45 = vsel %vm704_vm3, %v3380_v28, %v3389_v59 }
 0x2e9   : > { %6257 = vmatmul.mubr.bf16.gmra.mxu1 %v2729_v49  ;;  %v3108_v49 = vsel %vm704_vm3, %v3104_v34, %v3107_v43  ;;  %v6791_v34 = vld [vmem:[%s9282_s7 + $0x118] sm:$0xff]  }
 0x2ea   : > { %6260 = vmatprep.mubr.msk.bf16.mxu1 %vm6864_vm0, %v6863_v15 }
 0x2ed   : > { %6305 = vmatmul.mubr.bf16.gmra.mxu0 %v2918_v24  ;;  %v6787_v24 = vld [vmem:[%s9282_s7 + $0x178] sm:$0xff]  }
 0x2ee   : > { %6368 = vmatprep.mubr.msk.bf16.mxu0 %vm6864_vm0, %v6863_v15 }
 0x2f1   : > { %6261 = vmatmul.mubr.bf16.gmra.mxu1 %v2728_v35  ;;  %v3109_v35 = vrot.slane %v2686_v44, 3 }
 0x2f2   : > { %6324 = vmatprep.mubr.msk.bf16.mxu1 %vm6864_vm0, %v6863_v15 }
 0x2f3   : > { %v3111_v44 = vor.u32 %v3110_v38, %v3109_v35  ;;  %v3404_v35 = vshll.u32 %v5301_v33, 16  ;;  %v8479_v38 = vld [vmem:[#allocation2 + $0x38] sm:$0xf] }
 0x2f4   : > { %v5302_v21 = vcombine.low %v8370_v31, %v8479_v38 }
 0x2f5   : > { %6369 = vmatmul.mubr.bf16.vlgmr.msra.gmra.mxu0 %v3372_v9  ;;  %v3112_v47 = vsel %vm704_vm3, %v3107_v43, %v3111_v44  ;;  %v3118_v9 = vrot.slane %v2707_v18, 4  ;;  %v6798_v43 = vld [vmem:[%s9282_s7 + $0x150] sm:$0xff]   ;;  %v3116_v8 = vsel %vm704_vm3, %v3111_v44, %v3115_v60  ;;  %v6800_v18 = vld [vmem:[%s9282_s7 + $0x148] sm:$0xff]   ;;  %v3406_v28 = vrot.slane %v3404_v35, 4 }
 0x2f6   : > { %6372 = vmatprep.mubr.msk.bf16.mxu0 %vm6864_vm0, %v6863_v15  ;;  %6441 = vmatpush3.bf16.msra.mxu0 %v6787_v24  ;;  %v3397_v24 = vrot.slane %v3395_v54, 4  ;;  %v3121_v44 = vrot.slane %v2713_v0, 3 }
 0x2f7   : > { %6442 = vmatprep.subr.bf16.mxu0 %v6863_v15  ;;  %v3119_v48 = vor.u32 %v3118_v9, %v3117_v5 }
 0x2f8   : > { %v3398_v3 = vor.u32 %v3397_v24, %v3394_v30  ;;  %v6804_v24 = vld [vmem:[#allocation2 + $0x10] sm:$0xff]  }
 0x2f9   : > { %6325 = vmatmul.mubr.bf16.vlgmr.msra.gmra.mxu1 %v3108_v49  ;;  %v3120_v40 = vsel %vm704_vm3, %v3115_v60, %v3119_v48  ;;  %v3828_v9 = vshll.u32 %v6804_v24, 16 }
 0x2fa   : > { %6397 = vmatpush3.bf16.msra.mxu1 %v6781_v63  ;;  %6328 = vmatprep.mubr.msk.bf16.mxu1 %vm6864_vm0, %v6863_v15  ;;  %v3401_v63 = vshrl.u32 %v5301_v33, 16 }
 0x2fb   : > { %6398 = vmatprep.subr.bf16.mxu1 %v6863_v15  ;;  %6443 = vmatpush3.bf16.msra.mxu0 %v6789_v2  ;;  %v3399_v2 = vsel %vm704_vm3, %v3389_v59, %v3398_v3 }
 0x2fc   : > { %6444 = vmatprep.subr.bf16.mxu0 %v6863_v15  ;;  %v3403_v49 = vrot.slane %v3401_v63, 3  ;;  %v6814_v63 = vld [vmem:[%s9282_s7 + $0x1f8] sm:$0xff]  }
 0x2fd   : > { %6373 = vmatmul.mubr.bf16.gmra.mxu0 %v3381_v55  ;;  %v5271_v55 = vcombine.low %v8317_v13, %v3076_v50  ;;  %v6810_v50 = vld [vmem:[#allocation2 + $0x20] sm:$0xff]  }
 0x2fe   : > { %6399 = vmatpush3.bf16.msra.mxu1 %v6783_v4  ;;  %6376 = vmatprep.mubr.msk.bf16.mxu0 %vm6864_vm0, %v6863_v15  ;;  %v6799_v4 = vld [vmem:[%s9282_s7 + $0x108] sm:$0xff]   ;;  %v3407_v25 = vor.u32 %v3406_v28, %v3403_v49  ;;  %v3848_v41 = vshrl.u32 %v6810_v50, 16 }
 0x2ff   : > { %6400 = vmatprep.subr.bf16.mxu1 %v6863_v15  ;;  %6445 = vmatpush3.bf16.msra.mxu0 %v6792_v14  ;;  %v3122_v14 = vrot.slane %v2716_v61, 4  ;;  %v3126_v61 = vshrl.u32 %v5271_v55, 16  ;;  %v3129_v59 = vshll.u32 %v5271_v55, 16 }
 0x300   : > { %6446 = vmatprep.subr.bf16.mxu0 %v6863_v15  ;;  %v3408_v13 = vsel %vm704_vm3, %v3398_v3, %v3407_v25  ;;  %v6807_v3 = vld [vmem:[#allocation2 + $0x18] sm:$0xff]  }
 0x301   : > { %6329 = vmatmul.mubr.bf16.gmra.mxu1 %v3112_v47  ;;  %v3413_v47 = vshll.u32 %v5302_v21, 16  ;;  %v3123_v0 = vor.u32 %v3122_v14, %v3121_v44  ;;  %v3128_v54 = vrot.slane %v3126_v61, 3  ;;  %v3840_v11 = vshrl.u32 %v6807_v3, 16  ;;  %v6811_v44 = vld [vmem:[%s9282_s7 + $0x1a8] sm:$0xff]   ;;  %v6822_v14 = vld [vmem:[%s9282_s7 + $0x1e0] sm:$0xff]  }
 0x302   : > { %6332 = vmatprep.mubr.msk.bf16.mxu1 %vm6864_vm0, %v6863_v15  ;;  %6401 = vmatpush3.bf16.msra.mxu1 %v6785_v6  ;;  %v3410_v6 = vshrl.u32 %v5302_v21, 16  ;;  %v6809_v21 = vld [vmem:[%s9282_s7 + $0x1b0] sm:$0xff]  }
 0x303   : > { %6402 = vmatprep.subr.bf16.mxu1 %v6863_v15  ;;  %6447 = vmatpush3.bf16.msra.mxu0 %v6793_v39  ;;  %v3415_v39 = vrot.slane %v3413_v47, 4  ;;  %v3124_v62 = vsel %vm704_vm3, %v3119_v48, %v3123_v0  ;;  %v3832_v48 = vshrl.u32 %v6804_v24, 16  ;;  %v6819_v47 = vld [vmem:[%s9282_s7 + $0x198] sm:$0xff]   ;;  %v4031_v24 = vld [vmem:[#allocation2 + $0xc] sm:$0xf] }
 0x304   : > { %6448 = vmatprep.subr.bf16.mxu0 %v6863_v15  ;;  %v3412_v20 = vrot.slane %v3410_v6, 3  ;;  %v6825_v6 = vld [vmem:[%s9282_s7 + $0x1d8] sm:$0xff]  }
 0x305   : > { %6377 = vmatmul.mubr.bf16.gmra.mxu0 %v3390_v45  ;;  %v6803_v45 = vld [vmem:[#allocation2 + $0x8] sm:$0xff]  }
 0x306   : > { %6380 = vmatprep.mubr.msk.bf16.mxu0 %vm6864_vm0, %v6863_v15  ;;  %6403 = vmatpush3.bf16.msra.mxu1 %v6788_v23  ;;  %v3416_v37 = vor.u32 %v3415_v39, %v3412_v20  ;;  %v3131_v23 = vrot.slane %v3129_v59, 4  ;;  %v3823_v30 = vshll.u32 %v6803_v45, 16  ;;  %v3821_v5 = vshrl.u32 %v6803_v45, 16  ;;  %v6824_v20 = vld [vmem:[%s9282_s7 + $0x190] sm:$0xff]   ;;  %v6829_v39 = vld [vmem:[%s9282_s7 + $0x1c8] sm:$0xff]  }
 0x307   : > { %6404 = vmatprep.subr.bf16.mxu1 %v6863_v15  ;;  %6449 = vmatpush3.bf16.msra.mxu0 %v6796_v22  ;;  %v6828_v59 = vld [vmem:[%s9282_s7 + $0x188] sm:$0xff]  }
 0x308   : > { %6450 = vmatprep.subr.bf16.mxu0 %v6863_v15  ;;  %v3417_v33 = vsel %vm704_vm3, %v3407_v25, %v3416_v37  ;;  %v3132_v22 = vor.u32 %v3131_v23, %v3128_v54  ;;  %v6815_v25 = vld [vmem:[%s9282_s7 + $0x1a0] sm:$0xff]   ;;  %v6823_v23 = vld [vmem:[#allocation2 + $0x38] sm:$0x1f]  }
 0x309   : > { %6333 = vmatmul.mubr.bf16.gmra.mxu1 %v3116_v8  ;;  %v3830_v8 = vrot.slane %v3828_v9, 1  ;;  %v3868_v26 = vshll.u32 %v6823_v23, 16 }
 0x30a   : > { %6336 = vmatprep.mubr.msk.bf16.mxu1 %vm6864_vm0, %v6863_v15  ;;  %6405 = vmatpush3.bf16.msra.mxu1 %v6791_v34  ;;  %v3133_v60 = vsel %vm704_vm3, %v3123_v0, %v3132_v22  ;;  %v3825_v34 = vrot.slane %v3823_v30, 1  ;;  %v4032_v30 = vld [vmem:[#allocation2 + $0x10] sm:$0xf] }
 0x30b   : > { %6406 = vmatprep.subr.bf16.mxu1 %v6863_v15  ;;  %6451 = vmatpush3.bf16.msra.mxu0 %v6798_v43  ;;  %v3834_v49 = vor.u32 %v3832_v48, %v3830_v8  ;;  %v3870_v45 = vrot.slane %v3868_v26, 1  ;;  %v8647_v9 = vcombine.low %v4308_v27, %v4032_v30  ;;  %v8659_v48 = vld [vmem:[#allocation2 + $0x1c] sm:$0xff]  }
 0x30c   : > { %6452 = vmatprep.subr.bf16.mxu0 %v6863_v15  ;;  %v3826_v43 = vor.u32 %v3825_v34, %v3821_v5  ;;  %v5389_v34 = vcombine.low %v4031_v24, %v4032_v30  ;;  %v3872_v5 = vshrl.u32 %v6823_v23, 16  ;;  %v6848_v27 = vld [vmem:[%s9282_s7 + $0x200] sm:$0xff]  }
 0x30d   : > { %6381 = vmatmul.mubr.bf16.gmra.mxu0 %v3399_v2  ;;  %v6817_v2 = vld [vmem:[%s9282_s7 + $0x1f0] sm:$0xff]   ;;  %v4329_v42 = vrot.slane %v8647_v9, 1 }
 0x30e   : > { %6384 = vmatprep.mubr.msk.bf16.mxu0 %vm6864_vm0, %v6863_v15  ;;  %6407 = vmatpush3.bf16.msra.mxu1 %v6795_v7  ;;  %v3831_v35 = vsel %vm1428_vm4, %v3826_v43, %v3830_v8  ;;  %v6806_v7 = vld [vmem:[%s9282_s7 + $0x1b8] sm:$0xff]   ;;  %v3874_v51 = vor.u32 %v3872_v5, %v3870_v45  ;;  %v4100_v43 = vshll.u32 %v5389_v34, 16  ;;  %v5333_v8 = vcombine.low %v8479_v38, %v8479_v38 }
 0x30f   : > { %6408 = vmatprep.subr.bf16.mxu1 %v6863_v15  ;;  %6453 = vmatpush3.bf16.msra.mxu0 %v6800_v18  ;;  %v3836_v18 = vshll.u32 %v6807_v3, 16  ;;  %v4098_v3 = vshrl.u32 %v5389_v34, 16 }
 0x310   : > { %6454 = vmatprep.subr.bf16.mxu0 %v6863_v15 }
 0x311   : > { %6337 = vmatmul.mubr.bf16.gmra.mxu1 %v3120_v40  ;;  %v3838_v28 = vrot.slane %v3836_v18, 1  ;;  %v6813_v40 = vld [vmem:[#allocation2 + $0x28] sm:$0xff]   ;;  %v6836_v18 = vld [vmem:[%s9282_s7 + $0x238] sm:$0xff]  }
 0x312   : > { %6340 = vmatprep.mubr.msk.bf16.mxu1 %vm6864_vm0, %v6863_v15  ;;  %6409 = vmatpush3.bf16.msra.mxu1 %v6799_v4  ;;  %v6820_v4 = vld [vmem:[%s9282_s7 + $0x1e8] sm:$0xff]   ;;  %v3856_v46 = vshrl.u32 %v6813_v40, 16 }
 0x313   : > { %6410 = vmatprep.subr.bf16.mxu1 %v6863_v15  ;;  %6455 = vmatpush3.bf16.msra.mxu0 %v6801_v53  ;;  %v3839_v1 = vsel %vm1428_vm4, %v3834_v49, %v3838_v28  ;;  %v3842_v55 = vor.u32 %v3840_v11, %v3838_v28  ;;  %v4332_v49 = vrot.slane %v8659_v48, 1  ;;  %v8681_v11 = vld [vmem:[#allocation2 + $0x24] sm:$0xff]  }
 0x314   : > { %6528 = vmatprep.subr.bf16.mxu0 %v6863_v15 }
 0x315   : > { %6385 = vmatmul.mubr.bf16.gmra.mxu0 %v3408_v13  ;;  %v6818_v13 = vld [vmem:[#allocation2 + $0x30] sm:$0xff]  }
 0x316   : > { %6388 = vmatprep.mubr.msk.bf16.mxu0 %vm6864_vm0, %v6863_v15  ;;  %6411 = vmatpush3.bf16.msra.mxu1 %v6802_v58  ;;  %v6827_v58 = vld [vmem:[%s9282_s7 + $0x1d0] sm:$0xff]   ;;  %v3864_v57 = vshrl.u32 %v6818_v13, 16 }
 0x317   : > { %6484 = vmatprep.subr.bf16.mxu1 %v6863_v15 }
 0x319   : > { %6341 = vmatmul.mubr.bf16.gmra.mxu1 %v3124_v62  ;;  %v6831_v62 = vld [vmem:[%s9282_s7 + $0x1c0] sm:$0xff]  }
 0x31a   : > { %6344 = vmatprep.mubr.msk.bf16.mxu1 %vm6864_vm0, %v6863_v15 }
 0x31d   : > { %6389 = vmatmul.mubr.bf16.gmra.mxu0 %v3417_v33  ;;  %v6832_v33 = vld [vmem:[%s9282_s7 + $0x180] sm:$0xff]  }
 0x31e   : > { %6392 = vmatprep.mubr.msk.bf16.mxu0 %vm6864_vm0, %v6863_v15 }
 0x321   : > { %6345 = vmatmul.mubr.bf16.gmra.mxu1 %v3133_v60 }
 0x322   : > { %6348 = vmatprep.mubr.msk.bf16.mxu1 %vm6864_vm0, %v6863_v15 }
 0x325   : > { %6393 = vmatmul.mubr.bf16.gmra.mxu0 %v3416_v37 }
 0x326   : > { %6456 = vmatprep.mubr.msk.bf16.mxu0 %vm6864_vm0, %v6863_v15 }
 0x329   : > { %6349 = vmatmul.mubr.bf16.gmra.mxu1 %v3132_v22 }
 0x32a   : > { %6412 = vmatprep.mubr.msk.bf16.mxu1 %vm6864_vm0, %v6863_v15 }
 0x32d   : > { %6457 = vmatmul.mubr.bf16.vlgmr.msra.gmra.mxu0 %v3831_v35 }
 0x32e   : > { %6460 = vmatprep.mubr.msk.bf16.mxu0 %vm6864_vm0, %v6863_v15  ;;  %6529 = vmatpush3.bf16.msra.mxu0 %v6814_v63 }
 0x32f   : > { %6530 = vmatprep.subr.bf16.mxu0 %v6863_v15 }
 0x331   : > { %6413 = vmatmul.mubr.bf16.vlgmr.msra.gmra.mxu1 %v5327_v56  ;;  %v3844_v56 = vshll.u32 %v6810_v50, 16  ;;  %v6838_v50 = vld [vmem:[%s9282_s7 + $0x230] sm:$0xff]  }
 0x332   : > { %6485 = vmatpush3.bf16.msra.mxu1 %v6806_v7  ;;  %6416 = vmatprep.mubr.msk.bf16.mxu1 %vm6864_vm0, %v6863_v15 }
 0x333   : > { %6486 = vmatprep.subr.bf16.mxu1 %v6863_v15  ;;  %6531 = vmatpush3.bf16.msra.mxu0 %v6817_v2  ;;  %v3846_v53 = vrot.slane %v3844_v56, 1 }
 0x334   : > { %6532 = vmatprep.subr.bf16.mxu0 %v6863_v15 }
 0x335   : > { %6461 = vmatmul.mubr.bf16.gmra.mxu0 %v3839_v1  ;;  %v3847_v12 = vsel %vm1428_vm4, %v3842_v55, %v3846_v53  ;;  %v3850_v0 = vor.u32 %v3848_v41, %v3846_v53  ;;  %v4334_v55 = vrot.slane %v8681_v11, 1  ;;  %v4117_v53 = vshrl.u32 %v8659_v48, 16  ;;  %v8704_v41 = vld [vmem:[#allocation2 + $0x2c] sm:$0xff]  }
 0x336   : > { %6487 = vmatpush3.bf16.msra.mxu1 %v6809_v21  ;;  %6464 = vmatprep.mubr.msk.bf16.mxu0 %vm6864_vm0, %v6863_v15  ;;  %v4113_v21 = vshll.u32 %v8659_v48, 16  ;;  %v4133_v34 = vshrl.u32 %v8704_v41, 16 }
 0x337   : > { %6488 = vmatprep.subr.bf16.mxu1 %v6863_v15  ;;  %6533 = vmatpush3.bf16.msra.mxu0 %v6820_v4 }
 0x338   : > { %6534 = vmatprep.subr.bf16.mxu0 %v6863_v15  ;;  %v4115_v56 = vrot.slane %v4113_v21, 1 }
 0x339   : > { %6417 = vmatmul.mubr.bf16.gmra.mxu1 %v5328_v29  ;;  %v3852_v29 = vshll.u32 %v6813_v40, 16  ;;  %v4121_v40 = vshll.u32 %v8681_v11, 16 }
 0x33a   : > { %6420 = vmatprep.mubr.msk.bf16.mxu1 %vm6864_vm0, %v6863_v15  ;;  %6489 = vmatpush3.bf16.msra.mxu1 %v6811_v44  ;;  %v6840_v44 = vld [vmem:[%s9282_s7 + $0x228] sm:$0xff]  }
 0x33b   : > { %6490 = vmatprep.subr.bf16.mxu1 %v6863_v15  ;;  %6535 = vmatpush3.bf16.msra.mxu0 %v6822_v14  ;;  %v3854_v61 = vrot.slane %v3852_v29, 1  ;;  %v4123_v29 = vrot.slane %v4121_v40, 1 }
 0x33c   : > { %6536 = vmatprep.subr.bf16.mxu0 %v6863_v15 }
 0x33d   : > { %6465 = vmatmul.mubr.bf16.gmra.mxu0 %v3847_v12  ;;  %v3855_v52 = vsel %vm1428_vm4, %v3850_v0, %v3854_v61  ;;  %v3858_v37 = vor.u32 %v3856_v46, %v3854_v61  ;;  %v4119_v12 = vor.u32 %v4117_v53, %v4115_v56  ;;  %v4336_v0 = vrot.slane %v8704_v41, 1 }
 0x33e   : > { %6468 = vmatprep.mubr.msk.bf16.mxu0 %vm6864_vm0, %v6863_v15  ;;  %6491 = vmatpush3.bf16.msra.mxu1 %v6815_v25  ;;  %v6842_v25 = vld [vmem:[%s9282_s7 + $0x220] sm:$0xff]   ;;  %v4125_v61 = vshrl.u32 %v8681_v11, 16 }
 0x33f   : > { %6492 = vmatprep.subr.bf16.mxu1 %v6863_v15  ;;  %6537 = vmatpush3.bf16.msra.mxu0 %v6825_v6  ;;  %v4335_v6 = vsel %vm1938_vm5, %v4332_v49, %v4334_v55 }
 0x340   : > { %6538 = vmatprep.subr.bf16.mxu0 %v6863_v15  ;;  %v4127_v46 = vor.u32 %v4125_v61, %v4123_v29 }
 0x341   : > { %6421 = vmatmul.mubr.bf16.gmra.mxu1 %v5329_v19  ;;  %v3860_v19 = vshll.u32 %v6818_v13, 16  ;;  %v4129_v13 = vshll.u32 %v8704_v41, 16 }
 0x342   : > { %6424 = vmatprep.mubr.msk.bf16.mxu1 %vm6864_vm0, %v6863_v15  ;;  %6493 = vmatpush3.bf16.msra.mxu1 %v6819_v47  ;;  %v6844_v47 = vld [vmem:[%s9282_s7 + $0x218] sm:$0xff]  }
 0x343   : > { %6494 = vmatprep.subr.bf16.mxu1 %v6863_v15  ;;  %6539 = vmatpush3.bf16.msra.mxu0 %v6827_v58  ;;  %v3862_v54 = vrot.slane %v3860_v19, 1  ;;  %v4124_v58 = vsel %vm1428_vm4, %v4119_v12, %v4123_v29  ;;  %v8730_v19 = vld [vmem:[#allocation2 + $0x34] sm:$0xff]  }
 0x344   : > { %6540 = vmatprep.subr.bf16.mxu0 %v6863_v15  ;;  %v4137_v5 = vshll.u32 %v8730_v19, 16  ;;  %v4141_v29 = vshrl.u32 %v8730_v19, 16 }
 0x345   : > { %6469 = vmatmul.mubr.bf16.gmra.mxu0 %v3855_v52  ;;  %v3863_v22 = vsel %vm1428_vm4, %v3858_v37, %v3862_v54  ;;  %v4337_v52 = vsel %vm1938_vm5, %v4334_v55, %v4336_v0  ;;  %v4131_v37 = vrot.slane %v4129_v13, 1 }
 0x346   : > { %6472 = vmatprep.mubr.msk.bf16.mxu0 %vm6864_vm0, %v6863_v15  ;;  %6495 = vmatpush3.bf16.msra.mxu1 %v6824_v20  ;;  %v6846_v20 = vld [vmem:[%s9282_s7 + $0x210] sm:$0xff]  }
 0x347   : > { %6496 = vmatprep.subr.bf16.mxu1 %v6863_v15  ;;  %6541 = vmatpush3.bf16.msra.mxu0 %v6829_v39  ;;  %v2577_v39 = vld [vmem:[%s9281_s6] sm:$0xff] }
 0x348   : > { %6542 = vmatprep.subr.bf16.mxu0 %v6863_v15 }
 0x349   : > { %6425 = vmatmul.mubr.bf16.gmra.mxu1 %v5330_v17  ;;  %v3866_v17 = vor.u32 %v3864_v57, %v3862_v54  ;;  %v6847_v54 = vld [vmem:[%s9282_s7 + $0x208] sm:$0xff]   ;;  %v4338_v57 = vrot.slane %v8730_v19, 1 }
 0x34a   : > { %6428 = vmatprep.mubr.msk.bf16.mxu1 %vm6864_vm0, %v6863_v15  ;;  %6497 = vmatpush3.bf16.msra.mxu1 %v6828_v59 }
 0x34b   : > { %6498 = vmatprep.subr.bf16.mxu1 %v6863_v15  ;;  %6543 = vmatpush3.bf16.msra.mxu0 %v6831_v62  ;;  %v3871_v60 = vsel %vm1428_vm4, %v3866_v17, %v3870_v45  ;;  %v2590_v62 = vmul.f32 %v2577_v39, %v7637_v10  ;;  %v8746_v45 = vld [vmem:[#allocation2 + $0x3c] sm:$0xf] }
 0x34d   : > { %6473 = vmatmul.mubr.bf16.gmra.mxu0 %v3863_v22  ;;  %v4132_v22 = vsel %vm1428_vm4, %v4127_v46, %v4131_v37 }
 0x34e   : > { %6476 = vmatprep.mubr.msk.bf16.mxu0 %vm6864_vm0, %v6863_v15  ;;  %6499 = vmatpush3.bf16.msra.mxu1 %v6832_v33  ;;  %v2578_v33 = vld [vmem:[%s9281_s6 + $0x8] sm:$0xff] }
 0x34f   : > { %6572 = vmatprep.subr.bf16.mxu1 %v6863_v15  ;;  %v2591_v24 = vmul.f32 %v2578_v33, %v7637_v10 }
 0x351   : > { %6429 = vmatmul.mubr.bf16.gmra.mxu1 %v5331_v36  ;;  %v8645_v36 = vld [vmem:[#allocation2 + $0x14] sm:$0xff]  }
 0x352   : > { %6432 = vmatprep.mubr.msk.bf16.mxu1 %vm6864_vm0, %v6863_v15  ;;  %v4330_v31 = vrot.slane %v8645_v36, 1  ;;  %v4105_v63 = vshll.u32 %v8645_v36, 16  ;;  %v4109_v28 = vshrl.u32 %v8645_v36, 16 }
 0x354   : > { %v4331_v35 = vsel %vm1938_vm5, %v4329_v42, %v4330_v31  ;;  %v4107_v38 = vrot.slane %v4105_v63, 1  ;;  %v4333_v4 = vsel %vm1938_vm5, %v4330_v31, %v4332_v49  ;;  %v4339_v42 = vsel %vm1938_vm5, %v4336_v0, %v4338_v57  ;;  %v2581_v0 = vld [vmem:[%s9281_s6 + $0x20] sm:$0xff] }
 0x355   : > { %6477 = vmatmul.mubr.bf16.gmra.mxu0 %v3871_v60  ;;  %v4044_v60 = vld [vmem:[#allocation2 + $0x40] sm:$0x1]  ;;  %v4135_v31 = vor.u32 %v4133_v34, %v4131_v37 }
 0x356   : > { %6480 = vmatprep.mubr.msk.bf16.mxu0 %vm6864_vm0, %v6863_v15  ;;  %v4111_v1 = vor.u32 %v4109_v28, %v4107_v38 }
 0x358   : > { %v4116_v14 = vsel %vm1428_vm4, %v4111_v1, %v4115_v56 }
 0x359   : > { %6433 = vmatmul.mubr.bf16.gmra.mxu1 %v5332_v32  ;;  %v4102_v32 = vrot.slane %v4100_v43, 1 }
 0x35a   : > { %6436 = vmatprep.mubr.msk.bf16.mxu1 %vm6864_vm0, %v6863_v15 }
 0x35b   : > { %v4103_v7 = vor.u32 %v4102_v32, %v4098_v3  ;;  %v5395_v32 = vcombine.low %v8746_v45, %v4044_v60 }
 0x35d   : > { %6481 = vmatmul.mubr.bf16.gmra.mxu0 %v3874_v51  ;;  %v4108_v2 = vsel %vm1428_vm4, %v4103_v7, %v4107_v38  ;;  %v4340_v56 = vrot.slane %v5395_v32, 1 }
 0x35e   : > { %6544 = vmatprep.mubr.msk.bf16.mxu0 %vm6864_vm0, %v6863_v15 }
 0x361   : > { %6437 = vmatmul.mubr.bf16.gmra.mxu1 %v5333_v8  ;;  %v2579_v8 = vld [vmem:[%s9281_s6 + $0x10] sm:$0xff] }
 0x362   : > { %6500 = vmatprep.mubr.msk.bf16.mxu1 %vm6864_vm0, %v6863_v15 }
 0x365   : > { %6545 = vmatmul.mubr.bf16.vlgmr.msra.gmra.mxu0 %v4331_v35 }
 0x366   : > { %6548 = vmatprep.mubr.msk.bf16.mxu0 %vm6864_vm0, %v6863_v15 }
 0x369   : > { %6501 = vmatmul.mubr.bf16.vlgmr.msra.gmra.mxu1 %v4108_v2  ;;  %v4139_v2 = vrot.slane %v4137_v5, 1 }
 0x36a   : > { %6573 = vmatpush3.bf16.msra.mxu1 %v6836_v18  ;;  %6504 = vmatprep.mubr.msk.bf16.mxu1 %vm6864_vm0, %v6863_v15  ;;  %v2592_v18 = vmul.f32 %v2579_v8, %v7637_v10  ;;  %v2583_v8 = vld [vmem:[%s9281_s6 + $0x30] sm:$0xff] }
 0x36b   : > { %6574 = vmatprep.subr.bf16.mxu1 %v6863_v15  ;;  %v4140_v1 = vsel %vm1428_vm4, %v4135_v31, %v4139_v2  ;;  %v4143_v39 = vor.u32 %v4141_v29, %v4139_v2  ;;  %v4523_v31 = vshll.u32 %v8647_v9, 16  ;;  %v2596_v2 = vmul.f32 %v2583_v8, %v7637_v10 }
 0x36d   : > { %6549 = vmatmul.mubr.bf16.gmra.mxu0 %v4333_v4  ;;  %v2580_v4 = vld [vmem:[%s9281_s6 + $0x18] sm:$0xff] }
 0x36e   : > { %6575 = vmatpush3.bf16.msra.mxu1 %v6838_v50  ;;  %6552 = vmatprep.mubr.msk.bf16.mxu0 %vm6864_vm0, %v6863_v15  ;;  %v2593_v12 = vmul.f32 %v2580_v4, %v7637_v10 }
 0x36f   : > { %6576 = vmatprep.subr.bf16.mxu1 %v6863_v15 }
 0x371   : > { %6505 = vmatmul.mubr.bf16.gmra.mxu1 %v4116_v14 }
 0x372   : > { %6508 = vmatprep.mubr.msk.bf16.mxu1 %vm6864_vm0, %v6863_v15  ;;  %6577 = vmatpush3.bf16.msra.mxu1 %v6840_v44  ;;  %v4145_v44 = vshll.u32 %v5395_v32, 16 }
 0x373   : > { %6578 = vmatprep.subr.bf16.mxu1 %v6863_v15 }
 0x375   : > { %6553 = vmatmul.mubr.bf16.gmra.mxu0 %v4335_v6 }
 0x376   : > { %6556 = vmatprep.mubr.msk.bf16.mxu0 %vm6864_vm0, %v6863_v15  ;;  %6579 = vmatpush3.bf16.msra.mxu1 %v6842_v25 }
 0x377   : > { %6580 = vmatprep.subr.bf16.mxu1 %v6863_v15 }
 0x379   : > { %6509 = vmatmul.mubr.bf16.gmra.mxu1 %v4124_v58 }
 0x37a   : > { %6512 = vmatprep.mubr.msk.bf16.mxu1 %vm6864_vm0, %v6863_v15  ;;  %6581 = vmatpush3.bf16.msra.mxu1 %v6844_v47 }
 0x37b   : > { %6582 = vmatprep.subr.bf16.mxu1 %v6863_v15 }
 0x37d   : > { %v3009_v59 = vpop.f32.mrf.mxu0  ;;  %6557 = vmatmul.mubr.bf16.gmra.mxu0 %v4337_v52  ;;  %v4147_v52 = vrot.slane %v4145_v44, 1 }
 0x37e   : > { %6560 = vmatprep.mubr.msk.bf16.mxu0 %vm6864_vm0, %v6863_v15  ;;  %6583 = vmatpush3.bf16.msra.mxu1 %v6846_v20  ;;  %v4341_v20 = vsel %vm1938_vm5, %v4338_v57, %v4340_v56 }
 0x37f   : > { %v6282_v23 = vpop.f32.mrf.mxu0  ;;  %6584 = vmatprep.subr.bf16.mxu1 %v6863_v15  ;;  %v4148_v57 = vsel %vm1428_vm4, %v4143_v39, %v4147_v52 }
 0x381   : > { %v2819_v26 = vpop.f32.mrf.mxu1  ;;  %v3012_v17 = vpop.f32.mrf.mxu0  ;;  %6513 = vmatmul.mubr.bf16.gmra.mxu1 %v4132_v22  ;;  %v2582_v22 = vld [vmem:[%s9281_s6 + $0x28] sm:$0xff] }
 0x382   : > { %v2873_v30 = vadd.f32 %v2819_v26, %v2590_v62  ;;  %6516 = vmatprep.mubr.msk.bf16.mxu1 %vm6864_vm0, %v6863_v15  ;;  %6585 = vmatpush3.bf16.msra.mxu1 %v6847_v54  ;;  %v2594_v54 = vmul.f32 %v2581_v0, %v7637_v10  ;;  %v2585_v0 = vld [vmem:[%s9281_s6 + $0x40] sm:$0xff] }
 0x383   : > { %v6238_v51 = vpop.f32.mrf.mxu1  ;;  %v6283_v43 = vpop.f32.mrf.mxu0  ;;  %6586 = vmatprep.subr.bf16.mxu1 %v6863_v15 }
 0x384   : > { %v8764_v3 = vadd.f32 %v3009_v59, %v2873_v30  ;;  %v4149_v30 = vshrl.u32 %v5395_v32, 16 }
 0x385   : > { %v2822_v35 = vpop.f32.mrf.mxu1  ;;  %v3017_v7 = vpop.f32.mrf.mxu0  ;;  %6561 = vmatmul.mubr.bf16.gmra.mxu0 %v4339_v42  ;;  %v4520_v42 = vshrl.u32 %v8647_v9, 16  ;;  %v4525_v9 = vrot.slane %v4523_v31, 2 }
 0x386   : > { %v2874_v38 = vadd.f32 %v2822_v35, %v2591_v24  ;;  %6564 = vmatprep.mubr.msk.bf16.mxu0 %vm6864_vm0, %v6863_v15  ;;  %6587 = vmatpush3.bf16.msra.mxu1 %v6848_v27  ;;  %v2595_v27 = vmul.f32 %v2582_v22, %v7637_v10  ;;  %v4531_v22 = vrot.slane %v4117_v53, 1  ;;  %v2587_v53 = vld [vmem:[%s9281_s6 + $0x50] sm:$0xff] }
 0x387   : > { %v6239_v49 = vpop.f32.mrf.mxu1  ;;  %v6286_v50 = vpop.f32.mrf.mxu0  ;;  %v4522_v44 = vrot.slane %v4520_v42, 1 }
 0x388   : > { %v8775_v14 = vadd.f32 %v3012_v17, %v2874_v38  ;;  %v4151_v38 = vor.u32 %v4149_v30, %v4147_v52  ;;  %v4527_v49 = vrot.slane %v4109_v28, 1 }
 0x389   : > { %v2827_v55 = vpop.f32.mrf.mxu1  ;;  %v3020_v25 = vpop.f32.mrf.mxu0  ;;  %6517 = vmatmul.mubr.bf16.gmra.mxu1 %v4140_v1  ;;  %v2584_v1 = vld [vmem:[%s9281_s6 + $0x38] sm:$0xff] }
 0x38a   : > { %v2875_v6 = vadd.f32 %v2827_v55, %v2592_v18  ;;  %6520 = vmatprep.mubr.msk.bf16.mxu1 %vm6864_vm0, %v6863_v15  ;;  %v4528_v55 = vrot.slane %v4105_v63, 2 }
 0x38b   : > { %v6242_v47 = vpop.f32.mrf.mxu1  ;;  %v6287_v58 = vpop.f32.mrf.mxu0 }
 0x38c   : > { %v8787_v46 = vadd.f32 %v3017_v7, %v2875_v6  ;;  %v2597_v47 = vmul.f32 %v2584_v1, %v7637_v10  ;;  %v4529_v36 = vor.u32 %v4528_v55, %v4527_v49  ;;  %v4535_v49 = vrot.slane %v4125_v61, 1  ;;  %v2589_v61 = vld [vmem:[%s9281_s6 + $0x60] sm:$0xff] }
 0x38d   : > { %v2830_v59 = vpop.f32.mrf.mxu1  ;;  %v3025_v62 = vpop.f32.mrf.mxu0  ;;  %6565 = vmatmul.mubr.bf16.gmra.mxu0 %v4341_v20  ;;  %v4526_v20 = vor.u32 %v4525_v9, %v4522_v44 }
 0x38e   : > { %v2876_v37 = vadd.f32 %v2830_v59, %v2593_v12  ;;  %6568 = vmatprep.mubr.msk.bf16.mxu0 %vm6864_vm0, %v6863_v15 }
 0x38f   : > { %v6243_v23 = vpop.f32.mrf.mxu1  ;;  %v6290_v33 = vpop.f32.mrf.mxu0 }
 0x390   : > { %v8796_v26 = vadd.f32 %v3020_v25, %v2876_v37  ;;  %v2586_v23 = vld [vmem:[%s9281_s6 + $0x48] sm:$0xff]  ;;  %v4530_v33 = vsel %vm2129_vm6, %v4526_v20, %v4529_v36 }
 0x391   : > { %v2835_v17 = vpop.f32.mrf.mxu1  ;;  %v3028_v60 = vpop.f32.mrf.mxu0  ;;  %6521 = vmatmul.mubr.bf16.gmra.mxu1 %v4148_v57  ;;  %v4532_v57 = vrot.slane %v4113_v21, 2 }
 0x392   : > { %v2877_v24 = vadd.f32 %v2835_v17, %v2594_v54  ;;  %6524 = vmatprep.mubr.msk.bf16.mxu1 %vm6864_vm0, %v6863_v15 }
 0x393   : > { %v6246_v51 = vpop.f32.mrf.mxu1  ;;  %v6291_v43 = vpop.f32.mrf.mxu0  ;;  %v4533_v8 = vor.u32 %v4532_v57, %v4531_v22 }
 0x394   : > { %v8806_v35 = vadd.f32 %v3025_v62, %v2877_v24  ;;  %v2598_v62 = vmul.f32 %v2585_v0, %v7637_v10 }
 0x395   : > { %v2838_v7 = vpop.f32.mrf.mxu1  ;;  %v3033_v32 = vpop.f32.mrf.mxu0  ;;  %6569 = vmatmul.mubr.bf16.gmra.mxu0 %v4340_v56 }
 0x396   : > { %v2878_v18 = vadd.f32 %v2838_v7, %v2595_v27  ;;  %v2599_v27 = vmul.f32 %v2586_v23, %v7637_v10  ;;  %v2600_v7 = vmul.f32 %v2587_v53, %v7637_v10 }
 0x397   : > { %v6247_v50 = vpop.f32.mrf.mxu1  ;;  %v6294_v4 = vpop.f32.mrf.mxu0 }
 0x398   : > { %v8816_v25 = vadd.f32 %v3028_v60, %v2878_v18  ;;  %v2588_v18 = vld [vmem:[%s9281_s6 + $0x58] sm:$0xff]  ;;  %v4536_v50 = vrot.slane %v4121_v40, 2 }
 0x399   : > { %v2843_v56 = vpop.f32.mrf.mxu1  ;;  %v3036_v6 = vpop.f32.mrf.mxu0  ;;  %6525 = vmatmul.mubr.bf16.gmra.mxu1 %v4151_v38  ;;  %v2601_v55 = vmul.f32 %v2588_v18, %v7637_v10 }
 0x39a   : > { %v2879_v12 = vadd.f32 %v2843_v56, %v2596_v2  ;;  %6588 = vmatprep.mubr.msk.bf16.mxu1 %vm6864_vm0, %v6863_v15  ;;  %v4534_v2 = vsel %vm2129_vm6, %v4529_v36, %v4533_v8 }
 0x39b   : > { %v6250_v28 = vpop.f32.mrf.mxu1  ;;  %v6295_v58 = vpop.f32.mrf.mxu0 }
 0x39c   : > { %v8824_v63 = vadd.f32 %v3033_v32, %v2879_v12  ;;  %v4537_v12 = vor.u32 %v4536_v50, %v4535_v49  ;;  %v2602_v58 = vmul.f32 %v2589_v61, %v7637_v10 }
 0x39d   : > { %v2846_v39 = vpop.f32.mrf.mxu1  ;;  %v3041_v52 = vpop.f32.mrf.mxu0 }
 0x39e   : > { %v2880_v59 = vadd.f32 %v2846_v39, %v2597_v47  ;;  %v4538_v36 = vsel %vm2129_vm6, %v4533_v8, %v4537_v12  ;;  %v4539_v39 = vrot.slane %v4133_v34, 1  ;;  %v4498_v34 = vld [vmem:[#allocation2 + $0x40] sm:$0x3] }
 0x39f   : > { %v6251_v37 = vpop.f32.mrf.mxu1  ;;  %v6298_v54 = vpop.f32.mrf.mxu0 }
 0x3a0   : > { %v8835_v17 = vadd.f32 %v3036_v6, %v2880_v59 }
 0x3a1   : > { %v2851_v60 = vpop.f32.mrf.mxu1  ;;  %v3044_v30 = vpop.f32.mrf.mxu0  ;;  %6589 = vmatmul.mubr.bf16.vlgmr.msra.gmra.mxu1 %v4530_v33 }
 0x3a2   : > { %v2881_v24 = vadd.f32 %v2851_v60, %v2598_v62  ;;  %6592 = vmatprep.mubr.msk.bf16.mxu1 %vm6864_vm0, %v6863_v15 }
 0x3a3   : > { %v6254_v51 = vpop.f32.mrf.mxu1  ;;  %v6299_v43 = vpop.f32.mrf.mxu0 }
 0x3a4   : > { %v8843_v48 = vadd.f32 %v3041_v52, %v2881_v24  ;;  %v4540_v52 = vrot.slane %v4129_v13, 2  ;;  %v4543_v24 = vrot.slane %v4141_v29, 1  ;;  %v5445_v51 = vcombine.low %v8746_v45, %v4498_v34 }
 0x3a5   : > { %v2854_v21 = vpop.f32.mrf.mxu1  ;;  %v3049_v42 = vpop.f32.mrf.mxu0 }
 0x3a6   : > { %v2882_v31 = vadd.f32 %v2854_v21, %v2599_v27  ;;  %v4541_v33 = vor.u32 %v4540_v52, %v4539_v39  ;;  %v4544_v27 = vrot.slane %v4137_v5, 2 }
 0x3a7   : > { %v6255_v32 = vpop.f32.mrf.mxu1  ;;  %v6302_v38 = vpop.f32.mrf.mxu0 }
 0x3a8   : > { %v8854_v4 = vadd.f32 %v3044_v30, %v2882_v31  ;;  %v4542_v13 = vsel %vm2129_vm6, %v4537_v12, %v4541_v33  ;;  %v4545_v31 = vor.u32 %v4544_v27, %v4543_v24  ;;  %v4551_v32 = vshll.u32 %v5445_v51, 16 }
 0x3a9   : > { %v2859_v1 = vpop.f32.mrf.mxu1  ;;  %v3052_v44 = vpop.f32.mrf.mxu0  ;;  %6593 = vmatmul.mubr.bf16.gmra.mxu1 %v4534_v2 }
 0x3aa   : > { %v2883_v9 = vadd.f32 %v2859_v1, %v2600_v7  ;;  %6596 = vmatprep.mubr.msk.bf16.mxu1 %vm6864_vm0, %v6863_v15  ;;  %v4548_v7 = vshrl.u32 %v5445_v51, 16  ;;  %v4546_v2 = vsel %vm2129_vm6, %v4541_v33, %v4545_v31 }
 0x3ab   : > { %v6258_v56 = vpop.f32.mrf.mxu1  ;;  %v6303_v6 = vpop.f32.mrf.mxu0 }
 0x3ac   : > { %v8862_v11 = vadd.f32 %v3049_v42, %v2883_v9  ;;  %v4550_v49 = vrot.slane %v4548_v7, 1 }
 0x3ad   : > { %v2862_v40 = vpop.f32.mrf.mxu1  ;;  %v3057_v47 = vpop.f32.mrf.mxu0 }
 0x3ae   : > { %v2884_v28 = vadd.f32 %v2862_v40, %v2601_v55 }
 0x3af   : > { %v6259_v0 = vpop.f32.mrf.mxu1  ;;  %v6306_v20 = vpop.f32.mrf.mxu0 }
 0x3b0   : > { %v8870_v59 = vadd.f32 %v3052_v44, %v2884_v28 }
 0x3b1   : > { %v2867_v62 = vpop.f32.mrf.mxu1  ;;  %v3060_v37 = vpop.f32.mrf.mxu0  ;;  %6597 = vmatmul.mubr.bf16.gmra.mxu1 %v4538_v36 }
 0x3b2   : > { %v2885_v54 = vadd.f32 %v2867_v62, %v2602_v58  ;;  %6600 = vmatprep.mubr.msk.bf16.mxu1 %vm6864_vm0, %v6863_v15 }
 0x3b3   : > { %v6262_v10 = vpop.f32.mrf.mxu1  ;;  %v6307_v23 = vpop.f32.mrf.mxu0 }
 0x3b4   : > { %v8874_v22 = vadd.f32 %v3057_v47, %v2885_v54 }
 0x3b5   : > { %v2870_v57 = vpop.f32.mrf.mxu1  ;;  %v3507_v60 = vpop.f32.mrf.mxu0 }
 0x3b7   : > { %v6263_v30 = vpop.f32.mrf.mxu1  ;;  %v6370_v41 = vpop.f32.mrf.mxu0 }
 0x3b9   : > { %v3223_v43 = vpop.f32.mrf.mxu1  ;;  %v3510_v53 = vpop.f32.mrf.mxu0  ;;  %6601 = vmatmul.mubr.bf16.gmra.mxu1 %v4542_v13 }
 0x3ba   : > { %v3277_v8 = vadd.f32 %v3223_v43, %v8764_v3  ;;  %6604 = vmatprep.mubr.msk.bf16.mxu1 %vm6864_vm0, %v6863_v15  ;;  %v4553_v3 = vrot.slane %v4551_v32, 2 }
 0x3bb   : > { %v6326_v21 = vpop.f32.mrf.mxu1  ;;  %v6371_v42 = vpop.f32.mrf.mxu0 }
 0x3bc   : > { %v8885_v38 = vadd.f32 %v3507_v60, %v3277_v8  ;;  %v4554_v6 = vor.u32 %v4553_v3, %v4550_v49 }
 0x3bd   : > { %v3226_v29 = vpop.f32.mrf.mxu1  ;;  %v3515_v19 = vpop.f32.mrf.mxu0 }
 0x3be   : > { %v3278_v5 = vadd.f32 %v3226_v29, %v8775_v14  ;;  %v4555_v58 = vsel %vm2129_vm6, %v4545_v31, %v4554_v6 }
 0x3bf   : > { %v6327_v45 = vpop.f32.mrf.mxu1  ;;  %v6374_v18 = vpop.f32.mrf.mxu0 }
 0x3c0   : > { %v8889_v50 = vadd.f32 %v3510_v53, %v3278_v5 }
 0x3c1   : > { %v3231_v1 = vpop.f32.mrf.mxu1  ;;  %v3518_v44 = vpop.f32.mrf.mxu0  ;;  %6605 = vmatmul.mubr.bf16.gmra.mxu1 %v4546_v2 }
 0x3c2   : > { %v3279_v9 = vadd.f32 %v3231_v1, %v8787_v46  ;;  %6608 = vmatprep.mubr.msk.bf16.mxu1 %vm6864_vm0, %v6863_v15 }
 0x3c3   : > { %v6330_v55 = vpop.f32.mrf.mxu1  ;;  %v6375_v56 = vpop.f32.mrf.mxu0 }
 0x3c4   : > { %v8894_v14 = vadd.f32 %v3515_v19, %v3279_v9 }
 0x3c5   : > { %v3234_v61 = vpop.f32.mrf.mxu1  ;;  %v3523_v12 = vpop.f32.mrf.mxu0 }
 0x3c6   : > { %v3280_v40 = vadd.f32 %v3234_v61, %v8796_v26 }
 0x3c7   : > { %v6331_v47 = vpop.f32.mrf.mxu1  ;;  %v6378_v28 = vpop.f32.mrf.mxu0 }
 0x3c8   : > { %v8898_v0 = vadd.f32 %v3518_v44, %v3280_v40 }
 0x3c9   : > { %v3239_v20 = vpop.f32.mrf.mxu1  ;;  %v3526_v46 = vpop.f32.mrf.mxu0  ;;  %6609 = vmatmul.mubr.bf16.gmra.mxu1 %v4555_v58 }
 0x3ca   : > { %v3281_v36 = vadd.f32 %v3239_v20, %v8806_v35  ;;  %6612 = vmatprep.mubr.msk.bf16.mxu1 %vm6864_vm0, %v6863_v15 }
 0x3cb   : > { %v6334_v39 = vpop.f32.mrf.mxu1  ;;  %v6379_v52 = vpop.f32.mrf.mxu0 }
 0x3cc   : > { %v8903_v62 = vadd.f32 %v3523_v12, %v3281_v36 }
 0x3cd   : > { %v3242_v37 = vpop.f32.mrf.mxu1  ;;  %v3531_v26 = vpop.f32.mrf.mxu0 }
 0x3ce   : > { %v3282_v54 = vadd.f32 %v3242_v37, %v8816_v25 }
 0x3cf   : > { %v6335_v10 = vpop.f32.mrf.mxu1  ;;  %v6382_v23 = vpop.f32.mrf.mxu0 }
 0x3d0   : > { %v8906_v33 = vadd.f32 %v3526_v46, %v3282_v54 }
 0x3d1   : > { %v3247_v57 = vpop.f32.mrf.mxu1  ;;  %v3534_v60 = vpop.f32.mrf.mxu0  ;;  %6613 = vmatmul.mubr.bf16.gmra.mxu1 %v4554_v6 }
 0x3d2   : > { %v3283_v35 = vadd.f32 %v3247_v57, %v8824_v63 }
 0x3d3   : > { %v6338_v34 = vpop.f32.mrf.mxu1  ;;  %v6383_v30 = vpop.f32.mrf.mxu0 }
 0x3d4   : > { %v8909_v15 = vadd.f32 %v3531_v26, %v3283_v35 }
 0x3d5   : > { %v3250_v41 = vpop.f32.mrf.mxu1  ;;  %v3539_v13 = vpop.f32.mrf.mxu0 }
 0x3d6   : > { %v3284_v24 = vadd.f32 %v3250_v41, %v8835_v17 }
 0x3d7   : > { %v6339_v27 = vpop.f32.mrf.mxu1  ;;  %v6386_v51 = vpop.f32.mrf.mxu0 }
 0x3d8   : > { %v8912_v25 = vadd.f32 %v3534_v60, %v3284_v24 }
 0x3d9   : > { %v3255_v43 = vpop.f32.mrf.mxu1  ;;  %v3542_v53 = vpop.f32.mrf.mxu0 }
 0x3da   : > { %v3285_v8 = vadd.f32 %v3255_v43, %v8843_v48 }
 0x3db   : > { %v6342_v21 = vpop.f32.mrf.mxu1  ;;  %v6387_v42 = vpop.f32.mrf.mxu0 }
 0x3dc   : > { %v8915_v31 = vadd.f32 %v3539_v13, %v3285_v8 }
 0x3dd   : > { %v3258_v63 = vpop.f32.mrf.mxu1  ;;  %v3547_v7 = vpop.f32.mrf.mxu0 }
 0x3de   : > { %v3286_v32 = vadd.f32 %v3258_v63, %v8854_v4 }
 0x3df   : > { %v6343_v29 = vpop.f32.mrf.mxu1  ;;  %v6390_v19 = vpop.f32.mrf.mxu0 }
 0x3e0   : > { %v8918_v5 = vadd.f32 %v3542_v53, %v3286_v32 }
 0x3e1   : > { %v3263_v17 = vpop.f32.mrf.mxu1  ;;  %v3550_v45 = vpop.f32.mrf.mxu0 }
 0x3e2   : > { %v3287_v18 = vadd.f32 %v3263_v17, %v8862_v11 }
 0x3e3   : > { %v6346_v2 = vpop.f32.mrf.mxu1  ;;  %v6391_v49 = vpop.f32.mrf.mxu0 }
 0x3e4   : > { %v8921_v3 = vadd.f32 %v3547_v7, %v3287_v18 }
 0x3e5   : > { %v3266_v48 = vpop.f32.mrf.mxu1  ;;  %v3555_v1 = vpop.f32.mrf.mxu0 }
 0x3e6   : > { %v3288_v44 = vadd.f32 %v3266_v48, %v8870_v59 }
 0x3e7   : > { %v6347_v9 = vpop.f32.mrf.mxu1  ;;  %v6394_v55 = vpop.f32.mrf.mxu0 }
 0x3e8   : > { %v8924_v56 = vadd.f32 %v3550_v45, %v3288_v44 }
 0x3e9   : > { %v3271_v4 = vpop.f32.mrf.mxu1  ;;  %v3558_v6 = vpop.f32.mrf.mxu0 }
 0x3ea   : > { %v3289_v61 = vadd.f32 %v3271_v4, %v8874_v22 }
 0x3eb   : > { %v6350_v12 = vpop.f32.mrf.mxu1  ;;  %v6395_v40 = vpop.f32.mrf.mxu0 }
 0x3ec   : > { %v8927_v47 = vadd.f32 %v3555_v1, %v3289_v61 }
 0x3ed   : > { %v3274_v11 = vpop.f32.mrf.mxu1  ;;  %v3964_v28 = vpop.f32.mrf.mxu0 }
 0x3ef   : > { %v6351_v58 = vpop.f32.mrf.mxu1  ;;  %v6458_v20 = vpop.f32.mrf.mxu0 }
 0x3f1   : > { %v3687_v46 = vpop.f32.mrf.mxu1  ;;  %v3967_v36 = vpop.f32.mrf.mxu0 }
 0x3f2   : > { %v3741_v59 = vadd.f32 %v3687_v46, %v8885_v38 }
 0x3f3   : > { %v6414_v39 = vpop.f32.mrf.mxu1  ;;  %v6459_v52 = vpop.f32.mrf.mxu0 }
 0x3f4   : > { %v8930_v37 = vadd.f32 %v3964_v28, %v3741_v59 }
 0x3f5   : > { %v3690_v26 = vpop.f32.mrf.mxu1  ;;  %v3972_v54 = vpop.f32.mrf.mxu0 }
 0x3f6   : > { %v3742_v22 = vadd.f32 %v3690_v26, %v8889_v50 }
 0x3f7   : > { %v6415_v10 = vpop.f32.mrf.mxu1  ;;  %v6462_v23 = vpop.f32.mrf.mxu0 }
 0x3f8   : > { %v8933_v57 = vadd.f32 %v3967_v36, %v3742_v22 }
 0x3f9   : > { %v3695_v60 = vpop.f32.mrf.mxu1  ;;  %v3975_v35 = vpop.f32.mrf.mxu0 }
 0x3fa   : > { %v3743_v34 = vadd.f32 %v3695_v60, %v8894_v14 }
 0x3fb   : > { %v6418_v30 = vpop.f32.mrf.mxu1  ;;  %v6463_v41 = vpop.f32.mrf.mxu0 }
 0x3fc   : > { %v8936_v13 = vadd.f32 %v3972_v54, %v3743_v34 }
 0x3fd   : > { %v3698_v38 = vpop.f32.mrf.mxu1  ;;  %v3980_v24 = vpop.f32.mrf.mxu0 }
 0x3fe   : > { %v3744_v27 = vadd.f32 %v3698_v38, %v8898_v0 }
 0x3ff   : > { %v6419_v51 = vpop.f32.mrf.mxu1  ;;  %v6466_v43 = vpop.f32.mrf.mxu0 }
 0x400   : > { %v8939_v53 = vadd.f32 %v3975_v35, %v3744_v27 }
 0x401   : > { %v3703_v50 = vpop.f32.mrf.mxu1  ;;  %v3983_v8 = vpop.f32.mrf.mxu0 }
 0x402   : > { %v3745_v21 = vadd.f32 %v3703_v50, %v8903_v62 }
 0x403   : > { %v6422_v42 = vpop.f32.mrf.mxu1  ;;  %v6467_v63 = vpop.f32.mrf.mxu0 }
 0x404   : > { %v8942_v7 = vadd.f32 %v3980_v24, %v3745_v21 }
 0x405   : > { %v3706_v14 = vpop.f32.mrf.mxu1  ;;  %v3988_v32 = vpop.f32.mrf.mxu0 }
 0x406   : > { %v3746_v29 = vadd.f32 %v3706_v14, %v8906_v33 }
 0x407   : > { %v6423_v19 = vpop.f32.mrf.mxu1  ;;  %v6470_v17 = vpop.f32.mrf.mxu0 }
 0x408   : > { %v8945_v45 = vadd.f32 %v3983_v8, %v3746_v29 }
 0x409   : > { %v3711_v0 = vpop.f32.mrf.mxu1  ;;  %v3991_v18 = vpop.f32.mrf.mxu0 }
 0x40a   : > { %v3747_v2 = vadd.f32 %v3711_v0, %v8909_v15 }
 0x40b   : > { %v6426_v49 = vpop.f32.mrf.mxu1  ;;  %v6471_v48 = vpop.f32.mrf.mxu0 }
 0x40c   : > { %v8948_v1 = vadd.f32 %v3988_v32, %v3747_v2 }
 0x40d   : > { %v3714_v62 = vpop.f32.mrf.mxu1  ;;  %v3996_v44 = vpop.f32.mrf.mxu0 }
 0x40e   : > { %v3748_v9 = vadd.f32 %v3714_v62, %v8912_v25 }
 0x40f   : > { %v6427_v55 = vpop.f32.mrf.mxu1  ;;  %v6474_v4 = vpop.f32.mrf.mxu0 }
 0x410   : > { %v8951_v6 = vadd.f32 %v3991_v18, %v3748_v9 }
 0x411   : > { %v3719_v33 = vpop.f32.mrf.mxu1  ;;  %v3999_v61 = vpop.f32.mrf.mxu0 }
 0x412   : > { %v3749_v12 = vadd.f32 %v3719_v33, %v8915_v31 }
 0x413   : > { %v6430_v40 = vpop.f32.mrf.mxu1  ;;  %v6475_v11 = vpop.f32.mrf.mxu0 }
 0x414   : > { %v8954_v28 = vadd.f32 %v3996_v44, %v3749_v12 }
 0x415   : > { %v3722_v15 = vpop.f32.mrf.mxu1  ;;  %v4004_v58 = vpop.f32.mrf.mxu0 }
 0x416   : > { %v3750_v20 = vadd.f32 %v3722_v15, %v8918_v5 }
 0x417   : > { %v6431_v46 = vpop.f32.mrf.mxu1  ;;  %v6478_v36 = vpop.f32.mrf.mxu0 }
 0x418   : > { %v8957_v59 = vadd.f32 %v3999_v61, %v3750_v20 }
 0x419   : > { %v3727_v25 = vpop.f32.mrf.mxu1  ;;  %v4007_v39 = vpop.f32.mrf.mxu0 }
 0x41a   : > { %v3751_v52 = vadd.f32 %v3727_v25, %v8921_v3 }
 0x41b   : > { %v6434_v26 = vpop.f32.mrf.mxu1  ;;  %v6479_v54 = vpop.f32.mrf.mxu0 }
 0x41c   : > { %v8960_v22 = vadd.f32 %v4004_v58, %v3751_v52 }
 0x41d   : > { %v3730_v31 = vpop.f32.mrf.mxu1  ;;  %v4012_v10 = vpop.f32.mrf.mxu0 }
 0x41e   : > { %v3752_v23 = vadd.f32 %v3730_v31, %v8924_v56 }
 0x41f   : > { %v6435_v60 = vpop.f32.mrf.mxu1  ;;  %v6482_v35 = vpop.f32.mrf.mxu0 }
 0x420   : > { %v8963_v34 = vadd.f32 %v4007_v39, %v3752_v23 }
 0x421   : > { %v3735_v5 = vpop.f32.mrf.mxu1  ;;  %v4015_v30 = vpop.f32.mrf.mxu0 }
 0x422   : > { %v3753_v41 = vadd.f32 %v3735_v5, %v8927_v47 }
 0x423   : > { %v6438_v38 = vpop.f32.mrf.mxu1  ;;  %v6483_v24 = vpop.f32.mrf.mxu0 }
 0x424   : > { %v8966_v27 = vadd.f32 %v4012_v10, %v3753_v41 }
 0x425   : > { %v3738_v3 = vpop.f32.mrf.mxu1  ;;  %v4431_v51 = vpop.f32.mrf.mxu0 }
 0x427   : > { %v6439_v43 = vpop.f32.mrf.mxu1  ;;  %v6546_v50 = vpop.f32.mrf.mxu0 }
 0x429   : > { %v4241_v8 = vpop.f32.mrf.mxu1  ;;  %v4434_v21 = vpop.f32.mrf.mxu0 }
 0x42a   : > { %v4295_v56 = vadd.f32 %v4241_v8, %v8930_v37 }
 0x42b   : > { %v6502_v42 = vpop.f32.mrf.mxu1  ;;  %v6547_v63 = vpop.f32.mrf.mxu0 }
 0x42c   : > { %v8969_v14 = vadd.f32 %v4431_v51, %v4295_v56 }
 0x42d   : > { %v4244_v32 = vpop.f32.mrf.mxu1  ;;  %v4439_v29 = vpop.f32.mrf.mxu0 }
 0x42e   : > { %v4296_v47 = vadd.f32 %v4244_v32, %v8933_v57 }
 0x42f   : > { %v6503_v19 = vpop.f32.mrf.mxu1  ;;  %v6550_v17 = vpop.f32.mrf.mxu0 }
 0x430   : > { %v8972_v0 = vadd.f32 %v4434_v21, %v4296_v47 }
 0x431   : > { %v4249_v18 = vpop.f32.mrf.mxu1  ;;  %v4442_v2 = vpop.f32.mrf.mxu0 }
 0x432   : > { %v4297_v49 = vadd.f32 %v4249_v18, %v8936_v13 }
 0x433   : > { %v6506_v48 = vpop.f32.mrf.mxu1  ;;  %v6551_v62 = vpop.f32.mrf.mxu0 }
 0x434   : > { %v8975_v44 = vadd.f32 %v4439_v29, %v4297_v49 }
 0x435   : > { %v4252_v37 = vpop.f32.mrf.mxu1  ;;  %v4447_v9 = vpop.f32.mrf.mxu0 }
 0x436   : > { %v4298_v55 = vadd.f32 %v4252_v37, %v8939_v53 }
 0x437   : > { %v6507_v4 = vpop.f32.mrf.mxu1  ;;  %v6554_v33 = vpop.f32.mrf.mxu0 }
 0x438   : > { %v8978_v61 = vadd.f32 %v4442_v2, %v4298_v55 }
 0x439   : > { %v4257_v57 = vpop.f32.mrf.mxu1  ;;  %v4450_v12 = vpop.f32.mrf.mxu0 }
 0x43a   : > { %v4299_v40 = vadd.f32 %v4257_v57, %v8942_v7 }
 0x43b   : > { %v6510_v11 = vpop.f32.mrf.mxu1  ;;  %v6555_v15 = vpop.f32.mrf.mxu0 }
 0x43c   : > { %v8981_v58 = vadd.f32 %v4447_v9, %v4299_v40 }
 0x43d   : > { %v4260_v13 = vpop.f32.mrf.mxu1  ;;  %v4455_v20 = vpop.f32.mrf.mxu0 }
 0x43e   : > { %v4300_v46 = vadd.f32 %v4260_v13, %v8945_v45 }
 0x43f   : > { %v6511_v36 = vpop.f32.mrf.mxu1  ;;  %v6558_v25 = vpop.f32.mrf.mxu0 }
 0x440   : > { %v8984_v39 = vadd.f32 %v4450_v12, %v4300_v46 }
 0x441   : > { %v4265_v53 = vpop.f32.mrf.mxu1  ;;  %v4458_v52 = vpop.f32.mrf.mxu0 }
 0x442   : > { %v4301_v26 = vadd.f32 %v4265_v53, %v8948_v1 }
 0x443   : > { %v6514_v54 = vpop.f32.mrf.mxu1  ;;  %v6559_v31 = vpop.f32.mrf.mxu0 }
 0x444   : > { %v8987_v10 = vadd.f32 %v4455_v20, %v4301_v26 }
 0x445   : > { %v4268_v7 = vpop.f32.mrf.mxu1  ;;  %v4463_v23 = vpop.f32.mrf.mxu0 }
 0x446   : > { %v4302_v60 = vadd.f32 %v4268_v7, %v8951_v6 }
 0x447   : > { %v6515_v35 = vpop.f32.mrf.mxu1  ;;  %v6562_v5 = vpop.f32.mrf.mxu0 }
 0x448   : > { %v8990_v30 = vadd.f32 %v4458_v52, %v4302_v60  ;;  %v9019_v52 = vld [vmem:[%s9276_s1 + $0x8] sm:$0xff] }
 0x449   : > { %v4273_v45 = vpop.f32.mrf.mxu1  ;;  %v4466_v41 = vpop.f32.mrf.mxu0 }
 0x44a   : > { %v4303_v38 = vadd.f32 %v4273_v45, %v8954_v28 }
 0x44b   : > { %v6518_v24 = vpop.f32.mrf.mxu1  ;;  %v6563_v3 = vpop.f32.mrf.mxu0 }
 0x44c   : > { %v8993_v51 = vadd.f32 %v4463_v23, %v4303_v38 }
 0x44d   : > { %v4276_v1 = vpop.f32.mrf.mxu1  ;;  %v8995_v43 = vpop.f32.mrf.mxu0 }
 0x44e   : > { %v4304_v50 = vadd.f32 %v4276_v1, %v8957_v59 }
 0x44f   : > { %v6519_v8 = vpop.f32.mrf.mxu1  ;;  %v6566_v21 = vpop.f32.mrf.mxu0 }
 0x450   : > { %v8998_v6 = vadd.f32 %v4466_v41, %v4304_v50 }
 0x451   : > { %v9000_v56 = vpop.f32.mrf.mxu1  ;;  %v9002_v42 = vpop.f32.mrf.mxu0 }
 0x453   : > { %v6522_v63 = vpop.f32.mrf.mxu1  ;;  %v6567_v32 = vpop.f32.mrf.mxu0 }
 0x455   : > { %v9004_v28 = vpop.f32.mrf.mxu1  ;;  %v9006_v29 = vpop.f32.mrf.mxu0 }
 0x457   : > { %v6523_v47 = vpop.f32.mrf.mxu1  ;;  %v6570_v19 = vpop.f32.mrf.mxu0 }
 0x459   : > { %v9008_v17 = vpop.f32.mrf.mxu1  ;;  %v4482_v18 = vpop.f32.mrf.mxu0 }
 0x45b   : > { %v6526_v59 = vpop.f32.mrf.mxu1  ;;  %v6571_v2 = vpop.f32.mrf.mxu0 }
 0x45d   : > { %v4292_v49 = vpop.f32.mrf.mxu1 }
 0x45f   : > { %v6527_v48 = vpop.f32.mrf.mxu1 }
 0x461   : > { %v4645_v62 = vpop.f32.mrf.mxu1 }
 0x462   : > { %v4699_v13 = vadd.f32 %v4645_v62, %v8969_v14 }
 0x463   : > { %v6590_v37 = vpop.f32.mrf.mxu1 }
 0x464   : > { %v9021_v26 = vmax.f32 %v4699_v13, 0.0 }
 0x465   : > { %v4648_v9 = vpop.f32.mrf.mxu1 }
 0x466   : > { %v4700_v11 = vadd.f32 %v4648_v9, %v8972_v0  ;;  %v4305_v9 = vadd.f32 %v9000_v56, %v8960_v22  ;;  %v9101_v22 = vld [vmem:[%s9276_s1 + $0x40] sm:$0xff] }
 0x467   : > { %v6591_v55 = vpop.f32.mrf.mxu1 }
 0x468   : > { %v9013_v36 = vmax.f32 %v4700_v11, 0.0 }
 0x469   : > { %v4653_v4 = vpop.f32.mrf.mxu1 }
 0x46a   : > { %v4701_v20 = vadd.f32 %v4653_v4, %v8975_v44  ;;  %v9029_v44 = vld [vmem:[%s9276_s1] sm:$0xff]  ;;  %v4726_v31 = vmul.f32 %v9013_v36, %v9019_v52  ;;  %v9091_v4 = vld [vmem:[%s9276_s1 + $0x38] sm:$0xff] }
 0x46b   : > { %v6594_v33 = vpop.f32.mrf.mxu1  ;;  %v4725_v35 = vmul.f32 %v9021_v26, %v9029_v44 }
 0x46c   : > { %v9023_v54 = vmax.f32 %v4701_v20, 0.0  ;;  %v4757_v24 = vmul.f32 %v4726_v31, %v9013_v36 }
 0x46d   : > { %v4656_v57 = vpop.f32.mrf.mxu1  ;;  %v4756_v21 = vmul.f32 %v4725_v35, %v9021_v26  ;;  %v4738_v18 = vadd.f32 %v4726_v31, %v4725_v35 }
 0x46e   : > { %v4702_v25 = vadd.f32 %v4656_v57, %v8978_v61  ;;  %v9034_v61 = vld [vmem:[%s9276_s1 + $0x10] sm:$0xff] }
 0x46f   : > { %v6595_v12 = vpop.f32.mrf.mxu1  ;;  %v4727_v5 = vmul.f32 %v9023_v54, %v9034_v61  ;;  %v4769_v2 = vadd.f32 %v4757_v24, %v4756_v21 }
 0x470   : > { %v9038_v7 = vmax.f32 %v4702_v25, 0.0 }
 0x471   : > { %v4661_v40 = vpop.f32.mrf.mxu1  ;;  %v4758_v63 = vmul.f32 %v4727_v5, %v9023_v54  ;;  %v4739_v55 = vadd.f32 %v4738_v18, %v4727_v5 }
 0x472   : > { %v4703_v0 = vadd.f32 %v4661_v40, %v8981_v58  ;;  %v9044_v58 = vld [vmem:[%s9276_s1 + $0x18] sm:$0xff] }
 0x473   : > { %v6598_v15 = vpop.f32.mrf.mxu1  ;;  %v4728_v3 = vmul.f32 %v9038_v7, %v9044_v58  ;;  %v4770_v33 = vadd.f32 %v4769_v2, %v4758_v63 }
 0x474   : > { %v9050_v45 = vmax.f32 %v4703_v0, 0.0  ;;  %v4306_v15 = vadd.f32 %v9004_v28, %v8963_v34  ;;  %v9118_v34 = vld [vmem:[%s9276_s1 + $0x48] sm:$0xff] }
 0x475   : > { %v4664_v46 = vpop.f32.mrf.mxu1  ;;  %v4759_v49 = vmul.f32 %v4728_v3, %v9038_v7  ;;  %v4740_v11 = vadd.f32 %v4739_v55, %v4728_v3  ;;  %v4307_v3 = vadd.f32 %v9008_v17, %v8966_v27  ;;  %v9139_v27 = vld [vmem:[%s9276_s1 + $0x58] sm:$0xff] }
 0x476   : > { %v4704_v23 = vadd.f32 %v4664_v46, %v8984_v39  ;;  %v9056_v39 = vld [vmem:[%s9276_s1 + $0x20] sm:$0xff]  ;;  %v4496_v24 = vadd.f32 %v9002_v42, %v4306_v15 }
 0x477   : > { %v6599_v53 = vpop.f32.mrf.mxu1  ;;  %v4729_v32 = vmul.f32 %v9050_v45, %v9056_v39  ;;  %v4771_v13 = vadd.f32 %v4770_v33, %v4759_v49  ;;  %v4497_v17 = vadd.f32 %v9006_v29, %v4307_v3 }
 0x478   : > { %v9061_v1 = vmax.f32 %v4704_v23, 0.0 }
 0x479   : > { %v4669_v14 = vpop.f32.mrf.mxu1  ;;  %v4741_v53 = vadd.f32 %v4740_v11, %v4729_v32 }
 0x47a   : > { %v4705_v41 = vadd.f32 %v4669_v14, %v8987_v10  ;;  %v9067_v10 = vld [vmem:[%s9276_s1 + $0x28] sm:$0xff]  ;;  %v4495_v14 = vadd.f32 %v8995_v43, %v4305_v9  ;;  %v9124_v43 = vld [vmem:[%s9276_s1 + $0x50] sm:$0xff] }
 0x47b   : > { %v6602_v60 = vpop.f32.mrf.mxu1  ;;  %v4730_v48 = vmul.f32 %v9061_v1, %v9067_v10 }
 0x47c   : > { %v9073_v47 = vmax.f32 %v4705_v41, 0.0 }
 0x47d   : > { %v4672_v38 = vpop.f32.mrf.mxu1  ;;  %v4761_v20 = vmul.f32 %v4730_v48, %v9061_v1  ;;  %v4742_v60 = vadd.f32 %v4741_v53, %v4730_v48 }
 0x47e   : > { %v4706_v50 = vadd.f32 %v4672_v38, %v8990_v30  ;;  %v9078_v30 = vld [vmem:[%s9276_s1 + $0x30] sm:$0xff] }
 0x47f   : > { %v6603_v8 = vpop.f32.mrf.mxu1  ;;  %v4731_v57 = vmul.f32 %v9073_v47, %v9078_v30 }
 0x480   : > { %v9084_v62 = vmax.f32 %v4706_v50, 0.0 }
 0x481   : > { %v4677_v19 = vpop.f32.mrf.mxu1  ;;  %v4762_v23 = vmul.f32 %v4731_v57, %v9073_v47  ;;  %v4743_v50 = vadd.f32 %v4742_v60, %v4731_v57 }
 0x482   : > { %v4707_v59 = vadd.f32 %v4677_v19, %v8993_v51  ;;  %v4760_v51 = vmul.f32 %v4729_v32, %v9050_v45  ;;  %v4732_v46 = vmul.f32 %v9084_v62, %v9091_v4 }
 0x483   : > { %v6606_v37 = vpop.f32.mrf.mxu1 }
 0x484   : > { %v9096_v12 = vmax.f32 %v4707_v59, 0.0  ;;  %v4772_v31 = vadd.f32 %v4771_v13, %v4760_v51  ;;  %v4763_v41 = vmul.f32 %v4732_v46, %v9084_v62  ;;  %v4744_v18 = vadd.f32 %v4743_v50, %v4732_v46 }
 0x485   : > { %v4680_v40 = vpop.f32.mrf.mxu1 }
 0x486   : > { %v4708_v56 = vadd.f32 %v4680_v40, %v8998_v6  ;;  %v4733_v6 = vmul.f32 %v9096_v12, %v9101_v22  ;;  %v4773_v5 = vadd.f32 %v4772_v31, %v4761_v20 }
 0x487   : > { %v6607_v25 = vpop.f32.mrf.mxu1 }
 0x488   : > { %v9109_v0 = vmax.f32 %v4708_v56, 0.0  ;;  %v4774_v63 = vadd.f32 %v4773_v5, %v4762_v23  ;;  %v4764_v32 = vmul.f32 %v4733_v6, %v9096_v12  ;;  %v4745_v48 = vadd.f32 %v4744_v18, %v4733_v6  ;;  %v9151_v56 = vld [vmem:[%s9276_s1 + $0x60] sm:$0xff] }
 0x489   : > { %v4685_v28 = vpop.f32.mrf.mxu1 }
 0x48a   : > { %v4709_v35 = vadd.f32 %v4685_v28, %v4495_v14  ;;  %v4734_v8 = vmul.f32 %v9109_v0, %v9118_v34  ;;  %v4775_v49 = vadd.f32 %v4774_v63, %v4763_v41 }
 0x48b   : > { %v6610_v38 = vpop.f32.mrf.mxu1 }
 0x48c   : > { %v9131_v21 = vmax.f32 %v4709_v35, 0.0  ;;  %v4765_v37 = vmul.f32 %v4734_v8, %v9109_v0  ;;  %v4776_v55 = vadd.f32 %v4775_v49, %v4764_v32  ;;  %v4746_v51 = vadd.f32 %v4745_v48, %v4734_v8 }
 0x48d   : > { %v4688_v19 = vpop.f32.mrf.mxu1 }
 0x48e   : > { %v4735_v59 = vmul.f32 %v9131_v21, %v9124_v43  ;;  %v4710_v2 = vadd.f32 %v4688_v19, %v4496_v24  ;;  %v4777_v15 = vadd.f32 %v4776_v55, %v4765_v37 }
 0x48f   : > { %v6611_v42 = vpop.f32.mrf.mxu1 }
 0x490   : > { %v9143_v9 = vmax.f32 %v4710_v2, 0.0  ;;  %v4766_v57 = vmul.f32 %v4735_v59, %v9131_v21  ;;  %v4747_v13 = vadd.f32 %v4746_v51, %v4735_v59 }
 0x491   : > { %v4693_v33 = vpop.f32.mrf.mxu1 }
 0x492   : > { %v4736_v40 = vmul.f32 %v9143_v9, %v9139_v27  ;;  %v4711_v11 = vadd.f32 %v4693_v33, %v4497_v17  ;;  %v4778_v53 = vadd.f32 %v4777_v15, %v4766_v57 }
 0x493   : > { %v6614_v29 = vpop.f32.mrf.mxu1 }
 0x494   : > { %v4767_v20 = vmul.f32 %v4736_v40, %v9143_v9  ;;  %v9154_v46 = vmax.f32 %v4711_v11, 0.0  ;;  %v4748_v14 = vadd.f32 %v4747_v13, %v4736_v40 }
 0x495   : > { %v4696_v25 = vpop.f32.mrf.mxu1 }
 0x496   : > { %v4737_v31 = vmul.f32 %v9154_v46, %v9151_v56  ;;  %v4779_v6 = vadd.f32 %v4778_v53, %v4767_v20 }
 0x497   : > { %v6615_v23 = vpop.f32.mrf.mxu1 }
 0x498   : > { %v4768_v28 = vmul.f32 %v4737_v31, %v9154_v46  ;;  %v4749_v60 = vadd.f32 %v4748_v14, %v4737_v31 }
 0x49a   : > { %v4780_v35 = vadd.f32 %v4779_v6, %v4768_v28  ;;  %v4750_v5 = vrot.slane %v4749_v60, 4 }
 0x49c   : > { %v4781_v41 = vrot.slane %v4780_v35, 4  ;;  %v4751_v38 = vadd.f32 %v4750_v5, %v4749_v60 }
 0x49e   : > { %v4752_v24 = vrot.slane %v4751_v38, 2  ;;  %v4782_v3 = vadd.f32 %v4781_v41, %v4780_v35 }
 0x4a0   : > { %v4753_v50 = vadd.f32 %v4752_v24, %v4751_v38  ;;  %v4783_v8 = vrot.slane %v4782_v3, 2 }
 0x4a2   : > { %v4754_v63 = vrot.slane %v4753_v50, 1  ;;  %v4784_v32 = vadd.f32 %v4783_v8, %v4782_v3 }
 0x4a4   : > { %v4755_v19 = vadd.f32 %v4754_v63, %v4753_v50  ;;  %v4785_v18 = vrot.slane %v4784_v32, 1 }
 0x4a6   : > { %4787 = vrot.lane.b32.xlu1 %v4755_v19, %s6865_s11  ;;  %v4786_v59 = vadd.f32 %v4785_v18, %v4784_v32 }
 0x4aa   : > { %4790 = vrot.lane.b32.xlu1 %v4786_v59, %s6865_s11 }
 0x518   : > { %v4788_v2 = vpop.permute.xlu1 %4787 }
 0x519   : > { %v4789_v49 = vadd.f32 %v4788_v2, %v4755_v19 }
 0x51b   : > { %v4793_v17 = vmul.f32 0.0078125, %v4789_v49 }
 0x51c   : > { %v4791_v42 = vpop.permute.xlu1 %4790 }
 0x51d   : > { %v4792_v48 = vadd.f32 %v4791_v42, %v4786_v59  ;;  %v4795_v37 = vmul.f32 %v4793_v17, %v4793_v17  ;;  %v4801_v40 = vrot.slane %v4793_v17, %v8142_v16 }
 0x51f   : > { %v4794_v55 = vmul.f32 0.0078125, %v4792_v48  ;;  %v4802_v11 = vsub.f32 %v9021_v26, %v4801_v40  ;;  %v4803_v29 = vsub.f32 %v9013_v36, %v4801_v40  ;;  %v4804_v13 = vsub.f32 %v9023_v54, %v4801_v40 }
 0x520   : > { %v4805_v20 = vsub.f32 %v9038_v7, %v4801_v40  ;;  %v4806_v25 = vsub.f32 %v9050_v45, %v4801_v40  ;;  %v4807_v53 = vsub.f32 %v9061_v1, %v4801_v40  ;;  %v4808_v14 = vsub.f32 %v9073_v47, %v4801_v40  ;;  %v5454_v45 = vld [vmem:[%s9283_s8] ss:$0 sm:$0xff] }
 0x521   : > { %v4796_v33 = vsub.f32 %v4794_v55, %v4795_v37  ;;  %v4809_v31 = vsub.f32 %v9084_v62, %v4801_v40  ;;  %v4810_v23 = vsub.f32 %v9096_v12, %v4801_v40  ;;  %v4811_v26 = vsub.f32 %v9109_v0, %v4801_v40 }
 0x522   : > { %v4812_v36 = vsub.f32 %v9131_v21, %v4801_v40  ;;  %v4813_v54 = vsub.f32 %v9143_v9, %v4801_v40  ;;  %v4814_v7 = vsub.f32 %v9154_v46, %v4801_v40  ;;  %v5455_v9 = vld [vmem:[%s9284_s9] ss:$0 sm:$0xff] }
 0x523   : > { %v4797_v51 = vmax.f32 %v4796_v33, 0.0 }
 0x525   : > { %v4815_v57 = vadd.f32 1e-05, %v4797_v51 }
 0x527   : > { %6852 = vrsqrt.f32 %v4815_v57 }
 0x534   : > { %v6853_v15 = vpop.eup %6852 }
 0x535   : > { %v4820_v6 = vrot.slane %v6853_v15, %v8142_v16 }
 0x537   : > { %v4821_v1 = vmul.f32 %v4820_v6, %v4802_v11  ;;  %v4822_v47 = vmul.f32 %v4820_v6, %v4803_v29  ;;  %v4823_v28 = vmul.f32 %v4820_v6, %v4804_v13  ;;  %v4824_v62 = vmul.f32 %v4820_v6, %v4805_v20 }
 0x538   : > { %v4825_v60 = vmul.f32 %v4820_v6, %v4806_v25  ;;  %v4826_v12 = vmul.f32 %v4820_v6, %v4807_v53  ;;  %v4827_v35 = vmul.f32 %v4820_v6, %v4808_v14  ;;  %v4828_v16 = vmul.f32 %v4820_v6, %v4809_v31 }
 0x539   : > { %v4829_v5 = vmul.f32 %v4820_v6, %v4810_v23  ;;  %v4830_v0 = vmul.f32 %v4820_v6, %v4811_v26  ;;  %v4831_v41 = vmul.f32 %v4820_v6, %v4812_v36  ;;  %v4832_v21 = vmul.f32 %v4820_v6, %v4813_v54  ;;  %v4888_v26 = vld [vmem:[%s9286_s10 + $0x8] sm:$0xff]  ;;  %v4891_v54 = vld [vmem:[%s9286_s10 + $0x20] sm:$0xff] }
 0x53a   : > { %v4833_v46 = vmul.f32 %v4820_v6, %v4814_v7  ;;  %v4841_v38 = vmul.f32 %v5454_v45, %v4821_v1  ;;  %v4842_v24 = vmul.f32 %v5454_v45, %v4822_v47  ;;  %v4843_v3 = vmul.f32 %v5454_v45, %v4823_v28  ;;  %v4887_v6 = vld [vmem:[%s9286_s10] sm:$0xff]  ;;  %v4893_v7 = vld [vmem:[%s9286_s10 + $0x30] sm:$0xff]  ;;  %v4896_v28 = vld [vmem:[%s9286_s10 + $0x48] sm:$0xff] }
 0x53b   : > { %v4844_v50 = vmul.f32 %v5454_v45, %v4824_v62  ;;  %v4845_v8 = vmul.f32 %v5454_v45, %v4825_v60  ;;  %v4846_v63 = vmul.f32 %v5454_v45, %v4826_v12  ;;  %v4847_v32 = vmul.f32 %v5454_v45, %v4827_v35  ;;  %v4897_v62 = vld [vmem:[%s9286_s10 + $0x50] sm:$0xff]  ;;  %v4898_v60 = vld [vmem:[%s9286_s10 + $0x58] sm:$0xff]  ;;  %v4899_v12 = vld [vmem:[%s9286_s10 + $0x60] sm:$0xff] }
 0x53c   : > { %v4848_v19 = vmul.f32 %v5454_v45, %v4828_v16  ;;  %v4849_v18 = vmul.f32 %v5454_v45, %v4829_v5  ;;  %v4850_v59 = vmul.f32 %v5454_v45, %v4830_v0  ;;  %v4851_v2 = vmul.f32 %v5454_v45, %v4831_v41 }
 0x53d   : > { %v4852_v49 = vmul.f32 %v5454_v45, %v4832_v21  ;;  %v4853_v42 = vmul.f32 %v5454_v45, %v4833_v46  ;;  %v4861_v17 = vadd.f32 %v5455_v9, %v4841_v38  ;;  %v4862_v48 = vadd.f32 %v5455_v9, %v4842_v24  ;;  %v4894_v45 = vld [vmem:[%s9286_s10 + $0x38] sm:$0xff] }
 0x53e   : > { %v4863_v37 = vadd.f32 %v5455_v9, %v4843_v3  ;;  %v4864_v55 = vadd.f32 %v5455_v9, %v4844_v50  ;;  %v4865_v33 = vadd.f32 %v5455_v9, %v4845_v8  ;;  %v4866_v51 = vadd.f32 %v5455_v9, %v4846_v63 }
 0x53f   : > { %v4867_v57 = vadd.f32 %v5455_v9, %v4847_v32  ;;  %v4868_v40 = vadd.f32 %v5455_v9, %v4848_v19  ;;  %v4869_v11 = vadd.f32 %v5455_v9, %v4849_v18  ;;  %v4870_v29 = vadd.f32 %v5455_v9, %v4850_v59 }
 0x540   : > { %v4871_v15 = vadd.f32 %v5455_v9, %v4851_v2  ;;  %v4872_v13 = vadd.f32 %v5455_v9, %v4852_v49  ;;  %v4873_v20 = vadd.f32 %v5455_v9, %v4853_v42  ;;  %v4874_v25 = vmul.f32 %v4861_v17, %v9029_v44 }
 0x541   : > { %v4875_v53 = vmul.f32 %v4862_v48, %v9019_v52  ;;  %v4876_v14 = vmul.f32 %v4863_v37, %v9034_v61  ;;  %v4877_v31 = vmul.f32 %v4864_v55, %v9044_v58  ;;  %v4878_v23 = vmul.f32 %v4865_v33, %v9056_v39  ;;  %v4889_v58 = vld [vmem:[%s9286_s10 + $0x10] sm:$0xff]  ;;  %v4890_v39 = vld [vmem:[%s9286_s10 + $0x18] sm:$0xff] }
 0x542   : > { %v4879_v36 = vmul.f32 %v4866_v51, %v9067_v10  ;;  %v4880_v44 = vmul.f32 %v4867_v57, %v9078_v30  ;;  %v4881_v52 = vmul.f32 %v4868_v40, %v9091_v4  ;;  %v4882_v61 = vmul.f32 %v4869_v11, %v9101_v22  ;;  %v4892_v22 = vld [vmem:[%s9286_s10 + $0x28] sm:$0xff] }
 0x543   : > { %v4883_v10 = vmul.f32 %v4870_v29, %v9118_v34  ;;  %v4884_v30 = vmul.f32 %v4871_v15, %v9124_v43  ;;  %v4885_v4 = vmul.f32 %v4872_v13, %v9139_v27  ;;  %v4895_v34 = vld [vmem:[%s9286_s10 + $0x40] sm:$0xff]  ;;  %v4886_v43 = vmul.f32 %v4873_v20, %v9151_v56 }
 0x544   : > { %v4900_v1 = vmul.f32 0.05, %v4874_v25  ;;  %v4901_v27 = vmul.f32 0.05, %v4875_v53  ;;  %v4902_v47 = vmul.f32 0.05, %v4876_v14 }
 0x545   : > { %v4903_v56 = vmul.f32 0.05, %v4877_v31  ;;  %v4904_v35 = vmul.f32 0.05, %v4878_v23  ;;  %v4905_v16 = vmul.f32 0.05, %v4879_v36 }
 0x546   : > { %v4906_v5 = vmul.f32 0.05, %v4880_v44  ;;  %v4907_v0 = vmul.f32 0.05, %v4881_v52  ;;  %v4908_v41 = vmul.f32 0.05, %v4882_v61  ;;  %v4913_v21 = vadd.f32 %v4900_v1, %v4887_v6 }
 0x547   : > { %v4909_v9 = vmul.f32 0.05, %v4883_v10  ;;  %v4910_v46 = vmul.f32 0.05, %v4884_v30  ;;  %v4911_v38 = vmul.f32 0.05, %v4885_v4  ;;  %v4914_v24 = vadd.f32 %v4901_v27, %v4888_v26 }
 0x548   : > { %v4912_v3 = vmul.f32 0.05, %v4886_v43  ;;  %v4915_v50 = vadd.f32 %v4902_v47, %v4889_v58  ;;  %v4916_v8 = vadd.f32 %v4903_v56, %v4890_v39  ;;  %v4917_v63 = vadd.f32 %v4904_v35, %v4891_v54  ;;  %4926 = vst [vmem:[%s9286_s10] sm:$0xff] %v4913_v21 }
 0x549   : > { %v4918_v32 = vadd.f32 %v4905_v16, %v4892_v22  ;;  %v4919_v19 = vadd.f32 %v4906_v5, %v4893_v7  ;;  %v4920_v18 = vadd.f32 %v4907_v0, %v4894_v45  ;;  %v4921_v59 = vadd.f32 %v4908_v41, %v4895_v34  ;;  %4927 = vst [vmem:[%s9286_s10 + $0x8] sm:$0xff] %v4914_v24 }
 0x54a   : > { %v4922_v2 = vadd.f32 %v4909_v9, %v4896_v28  ;;  %v4923_v49 = vadd.f32 %v4910_v46, %v4897_v62  ;;  %v4924_v42 = vadd.f32 %v4911_v38, %v4898_v60  ;;  %v4925_v17 = vadd.f32 %v4912_v3, %v4899_v12  ;;  %4928 = vst [vmem:[%s9286_s10 + $0x10] sm:$0xff] %v4915_v50 }
 0x54b   : > { %4929 = vst [vmem:[%s9286_s10 + $0x18] sm:$0xff] %v4916_v8  ;;  %4930 = vst [vmem:[%s9286_s10 + $0x20] sm:$0xff] %v4917_v63 }
 0x54c   : > { %4931 = vst [vmem:[%s9286_s10 + $0x28] sm:$0xff] %v4918_v32  ;;  %4932 = vst [vmem:[%s9286_s10 + $0x30] sm:$0xff] %v4919_v19  ;;  %84 = sbr.rel (!%p82_p0) target bundleno = 16 (0x10), region = 83 }
 0x54d   : > { %4933 = vst [vmem:[%s9286_s10 + $0x38] sm:$0xff] %v4920_v18  ;;  %4934 = vst [vmem:[%s9286_s10 + $0x40] sm:$0xff] %v4921_v59 }
 0x54e   : > { %4935 = vst [vmem:[%s9286_s10 + $0x48] sm:$0xff] %v4922_v2  ;;  %4936 = vst [vmem:[%s9286_s10 + $0x50] sm:$0xff] %v4923_v49 }
 0x54f   : > { %4937 = vst [vmem:[%s9286_s10 + $0x58] sm:$0xff] %v4924_v42  ;;  %4938 = vst [vmem:[%s9286_s10 + $0x60] sm:$0xff] %v4925_v17 }

</bundles_post_ra>
